<compile_context>
chip_gen: v6e
topology: v6e:2x2x1
jax: 0.10.0
libtpu: 0.0.40
codegen_flags: <defaults>
</compile_context>

<pallas_src>
import math

import jax
import jax.numpy as jnp
from jax.experimental import pallas as pl
from jax.experimental.pallas import tpu as pltpu


# -----------------------------------------------------------------------------
# Kernel
# -----------------------------------------------------------------------------
def mha_kernel(q_ref, kT_ref, v_ref,
               wq_ref, bq_ref, wk_ref, bk_ref, wv_ref, bv_ref,
               wo_ref, bo_ref,
               out_ref,
               kproj_ref, vproj_ref, ctx_ref):
    """One grid step = one (batch, query-tile) pair.

    Scratch:
      kproj_ref : (H, d_k, Sk)  per-head projected K, stored transposed
      vproj_ref : (H, Sk, d_k)  per-head projected V
      ctx_ref   : (TQ, D)       per-head context written at lane offset h*d_k

    K/V projections for the current batch element are computed once (qi == 0)
    and reused by every query tile of that batch.  Correctness of that cache
    relies on the grid order: b is the outer ("parallel") axis and qi the
    inner ("arbitrary") one, so every batch element starts at qi == 0 on the
    core that owns it.
    """
    qi = pl.program_id(1)
    cdt = q_ref.dtype                                  # MXU compute dtype
    num_heads, _, d_k = wq_ref.shape
    inv_sqrt_dk = 1.0 / math.sqrt(d_k)

    # ---- cache per-head K^T / V projections for this batch element ----------
    @pl.when(qi == 0)
    def _():
        kT = kT_ref[0]                                 # (D, Sk), key pre-transposed
        v_in = v_ref[0]                                # (Sk, D)
        for h in range(num_heads):
            # K head h, stored transposed: (d_k, D) @ (D, Sk) -> (d_k, Sk).
            kproj_ref[h] = (jnp.dot(wk_ref[h], kT,
                                    preferred_element_type=jnp.float32)
                            + bk_ref[h]).astype(cdt)
            # V head h: (Sk, D) @ (D, d_k) -> (Sk, d_k).
            vproj_ref[h] = (jnp.dot(v_in, wv_ref[h],
                                    preferred_element_type=jnp.float32)
                            + bv_ref[h]).astype(cdt)

    q_in = q_ref[0]                                    # (TQ, D)

    # ---- per-head attention --------------------------------------------------
    # Static unroll keeps the ctx store offsets static (no dynamic lane-dim
    # stores); each head's (TQ, Sk) intermediates die at its ctx store, so live
    # ranges stay bounded per head.
    # TODO(synk): for very large head counts move heads onto a grid axis (or a
    # fori_loop over a (H, TQ, d_k) ctx scratch) to also bound code size.
    for h in range(num_heads):
        lo = h * d_k
        # Per-head Q projection (leading-axis weight -> no lane slicing of qp).
        qh = jnp.dot(q_in, wq_ref[h], preferred_element_type=jnp.float32)
        # Fold 1/sqrt(d_k) into q: O(TQ*d_k) instead of O(TQ*Sk) on the scores.
        qh = ((qh + bq_ref[h]) * inv_sqrt_dk).astype(cdt)          # (TQ, d_k)

        # scores = qh @ K_h^T; K cached pre-transposed -> plain (M,K)@(K,N).
        s = jnp.dot(qh, kproj_ref[h], preferred_element_type=jnp.float32)

        # Numerically-stable softmax, normalization deferred past the PV matmul.
        m = jnp.max(s, axis=-1, keepdims=True)
        e = jnp.exp(s - m)                                         # f32 (EUP)
        # TODO(synk): on v6e/v7x the exp could run in bf16 (~2x EUP rate); kept
        # f32 so the same kernel stays accurate on v5e (no bf16 EUP).
        l = jnp.sum(e, axis=-1, keepdims=True)                     # (TQ, 1) f32

        ctx = jnp.dot(e.astype(cdt), vproj_ref[h],
                      preferred_element_type=jnp.float32)          # (TQ, d_k)
        # Deferred normalization; approx reciprocal -> row sums off by ~1e-3
        # relative (use approx=False if bit-parity with PyTorch softmax matters).
        ctx = ctx * pl.reciprocal(l, approx=True)
        ctx_ref[:, lo:lo + d_k] = ctx.astype(cdt)

    # ---- single full-width output projection (full MXU fill) ------------------
    out = jnp.dot(ctx_ref[...], wo_ref[...],
                  preferred_element_type=jnp.float32) + bo_ref[...]
    out_ref[0] = out.astype(out_ref.dtype)


# -----------------------------------------------------------------------------
# Tiling / VMEM planning
# -----------------------------------------------------------------------------
def _vmem_capacity_bytes():
    """Physical per-core VMEM (128 MiB on v5e/v6e, 64 MiB on v7x)."""
    try:
        info = pltpu.get_tpu_info()
        for attr in ("vmem_capacity_bytes", "vmem_bytes"):
            cap = getattr(info, attr, None)
            if cap:
                return int(cap)
    except Exception:
        pass
    return 64 * 1024 * 1024            # conservative fallback (v7x per-core)


def _vmem_bytes(tq, Sk, D, cbytes, obytes):
    """Rough per-core VMEM footprint for a given query-tile size."""
    weights = 2 * 4 * D * D * cbytes           # 4 weight mats; budget 2 buffers in
                                               # case Buffered(1) falls back
    kv_in = 2 * 2 * Sk * D * cbytes            # K^T + V inputs, double-buffered
    kv_scr = 2 * Sk * D * cbytes               # cached projected K^T / V scratch
    q_io = 2 * tq * D * (cbytes + obytes)      # q in + out tiles, double-buffered
    ctx = tq * D * cbytes                      # concat-context scratch
    scores = 3 * tq * Sk * 4                   # f32 scores / exp live per head
    return weights + kv_in + kv_scr + q_io + ctx + scores


def _plan_q_tile(S, Sk, D, cbytes, obytes, vmem_limit):
    """Largest 128-multiple query tile whose working set fits the VMEM budget."""
    if S <= 128:
        return S                               # tiny / odd sequence: one tile
    budget = int(vmem_limit * 0.85)
    rounded_s = -(-S // 128) * 128
    tq = 128
    for cand in (256, 512, 1024):
        if cand <= rounded_s and _vmem_bytes(cand, Sk, D, cbytes, obytes) <= budget:
            tq = cand
    # TODO(synk): if even tq=128 exceeds the budget (huge Sk*D), stream K/V
    # flash-style instead of caching the whole projected K/V per batch element.
    return tq


# -----------------------------------------------------------------------------
# Wrapper
# -----------------------------------------------------------------------------
def multi_head_attention(query, key, value, params, num_heads, *,
                         compute_dtype=jnp.bfloat16):
    """Forward pass of the PyTorch MultiHeadAttention module (eval mode).

    params: dict with 'wq','bq','wk','bk','wv','bv','wo','bo' in PyTorch Linear
    layout (W is (out_features, in_features); y = x @ W.T + b).

    compute_dtype: dtype fed to the MXU matmuls (accumulation is always f32).
    Default bf16 (2-4x MXU rate and half the DMA/VMEM bytes on v5e/v6e/v7x);
    pass jnp.float32 for closer parity with the float32 PyTorch module, or
    None to use the input dtype.
    """
    B, S, D = query.shape
    H = num_heads
    assert D % H == 0, "d_model must be divisible by num_heads"
    d_k = D // H
    Bk, Sk, Dk = key.shape
    assert Bk == B and Dk == D and value.shape == key.shape

    cdt = query.dtype if compute_dtype is None else compute_dtype
    out_dtype = query.dtype
    cbytes = jnp.dtype(cdt).itemsize
    obytes = jnp.dtype(out_dtype).itemsize

    vmem_limit = max(32 * 1024 * 1024, int(_vmem_capacity_bytes() * 0.85))
    tq = _plan_q_tile(S, Sk, D, cbytes, obytes, vmem_limit)
    s_pad = -(-S // tq) * tq

    # Pre-arrange weights per head (leading head axis) so the kernel never
    # lane-slices.  PyTorch Linear: y = x @ W.T + b; head h = output columns
    # [h*d_k, (h+1)*d_k) of x @ W.T.
    wq_h = params["wq"].T.reshape(D, H, d_k).transpose(1, 0, 2).astype(cdt)  # (H, D, d_k)
    wv_h = params["wv"].T.reshape(D, H, d_k).transpose(1, 0, 2).astype(cdt)  # (H, D, d_k)
    wk_h = params["wk"].reshape(H, d_k, D).astype(cdt)   # (H, d_k, D): per-head (Wk.T)^T
    wo_t = params["wo"].T.astype(cdt)                    # (D, D)
    bq_h = params["bq"].reshape(H, 1, d_k).astype(jnp.float32)
    bk_h = params["bk"].reshape(H, d_k, 1).astype(jnp.float32)
    bv_h = params["bv"].reshape(H, 1, d_k).astype(jnp.float32)
    bo = params["bo"].reshape(1, D).astype(jnp.float32)

    q_c = query.astype(cdt)
    if s_pad != S:
        # Zero-pad odd sequence lengths; padded rows are sliced off below.
        q_c = jnp.pad(q_c, ((0, 0), (0, s_pad - S), (0, 0)))
    kT_c = key.transpose(0, 2, 1).astype(cdt)            # (B, D, Sk): K pre-transposed
    v_c = value.astype(cdt)

    grid = (B, s_pad // tq)
    # b must stay the OUTER axis and qi the INNER one: the projected-K/V scratch
    # is refilled at qi == 0 of each batch element.
    dim_sem = ("parallel", "arbitrary")
    # TODO(synk): on v7x with B == 1 only one TensorCore gets work; hoist the
    # K/V projection out of the kernel (or add a core-split axis) to parallelize
    # over qi instead.

    def call(single_buffer_invariants):
        def const_spec(shape):
            kw = {}
            if single_buffer_invariants:
                # Grid-invariant blocks: one buffer is enough; halves their VMEM.
                kw["pipeline_mode"] = pl.Buffered(1)
            return pl.BlockSpec(shape, lambda b, qi: (0,) * len(shape), **kw)

        q_spec = pl.BlockSpec((1, tq, D), lambda b, qi: (b, qi, 0))
        kT_spec = pl.BlockSpec((1, D, Sk), lambda b, qi: (b, 0, 0))
        v_spec = pl.BlockSpec((1, Sk, D), lambda b, qi: (b, 0, 0))
        # TODO(synk): the K/V input blocks are invariant over qi as well; single-
        # buffer them too once Buffered(1) on batch-varying blocks is verified.
        out_spec = pl.BlockSpec((1, tq, D), lambda b, qi: (b, qi, 0))

        return pl.pallas_call(
            mha_kernel,
            out_shape=jax.ShapeDtypeStruct((B, s_pad, D), out_dtype),
            grid_spec=pltpu.PrefetchScalarGridSpec(
                num_scalar_prefetch=0,
                grid=grid,
                in_specs=[q_spec, kT_spec, v_spec,
                          const_spec((H, D, d_k)), const_spec((H, 1, d_k)),
                          const_spec((H, d_k, D)), const_spec((H, d_k, 1)),
                          const_spec((H, D, d_k)), const_spec((H, 1, d_k)),
                          const_spec((D, D)), const_spec((1, D))],
                out_specs=out_spec,
                scratch_shapes=[pltpu.VMEM((H, d_k, Sk), cdt),   # cached K^T per head
                                pltpu.VMEM((H, Sk, d_k), cdt),   # cached V per head
                                pltpu.VMEM((tq, D), cdt)]),      # concat context
            compiler_params=pltpu.CompilerParams(
                dimension_semantics=dim_sem,
                vmem_limit_bytes=vmem_limit),
        )(q_c, kT_c, v_c, wq_h, bq_h, wk_h, bk_h, wv_h, bv_h, wo_t, bo)

    try:
        out = call(True)
    except Exception:
        # pipeline_mode=pl.Buffered(1) support is version-dependent; fall back
        # to default double-buffered invariant blocks if lowering rejects it.
        out = call(False)

    if s_pad != S:
        out = out[:, :S, :]
    return out


# -----------------------------------------------------------------------------
# Pure-JAX reference (mirrors the PyTorch forward exactly, eval mode)
# -----------------------------------------------------------------------------
def mha_reference(query, key, value, params, num_heads):
    B, S, D = query.shape
    d_k = D // num_heads

    def lin(x, w, b):
        return x @ w.T + b

    def split_heads(x):                    # (B,S,D) -> (B,h,S,d_k)
        return x.reshape(B, -1, num_heads, d_k).transpose(0, 2, 1, 3)

    q = split_heads(lin(query, params["wq"], params["bq"]))
    k = split_heads(lin(key, params["wk"], params["bk"]))
    v = split_heads(lin(value, params["wv"], params["bv"]))

    scores = jnp.einsum("bhqd,bhkd->bhqk", q, k) / math.sqrt(d_k)
    p = jax.nn.softmax(scores, axis=-1)
    x = jnp.einsum("bhqk,bhkd->bhqd", p, v)
    x = x.transpose(0, 2, 1, 3).reshape(B, S, D)
    return lin(x, params["wo"], params["bo"])


if __name__ == "__main__":
    B, S, D, H = 2, 8, 32, 4

    key0 = jax.random.PRNGKey(0)
    keys = jax.random.split(key0, 12)

    # Deterministic parameter init (PyTorch Linear shapes: W (D,D), b (D,))
    bound = 1.0 / math.sqrt(D)
    params = {
        "wq": jax.random.uniform(keys[0], (D, D), jnp.float32, -bound, bound),
        "bq": jax.random.uniform(keys[1], (D,), jnp.float32, -bound, bound),
        "wk": jax.random.uniform(keys[2], (D, D), jnp.float32, -bound, bound),
        "bk": jax.random.uniform(keys[3], (D,), jnp.float32, -bound, bound),
        "wv": jax.random.uniform(keys[4], (D, D), jnp.float32, -bound, bound),
        "bv": jax.random.uniform(keys[5], (D,), jnp.float32, -bound, bound),
        "wo": jax.random.uniform(keys[6], (D, D), jnp.float32, -bound, bound),
        "bo": jax.random.uniform(keys[7], (D,), jnp.float32, -bound, bound),
    }

    query = jax.random.normal(keys[8], (B, S, D), jnp.float32)
    key_in = jax.random.normal(keys[9], (B, S, D), jnp.float32)
    value = jax.random.normal(keys[10], (B, S, D), jnp.float32)

    ref = mha_reference(query, key_in, value, params, H)

    # Default path: bf16 MXU compute with f32 accumulation.
    out = multi_head_attention(query, key_in, value, params, H)
    out = jax.block_until_ready(out)
    assert out.shape == (B, S, D)
    assert bool(jnp.all(jnp.isfinite(out)))
    assert jnp.allclose(out, ref, atol=5e-2, rtol=5e-2), "bf16 path off vs reference"

    # f32 compute path: matches the PyTorch module (tolerance covers the approx
    # reciprocal used for the softmax denominator).
    out_f32 = multi_head_attention(query, key_in, value, params, H,
                                   compute_dtype=jnp.float32)
    out_f32 = jax.block_until_ready(out_f32)
    assert out_f32.shape == (B, S, D)
    assert jnp.allclose(out_f32, ref, atol=2e-3, rtol=2e-3), "f32 path mismatch"

    print("KERNEL_OK")
</pallas_src>

<mosaic_0001>
module attributes {stable_mosaic.version = 11 : i64} {
  func.func @mha_kernel(%arg0: i32, %arg1: i32, %arg2: memref<1x8x32xbf16, #tpu.memory_space<vmem>>, %arg3: memref<1x32x8xbf16, #tpu.memory_space<vmem>>, %arg4: memref<1x8x32xbf16, #tpu.memory_space<vmem>>, %arg5: memref<4x32x8xbf16, #tpu.memory_space<vmem>>, %arg6: memref<4x1x8xf32, #tpu.memory_space<vmem>>, %arg7: memref<4x8x32xbf16, #tpu.memory_space<vmem>>, %arg8: memref<4x8x1xf32, #tpu.memory_space<vmem>>, %arg9: memref<4x32x8xbf16, #tpu.memory_space<vmem>>, %arg10: memref<4x1x8xf32, #tpu.memory_space<vmem>>, %arg11: memref<32x32xbf16, #tpu.memory_space<vmem>>, %arg12: memref<1x32xf32, #tpu.memory_space<vmem>>, %arg13: memref<1x8x32xf32, #tpu.memory_space<vmem>>, %arg14: memref<4x8x8xbf16, #tpu.memory_space<vmem>>, %arg15: memref<4x8x8xbf16, #tpu.memory_space<vmem>>, %arg16: memref<8x32xbf16, #tpu.memory_space<vmem>>) attributes {dimension_semantics = [#tpu.dimension_semantics<parallel>, #tpu.dimension_semantics<arbitrary>], iteration_bounds = array<i64: 2, 1>, scalar_prefetch = 0 : i64, scratch_operands = 3 : i64, tpu.core_type = #tpu.core_type<tc>, window_params = [{transform_indices = @transform_0, window_bounds = array<i64: 1, 8, 32>}, {transform_indices = @transform_1, window_bounds = array<i64: 1, 32, 8>}, {transform_indices = @transform_2, window_bounds = array<i64: 1, 8, 32>}, {pipeline_mode = #tpu.pipeline_mode<synchronous>, transform_indices = @transform_3, window_bounds = array<i64: 4, 32, 8>}, {pipeline_mode = #tpu.pipeline_mode<synchronous>, transform_indices = @transform_4, window_bounds = array<i64: 4, 1, 8>}, {pipeline_mode = #tpu.pipeline_mode<synchronous>, transform_indices = @transform_5, window_bounds = array<i64: 4, 8, 32>}, {pipeline_mode = #tpu.pipeline_mode<synchronous>, transform_indices = @transform_6, window_bounds = array<i64: 4, 8, 1>}, {pipeline_mode = #tpu.pipeline_mode<synchronous>, transform_indices = @transform_7, window_bounds = array<i64: 4, 32, 8>}, {pipeline_mode = #tpu.pipeline_mode<synchronous>, transform_indices = @transform_8, window_bounds = array<i64: 4, 1, 8>}, {pipeline_mode = #tpu.pipeline_mode<synchronous>, transform_indices = @transform_9, window_bounds = array<i64: 32, 32>}, {pipeline_mode = #tpu.pipeline_mode<synchronous>, transform_indices = @transform_10, window_bounds = array<i64: 1, 32>}, {transform_indices = @transform_11, window_bounds = array<i64: 1, 8, 32>}]} {
    %c0_i32 = arith.constant 0 : i32
    %0 = arith.cmpi eq, %arg1, %c0_i32 : i32
    %1 = arith.extui %0 : i1 to i32
    %c0_i32_0 = arith.constant 0 : i32
    %2 = arith.cmpi ne, %1, %c0_i32_0 : i32
    scf.if %2 {
      %c0_86 = arith.constant 0 : index
      %c0_87 = arith.constant 0 : index
      %c0_88 = arith.constant 0 : index
      %130 = vector.load %arg3[%c0_86, %c0_87, %c0_88] : memref<1x32x8xbf16, #tpu.memory_space<vmem>>, vector<1x32x8xbf16>
      %131 = vector.shape_cast %130 : vector<1x32x8xbf16> to vector<32x8xbf16>
      %c0_89 = arith.constant 0 : index
      %c0_90 = arith.constant 0 : index
      %c0_91 = arith.constant 0 : index
      %132 = vector.load %arg4[%c0_89, %c0_90, %c0_91] : memref<1x8x32xbf16, #tpu.memory_space<vmem>>, vector<1x8x32xbf16>
      %133 = vector.shape_cast %132 : vector<1x8x32xbf16> to vector<8x32xbf16>
      %c0_92 = arith.constant 0 : index
      %c0_93 = arith.constant 0 : index
      %c0_94 = arith.constant 0 : index
      %134 = vector.load %arg7[%c0_92, %c0_93, %c0_94] : memref<4x8x32xbf16, #tpu.memory_space<vmem>>, vector<1x8x32xbf16>
      %135 = vector.shape_cast %134 : vector<1x8x32xbf16> to vector<8x32xbf16>
      %cst_95 = arith.constant dense<0.000000e+00> : vector<8x8xf32>
      %136 = tpu.matmul %135, %131, %cst_95 {dimension_numbers = #tpu.dot_dimension_numbers<[1], [0], [0], [1], [0, 0, 1, 1], [], []>} : vector<8x32xbf16>, vector<32x8xbf16>, vector<8x8xf32> -> vector<8x8xf32>
      %c0_96 = arith.constant 0 : index
      %c0_97 = arith.constant 0 : index
      %c0_98 = arith.constant 0 : index
      %137 = vector.load %arg8[%c0_96, %c0_97, %c0_98] : memref<4x8x1xf32, #tpu.memory_space<vmem>>, vector<1x8x1xf32>
      %138 = vector.shape_cast %137 : vector<1x8x1xf32> to vector<8x1xf32>
      %139 = vector.broadcast %138 : vector<8x1xf32> to vector<8x8xf32>
      %140 = arith.addf %136, %139 : vector<8x8xf32>
      %141 = arith.truncf %140 : vector<8x8xf32> to vector<8x8xbf16>
      %c0_99 = arith.constant 0 : index
      %c0_100 = arith.constant 0 : index
      %c0_101 = arith.constant 0 : index
      %142 = vector.load %arg14[%c0_99, %c0_100, %c0_101] : memref<4x8x8xbf16, #tpu.memory_space<vmem>>, vector<1x8x8xbf16>
      %143 = vector.shape_cast %142 : vector<1x8x8xbf16> to vector<8x8xbf16>
      %144 = vector.shape_cast %141 : vector<8x8xbf16> to vector<1x8x8xbf16>
      tpu.vector_store %arg14[%c0_99, %c0_100, %c0_101], %144 {strides = array<i32>} : memref<4x8x8xbf16, #tpu.memory_space<vmem>>, vector<1x8x8xbf16>,
      %c0_102 = arith.constant 0 : index
      %c0_103 = arith.constant 0 : index
      %c0_104 = arith.constant 0 : index
      %145 = vector.load %arg9[%c0_102, %c0_103, %c0_104] : memref<4x32x8xbf16, #tpu.memory_space<vmem>>, vector<1x32x8xbf16>
      %146 = vector.shape_cast %145 : vector<1x32x8xbf16> to vector<32x8xbf16>
      %cst_105 = arith.constant dense<0.000000e+00> : vector<8x8xf32>
      %147 = tpu.matmul %133, %146, %cst_105 {dimension_numbers = #tpu.dot_dimension_numbers<[1], [0], [0], [1], [0, 0, 1, 1], [], []>} : vector<8x32xbf16>, vector<32x8xbf16>, vector<8x8xf32> -> vector<8x8xf32>
      %c0_106 = arith.constant 0 : index
      %c0_107 = arith.constant 0 : index
      %c0_108 = arith.constant 0 : index
      %148 = vector.load %arg10[%c0_106, %c0_107, %c0_108] : memref<4x1x8xf32, #tpu.memory_space<vmem>>, vector<1x1x8xf32>
      %149 = vector.shape_cast %148 : vector<1x1x8xf32> to vector<1x8xf32>
      %150 = vector.broadcast %149 : vector<1x8xf32> to vector<8x8xf32>
      %151 = arith.addf %147, %150 : vector<8x8xf32>
      %152 = arith.truncf %151 : vector<8x8xf32> to vector<8x8xbf16>
      %c0_109 = arith.constant 0 : index
      %c0_110 = arith.constant 0 : index
      %c0_111 = arith.constant 0 : index
      %153 = vector.load %arg15[%c0_109, %c0_110, %c0_111] : memref<4x8x8xbf16, #tpu.memory_space<vmem>>, vector<1x8x8xbf16>
      %154 = vector.shape_cast %153 : vector<1x8x8xbf16> to vector<8x8xbf16>
      %155 = vector.shape_cast %152 : vector<8x8xbf16> to vector<1x8x8xbf16>
      tpu.vector_store %arg15[%c0_109, %c0_110, %c0_111], %155 {strides = array<i32>} : memref<4x8x8xbf16, #tpu.memory_space<vmem>>, vector<1x8x8xbf16>,
      %c1_112 = arith.constant 1 : index
      %c0_113 = arith.constant 0 : index
      %c0_114 = arith.constant 0 : index
      %156 = vector.load %arg7[%c1_112, %c0_113, %c0_114] : memref<4x8x32xbf16, #tpu.memory_space<vmem>>, vector<1x8x32xbf16>
      %157 = vector.shape_cast %156 : vector<1x8x32xbf16> to vector<8x32xbf16>
      %cst_115 = arith.constant dense<0.000000e+00> : vector<8x8xf32>
      %158 = tpu.matmul %157, %131, %cst_115 {dimension_numbers = #tpu.dot_dimension_numbers<[1], [0], [0], [1], [0, 0, 1, 1], [], []>} : vector<8x32xbf16>, vector<32x8xbf16>, vector<8x8xf32> -> vector<8x8xf32>
      %c1_116 = arith.constant 1 : index
      %c0_117 = arith.constant 0 : index
      %c0_118 = arith.constant 0 : index
      %159 = vector.load %arg8[%c1_116, %c0_117, %c0_118] : memref<4x8x1xf32, #tpu.memory_space<vmem>>, vector<1x8x1xf32>
      %160 = vector.shape_cast %159 : vector<1x8x1xf32> to vector<8x1xf32>
      %161 = vector.broadcast %160 : vector<8x1xf32> to vector<8x8xf32>
      %162 = arith.addf %158, %161 : vector<8x8xf32>
      %163 = arith.truncf %162 : vector<8x8xf32> to vector<8x8xbf16>
      %c1_119 = arith.constant 1 : index
      %c0_120 = arith.constant 0 : index
      %c0_121 = arith.constant 0 : index
      %164 = vector.load %arg14[%c1_119, %c0_120, %c0_121] : memref<4x8x8xbf16, #tpu.memory_space<vmem>>, vector<1x8x8xbf16>
      %165 = vector.shape_cast %164 : vector<1x8x8xbf16> to vector<8x8xbf16>
      %166 = vector.shape_cast %163 : vector<8x8xbf16> to vector<1x8x8xbf16>
      tpu.vector_store %arg14[%c1_119, %c0_120, %c0_121], %166 {strides = array<i32>} : memref<4x8x8xbf16, #tpu.memory_space<vmem>>, vector<1x8x8xbf16>,
      %c1_122 = arith.constant 1 : index
      %c0_123 = arith.constant 0 : index
      %c0_124 = arith.constant 0 : index
      %167 = vector.load %arg9[%c1_122, %c0_123, %c0_124] : memref<4x32x8xbf16, #tpu.memory_space<vmem>>, vector<1x32x8xbf16>
      %168 = vector.shape_cast %167 : vector<1x32x8xbf16> to vector<32x8xbf16>
      %cst_125 = arith.constant dense<0.000000e+00> : vector<8x8xf32>
      %169 = tpu.matmul %133, %168, %cst_125 {dimension_numbers = #tpu.dot_dimension_numbers<[1], [0], [0], [1], [0, 0, 1, 1], [], []>} : vector<8x32xbf16>, vector<32x8xbf16>, vector<8x8xf32> -> vector<8x8xf32>
      %c1_126 = arith.constant 1 : index
      %c0_127 = arith.constant 0 : index
      %c0_128 = arith.constant 0 : index
      %170 = vector.load %arg10[%c1_126, %c0_127, %c0_128] : memref<4x1x8xf32, #tpu.memory_space<vmem>>, vector<1x1x8xf32>
      %171 = vector.shape_cast %170 : vector<1x1x8xf32> to vector<1x8xf32>
      %172 = vector.broadcast %171 : vector<1x8xf32> to vector<8x8xf32>
      %173 = arith.addf %169, %172 : vector<8x8xf32>
      %174 = arith.truncf %173 : vector<8x8xf32> to vector<8x8xbf16>
      %c1_129 = arith.constant 1 : index
      %c0_130 = arith.constant 0 : index
      %c0_131 = arith.constant 0 : index
      %175 = vector.load %arg15[%c1_129, %c0_130, %c0_131] : memref<4x8x8xbf16, #tpu.memory_space<vmem>>, vector<1x8x8xbf16>
      %176 = vector.shape_cast %175 : vector<1x8x8xbf16> to vector<8x8xbf16>
      %177 = vector.shape_cast %174 : vector<8x8xbf16> to vector<1x8x8xbf16>
      tpu.vector_store %arg15[%c1_129, %c0_130, %c0_131], %177 {strides = array<i32>} : memref<4x8x8xbf16, #tpu.memory_space<vmem>>, vector<1x8x8xbf16>,
      %c2_132 = arith.constant 2 : index
      %c0_133 = arith.constant 0 : index
      %c0_134 = arith.constant 0 : index
      %178 = vector.load %arg7[%c2_132, %c0_133, %c0_134] : memref<4x8x32xbf16, #tpu.memory_space<vmem>>, vector<1x8x32xbf16>
      %179 = vector.shape_cast %178 : vector<1x8x32xbf16> to vector<8x32xbf16>
      %cst_135 = arith.constant dense<0.000000e+00> : vector<8x8xf32>
      %180 = tpu.matmul %179, %131, %cst_135 {dimension_numbers = #tpu.dot_dimension_numbers<[1], [0], [0], [1], [0, 0, 1, 1], [], []>} : vector<8x32xbf16>, vector<32x8xbf16>, vector<8x8xf32> -> vector<8x8xf32>
      %c2_136 = arith.constant 2 : index
      %c0_137 = arith.constant 0 : index
      %c0_138 = arith.constant 0 : index
      %181 = vector.load %arg8[%c2_136, %c0_137, %c0_138] : memref<4x8x1xf32, #tpu.memory_space<vmem>>, vector<1x8x1xf32>
      %182 = vector.shape_cast %181 : vector<1x8x1xf32> to vector<8x1xf32>
      %183 = vector.broadcast %182 : vector<8x1xf32> to vector<8x8xf32>
      %184 = arith.addf %180, %183 : vector<8x8xf32>
      %185 = arith.truncf %184 : vector<8x8xf32> to vector<8x8xbf16>
      %c2_139 = arith.constant 2 : index
      %c0_140 = arith.constant 0 : index
      %c0_141 = arith.constant 0 : index
      %186 = vector.load %arg14[%c2_139, %c0_140, %c0_141] : memref<4x8x8xbf16, #tpu.memory_space<vmem>>, vector<1x8x8xbf16>
      %187 = vector.shape_cast %186 : vector<1x8x8xbf16> to vector<8x8xbf16>
      %188 = vector.shape_cast %185 : vector<8x8xbf16> to vector<1x8x8xbf16>
      tpu.vector_store %arg14[%c2_139, %c0_140, %c0_141], %188 {strides = array<i32>} : memref<4x8x8xbf16, #tpu.memory_space<vmem>>, vector<1x8x8xbf16>,
      %c2_142 = arith.constant 2 : index
      %c0_143 = arith.constant 0 : index
      %c0_144 = arith.constant 0 : index
      %189 = vector.load %arg9[%c2_142, %c0_143, %c0_144] : memref<4x32x8xbf16, #tpu.memory_space<vmem>>, vector<1x32x8xbf16>
      %190 = vector.shape_cast %189 : vector<1x32x8xbf16> to vector<32x8xbf16>
      %cst_145 = arith.constant dense<0.000000e+00> : vector<8x8xf32>
      %191 = tpu.matmul %133, %190, %cst_145 {dimension_numbers = #tpu.dot_dimension_numbers<[1], [0], [0], [1], [0, 0, 1, 1], [], []>} : vector<8x32xbf16>, vector<32x8xbf16>, vector<8x8xf32> -> vector<8x8xf32>
      %c2_146 = arith.constant 2 : index
      %c0_147 = arith.constant 0 : index
      %c0_148 = arith.constant 0 : index
      %192 = vector.load %arg10[%c2_146, %c0_147, %c0_148] : memref<4x1x8xf32, #tpu.memory_space<vmem>>, vector<1x1x8xf32>
      %193 = vector.shape_cast %192 : vector<1x1x8xf32> to vector<1x8xf32>
      %194 = vector.broadcast %193 : vector<1x8xf32> to vector<8x8xf32>
      %195 = arith.addf %191, %194 : vector<8x8xf32>
      %196 = arith.truncf %195 : vector<8x8xf32> to vector<8x8xbf16>
      %c2_149 = arith.constant 2 : index
      %c0_150 = arith.constant 0 : index
      %c0_151 = arith.constant 0 : index
      %197 = vector.load %arg15[%c2_149, %c0_150, %c0_151] : memref<4x8x8xbf16, #tpu.memory_space<vmem>>, vector<1x8x8xbf16>
      %198 = vector.shape_cast %197 : vector<1x8x8xbf16> to vector<8x8xbf16>
      %199 = vector.shape_cast %196 : vector<8x8xbf16> to vector<1x8x8xbf16>
      tpu.vector_store %arg15[%c2_149, %c0_150, %c0_151], %199 {strides = array<i32>} : memref<4x8x8xbf16, #tpu.memory_space<vmem>>, vector<1x8x8xbf16>,
      %c3_152 = arith.constant 3 : index
      %c0_153 = arith.constant 0 : index
      %c0_154 = arith.constant 0 : index
      %200 = vector.load %arg7[%c3_152, %c0_153, %c0_154] : memref<4x8x32xbf16, #tpu.memory_space<vmem>>, vector<1x8x32xbf16>
      %201 = vector.shape_cast %200 : vector<1x8x32xbf16> to vector<8x32xbf16>
      %cst_155 = arith.constant dense<0.000000e+00> : vector<8x8xf32>
      %202 = tpu.matmul %201, %131, %cst_155 {dimension_numbers = #tpu.dot_dimension_numbers<[1], [0], [0], [1], [0, 0, 1, 1], [], []>} : vector<8x32xbf16>, vector<32x8xbf16>, vector<8x8xf32> -> vector<8x8xf32>
      %c3_156 = arith.constant 3 : index
      %c0_157 = arith.constant 0 : index
      %c0_158 = arith.constant 0 : index
      %203 = vector.load %arg8[%c3_156, %c0_157, %c0_158] : memref<4x8x1xf32, #tpu.memory_space<vmem>>, vector<1x8x1xf32>
      %204 = vector.shape_cast %203 : vector<1x8x1xf32> to vector<8x1xf32>
      %205 = vector.broadcast %204 : vector<8x1xf32> to vector<8x8xf32>
      %206 = arith.addf %202, %205 : vector<8x8xf32>
      %207 = arith.truncf %206 : vector<8x8xf32> to vector<8x8xbf16>
      %c3_159 = arith.constant 3 : index
      %c0_160 = arith.constant 0 : index
      %c0_161 = arith.constant 0 : index
      %208 = vector.load %arg14[%c3_159, %c0_160, %c0_161] : memref<4x8x8xbf16, #tpu.memory_space<vmem>>, vector<1x8x8xbf16>
      %209 = vector.shape_cast %208 : vector<1x8x8xbf16> to vector<8x8xbf16>
      %210 = vector.shape_cast %207 : vector<8x8xbf16> to vector<1x8x8xbf16>
      tpu.vector_store %arg14[%c3_159, %c0_160, %c0_161], %210 {strides = array<i32>} : memref<4x8x8xbf16, #tpu.memory_space<vmem>>, vector<1x8x8xbf16>,
      %c3_162 = arith.constant 3 : index
      %c0_163 = arith.constant 0 : index
      %c0_164 = arith.constant 0 : index
      %211 = vector.load %arg9[%c3_162, %c0_163, %c0_164] : memref<4x32x8xbf16, #tpu.memory_space<vmem>>, vector<1x32x8xbf16>
      %212 = vector.shape_cast %211 : vector<1x32x8xbf16> to vector<32x8xbf16>
      %cst_165 = arith.constant dense<0.000000e+00> : vector<8x8xf32>
      %213 = tpu.matmul %133, %212, %cst_165 {dimension_numbers = #tpu.dot_dimension_numbers<[1], [0], [0], [1], [0, 0, 1, 1], [], []>} : vector<8x32xbf16>, vector<32x8xbf16>, vector<8x8xf32> -> vector<8x8xf32>
      %c3_166 = arith.constant 3 : index
      %c0_167 = arith.constant 0 : index
      %c0_168 = arith.constant 0 : index
      %214 = vector.load %arg10[%c3_166, %c0_167, %c0_168] : memref<4x1x8xf32, #tpu.memory_space<vmem>>, vector<1x1x8xf32>
      %215 = vector.shape_cast %214 : vector<1x1x8xf32> to vector<1x8xf32>
      %216 = vector.broadcast %215 : vector<1x8xf32> to vector<8x8xf32>
      %217 = arith.addf %213, %216 : vector<8x8xf32>
      %218 = arith.truncf %217 : vector<8x8xf32> to vector<8x8xbf16>
      %c3_169 = arith.constant 3 : index
      %c0_170 = arith.constant 0 : index
      %c0_171 = arith.constant 0 : index
      %219 = vector.load %arg15[%c3_169, %c0_170, %c0_171] : memref<4x8x8xbf16, #tpu.memory_space<vmem>>, vector<1x8x8xbf16>
      %220 = vector.shape_cast %219 : vector<1x8x8xbf16> to vector<8x8xbf16>
      %221 = vector.shape_cast %218 : vector<8x8xbf16> to vector<1x8x8xbf16>
      tpu.vector_store %arg15[%c3_169, %c0_170, %c0_171], %221 {strides = array<i32>} : memref<4x8x8xbf16, #tpu.memory_space<vmem>>, vector<1x8x8xbf16>,
    } else {
    }
    %c0 = arith.constant 0 : index
    %c0_1 = arith.constant 0 : index
    %c0_2 = arith.constant 0 : index
    %3 = vector.load %arg2[%c0, %c0_1, %c0_2] : memref<1x8x32xbf16, #tpu.memory_space<vmem>>, vector<1x8x32xbf16>
    %4 = vector.shape_cast %3 : vector<1x8x32xbf16> to vector<8x32xbf16>
    %c0_3 = arith.constant 0 : index
    %c0_4 = arith.constant 0 : index
    %c0_5 = arith.constant 0 : index
    %5 = vector.load %arg5[%c0_3, %c0_4, %c0_5] : memref<4x32x8xbf16, #tpu.memory_space<vmem>>, vector<1x32x8xbf16>
    %6 = vector.shape_cast %5 : vector<1x32x8xbf16> to vector<32x8xbf16>
    %cst = arith.constant dense<0.000000e+00> : vector<8x8xf32>
    %7 = tpu.matmul %4, %6, %cst {dimension_numbers = #tpu.dot_dimension_numbers<[1], [0], [0], [1], [0, 0, 1, 1], [], []>} : vector<8x32xbf16>, vector<32x8xbf16>, vector<8x8xf32> -> vector<8x8xf32>
    %c0_6 = arith.constant 0 : index
    %c0_7 = arith.constant 0 : index
    %c0_8 = arith.constant 0 : index
    %8 = vector.load %arg6[%c0_6, %c0_7, %c0_8] : memref<4x1x8xf32, #tpu.memory_space<vmem>>, vector<1x1x8xf32>
    %9 = vector.shape_cast %8 : vector<1x1x8xf32> to vector<1x8xf32>
    %10 = vector.broadcast %9 : vector<1x8xf32> to vector<8x8xf32>
    %11 = arith.addf %7, %10 : vector<8x8xf32>
    %cst_9 = arith.constant 0.353553385 : f32
    %12 = vector.broadcast %cst_9 : f32 to vector<8x8xf32>
    %13 = arith.mulf %11, %12 : vector<8x8xf32>
    %14 = arith.truncf %13 : vector<8x8xf32> to vector<8x8xbf16>
    %c0_10 = arith.constant 0 : index
    %c0_11 = arith.constant 0 : index
    %c0_12 = arith.constant 0 : index
    %15 = vector.load %arg14[%c0_10, %c0_11, %c0_12] : memref<4x8x8xbf16, #tpu.memory_space<vmem>>, vector<1x8x8xbf16>
    %16 = vector.shape_cast %15 : vector<1x8x8xbf16> to vector<8x8xbf16>
    %cst_13 = arith.constant dense<0.000000e+00> : vector<8x8xf32>
    %17 = tpu.matmul %14, %16, %cst_13 {dimension_numbers = #tpu.dot_dimension_numbers<[1], [0], [0], [1], [0, 0, 1, 1], [], []>} : vector<8x8xbf16>, vector<8x8xbf16>, vector<8x8xf32> -> vector<8x8xf32>
    %cst_14 = arith.constant dense<0xFF800000> : vector<8xf32>
    %18 = vector.multi_reduction <maximumf>, %17, %cst_14 [1] : vector<8x8xf32> to vector<8xf32>
    %19 = vector.shape_cast %18 : vector<8xf32> to vector<8x1xf32>
    %20 = vector.broadcast %19 : vector<8x1xf32> to vector<8x8xf32>
    %21 = arith.subf %17, %20 : vector<8x8xf32>
    %22 = math.exp %21 : vector<8x8xf32>
    %cst_15 = arith.constant dense<0.000000e+00> : vector<8xf32>
    %23 = vector.multi_reduction <add>, %22, %cst_15 [1] : vector<8x8xf32> to vector<8xf32>
    %24 = vector.shape_cast %23 : vector<8xf32> to vector<8x1xf32>
    %25 = arith.truncf %22 : vector<8x8xf32> to vector<8x8xbf16>
    %c0_16 = arith.constant 0 : index
    %c0_17 = arith.constant 0 : index
    %c0_18 = arith.constant 0 : index
    %26 = vector.load %arg15[%c0_16, %c0_17, %c0_18] : memref<4x8x8xbf16, #tpu.memory_space<vmem>>, vector<1x8x8xbf16>
    %27 = vector.shape_cast %26 : vector<1x8x8xbf16> to vector<8x8xbf16>
    %cst_19 = arith.constant dense<0.000000e+00> : vector<8x8xf32>
    %28 = tpu.matmul %25, %27, %cst_19 {dimension_numbers = #tpu.dot_dimension_numbers<[1], [0], [0], [1], [0, 0, 1, 1], [], []>} : vector<8x8xbf16>, vector<8x8xbf16>, vector<8x8xf32> -> vector<8x8xf32>
    %29 = tpu.reciprocal %24 {approx = true} : vector<8x1xf32> -> vector<8x1xf32>
    %30 = vector.broadcast %29 : vector<8x1xf32> to vector<8x8xf32>
    %31 = arith.mulf %28, %30 : vector<8x8xf32>
    %32 = arith.truncf %31 : vector<8x8xf32> to vector<8x8xbf16>
    %c0_20 = arith.constant 0 : index
    %c0_21 = arith.constant 0 : index
    %33 = vector.load %arg16[%c0_20, %c0_21] : memref<8x32xbf16, #tpu.memory_space<vmem>>, vector<8x8xbf16>
    tpu.vector_store %arg16[%c0_20, %c0_21], %32 {strides = array<i32>} : memref<8x32xbf16, #tpu.memory_space<vmem>>, vector<8x8xbf16>,
    %c1 = arith.constant 1 : index
    %c0_22 = arith.constant 0 : index
    %c0_23 = arith.constant 0 : index
    %34 = vector.load %arg5[%c1, %c0_22, %c0_23] : memref<4x32x8xbf16, #tpu.memory_space<vmem>>, vector<1x32x8xbf16>
    %35 = vector.shape_cast %34 : vector<1x32x8xbf16> to vector<32x8xbf16>
    %cst_24 = arith.constant dense<0.000000e+00> : vector<8x8xf32>
    %36 = tpu.matmul %4, %35, %cst_24 {dimension_numbers = #tpu.dot_dimension_numbers<[1], [0], [0], [1], [0, 0, 1, 1], [], []>} : vector<8x32xbf16>, vector<32x8xbf16>, vector<8x8xf32> -> vector<8x8xf32>
    %c1_25 = arith.constant 1 : index
    %c0_26 = arith.constant 0 : index
    %c0_27 = arith.constant 0 : index
    %37 = vector.load %arg6[%c1_25, %c0_26, %c0_27] : memref<4x1x8xf32, #tpu.memory_space<vmem>>, vector<1x1x8xf32>
    %38 = vector.shape_cast %37 : vector<1x1x8xf32> to vector<1x8xf32>
    %39 = vector.broadcast %38 : vector<1x8xf32> to vector<8x8xf32>
    %40 = arith.addf %36, %39 : vector<8x8xf32>
    %cst_28 = arith.constant 0.353553385 : f32
    %41 = vector.broadcast %cst_28 : f32 to vector<8x8xf32>
    %42 = arith.mulf %40, %41 : vector<8x8xf32>
    %43 = arith.truncf %42 : vector<8x8xf32> to vector<8x8xbf16>
    %c1_29 = arith.constant 1 : index
    %c0_30 = arith.constant 0 : index
    %c0_31 = arith.constant 0 : index
    %44 = vector.load %arg14[%c1_29, %c0_30, %c0_31] : memref<4x8x8xbf16, #tpu.memory_space<vmem>>, vector<1x8x8xbf16>
    %45 = vector.shape_cast %44 : vector<1x8x8xbf16> to vector<8x8xbf16>
    %cst_32 = arith.constant dense<0.000000e+00> : vector<8x8xf32>
    %46 = tpu.matmul %43, %45, %cst_32 {dimension_numbers = #tpu.dot_dimension_numbers<[1], [0], [0], [1], [0, 0, 1, 1], [], []>} : vector<8x8xbf16>, vector<8x8xbf16>, vector<8x8xf32> -> vector<8x8xf32>
    %cst_33 = arith.constant dense<0xFF800000> : vector<8xf32>
    %47 = vector.multi_reduction <maximumf>, %46, %cst_33 [1] : vector<8x8xf32> to vector<8xf32>
    %48 = vector.shape_cast %47 : vector<8xf32> to vector<8x1xf32>
    %49 = vector.broadcast %48 : vector<8x1xf32> to vector<8x8xf32>
    %50 = arith.subf %46, %49 : vector<8x8xf32>
    %51 = math.exp %50 : vector<8x8xf32>
    %cst_34 = arith.constant dense<0.000000e+00> : vector<8xf32>
    %52 = vector.multi_reduction <add>, %51, %cst_34 [1] : vector<8x8xf32> to vector<8xf32>
    %53 = vector.shape_cast %52 : vector<8xf32> to vector<8x1xf32>
    %54 = arith.truncf %51 : vector<8x8xf32> to vector<8x8xbf16>
    %c1_35 = arith.constant 1 : index
    %c0_36 = arith.constant 0 : index
    %c0_37 = arith.constant 0 : index
    %55 = vector.load %arg15[%c1_35, %c0_36, %c0_37] : memref<4x8x8xbf16, #tpu.memory_space<vmem>>, vector<1x8x8xbf16>
    %56 = vector.shape_cast %55 : vector<1x8x8xbf16> to vector<8x8xbf16>
    %cst_38 = arith.constant dense<0.000000e+00> : vector<8x8xf32>
    %57 = tpu.matmul %54, %56, %cst_38 {dimension_numbers = #tpu.dot_dimension_numbers<[1], [0], [0], [1], [0, 0, 1, 1], [], []>} : vector<8x8xbf16>, vector<8x8xbf16>, vector<8x8xf32> -> vector<8x8xf32>
    %58 = tpu.reciprocal %53 {approx = true} : vector<8x1xf32> -> vector<8x1xf32>
    %59 = vector.broadcast %58 : vector<8x1xf32> to vector<8x8xf32>
    %60 = arith.mulf %57, %59 : vector<8x8xf32>
    %61 = arith.truncf %60 : vector<8x8xf32> to vector<8x8xbf16>
    %c0_39 = arith.constant 0 : index
    %c8 = arith.constant 8 : index
    %62 = vector.load %arg16[%c0_39, %c8] : memref<8x32xbf16, #tpu.memory_space<vmem>>, vector<8x8xbf16>
    tpu.vector_store %arg16[%c0_39, %c8], %61 {strides = array<i32>} : memref<8x32xbf16, #tpu.memory_space<vmem>>, vector<8x8xbf16>,
    %c2 = arith.constant 2 : index
    %c0_40 = arith.constant 0 : index
    %c0_41 = arith.constant 0 : index
    %63 = vector.load %arg5[%c2, %c0_40, %c0_41] : memref<4x32x8xbf16, #tpu.memory_space<vmem>>, vector<1x32x8xbf16>
    %64 = vector.shape_cast %63 : vector<1x32x8xbf16> to vector<32x8xbf16>
    %cst_42 = arith.constant dense<0.000000e+00> : vector<8x8xf32>
    %65 = tpu.matmul %4, %64, %cst_42 {dimension_numbers = #tpu.dot_dimension_numbers<[1], [0], [0], [1], [0, 0, 1, 1], [], []>} : vector<8x32xbf16>, vector<32x8xbf16>, vector<8x8xf32> -> vector<8x8xf32>
    %c2_43 = arith.constant 2 : index
    %c0_44 = arith.constant 0 : index
    %c0_45 = arith.constant 0 : index
    %66 = vector.load %arg6[%c2_43, %c0_44, %c0_45] : memref<4x1x8xf32, #tpu.memory_space<vmem>>, vector<1x1x8xf32>
    %67 = vector.shape_cast %66 : vector<1x1x8xf32> to vector<1x8xf32>
    %68 = vector.broadcast %67 : vector<1x8xf32> to vector<8x8xf32>
    %69 = arith.addf %65, %68 : vector<8x8xf32>
    %cst_46 = arith.constant 0.353553385 : f32
    %70 = vector.broadcast %cst_46 : f32 to vector<8x8xf32>
    %71 = arith.mulf %69, %70 : vector<8x8xf32>
    %72 = arith.truncf %71 : vector<8x8xf32> to vector<8x8xbf16>
    %c2_47 = arith.constant 2 : index
    %c0_48 = arith.constant 0 : index
    %c0_49 = arith.constant 0 : index
    %73 = vector.load %arg14[%c2_47, %c0_48, %c0_49] : memref<4x8x8xbf16, #tpu.memory_space<vmem>>, vector<1x8x8xbf16>
    %74 = vector.shape_cast %73 : vector<1x8x8xbf16> to vector<8x8xbf16>
    %cst_50 = arith.constant dense<0.000000e+00> : vector<8x8xf32>
    %75 = tpu.matmul %72, %74, %cst_50 {dimension_numbers = #tpu.dot_dimension_numbers<[1], [0], [0], [1], [0, 0, 1, 1], [], []>} : vector<8x8xbf16>, vector<8x8xbf16>, vector<8x8xf32> -> vector<8x8xf32>
    %cst_51 = arith.constant dense<0xFF800000> : vector<8xf32>
    %76 = vector.multi_reduction <maximumf>, %75, %cst_51 [1] : vector<8x8xf32> to vector<8xf32>
    %77 = vector.shape_cast %76 : vector<8xf32> to vector<8x1xf32>
    %78 = vector.broadcast %77 : vector<8x1xf32> to vector<8x8xf32>
    %79 = arith.subf %75, %78 : vector<8x8xf32>
    %80 = math.exp %79 : vector<8x8xf32>
    %cst_52 = arith.constant dense<0.000000e+00> : vector<8xf32>
    %81 = vector.multi_reduction <add>, %80, %cst_52 [1] : vector<8x8xf32> to vector<8xf32>
    %82 = vector.shape_cast %81 : vector<8xf32> to vector<8x1xf32>
    %83 = arith.truncf %80 : vector<8x8xf32> to vector<8x8xbf16>
    %c2_53 = arith.constant 2 : index
    %c0_54 = arith.constant 0 : index
    %c0_55 = arith.constant 0 : index
    %84 = vector.load %arg15[%c2_53, %c0_54, %c0_55] : memref<4x8x8xbf16, #tpu.memory_space<vmem>>, vector<1x8x8xbf16>
    %85 = vector.shape_cast %84 : vector<1x8x8xbf16> to vector<8x8xbf16>
    %cst_56 = arith.constant dense<0.000000e+00> : vector<8x8xf32>
    %86 = tpu.matmul %83, %85, %cst_56 {dimension_numbers = #tpu.dot_dimension_numbers<[1], [0], [0], [1], [0, 0, 1, 1], [], []>} : vector<8x8xbf16>, vector<8x8xbf16>, vector<8x8xf32> -> vector<8x8xf32>
    %87 = tpu.reciprocal %82 {approx = true} : vector<8x1xf32> -> vector<8x1xf32>
    %88 = vector.broadcast %87 : vector<8x1xf32> to vector<8x8xf32>
    %89 = arith.mulf %86, %88 : vector<8x8xf32>
    %90 = arith.truncf %89 : vector<8x8xf32> to vector<8x8xbf16>
    %c0_57 = arith.constant 0 : index
    %c16 = arith.constant 16 : index
    %91 = vector.load %arg16[%c0_57, %c16] : memref<8x32xbf16, #tpu.memory_space<vmem>>, vector<8x8xbf16>
    tpu.vector_store %arg16[%c0_57, %c16], %90 {strides = array<i32>} : memref<8x32xbf16, #tpu.memory_space<vmem>>, vector<8x8xbf16>,
    %c3 = arith.constant 3 : index
    %c0_58 = arith.constant 0 : index
    %c0_59 = arith.constant 0 : index
    %92 = vector.load %arg5[%c3, %c0_58, %c0_59] : memref<4x32x8xbf16, #tpu.memory_space<vmem>>, vector<1x32x8xbf16>
    %93 = vector.shape_cast %92 : vector<1x32x8xbf16> to vector<32x8xbf16>
    %cst_60 = arith.constant dense<0.000000e+00> : vector<8x8xf32>
    %94 = tpu.matmul %4, %93, %cst_60 {dimension_numbers = #tpu.dot_dimension_numbers<[1], [0], [0], [1], [0, 0, 1, 1], [], []>} : vector<8x32xbf16>, vector<32x8xbf16>, vector<8x8xf32> -> vector<8x8xf32>
    %c3_61 = arith.constant 3 : index
    %c0_62 = arith.constant 0 : index
    %c0_63 = arith.constant 0 : index
    %95 = vector.load %arg6[%c3_61, %c0_62, %c0_63] : memref<4x1x8xf32, #tpu.memory_space<vmem>>, vector<1x1x8xf32>
    %96 = vector.shape_cast %95 : vector<1x1x8xf32> to vector<1x8xf32>
    %97 = vector.broadcast %96 : vector<1x8xf32> to vector<8x8xf32>
    %98 = arith.addf %94, %97 : vector<8x8xf32>
    %cst_64 = arith.constant 0.353553385 : f32
    %99 = vector.broadcast %cst_64 : f32 to vector<8x8xf32>
    %100 = arith.mulf %98, %99 : vector<8x8xf32>
    %101 = arith.truncf %100 : vector<8x8xf32> to vector<8x8xbf16>
    %c3_65 = arith.constant 3 : index
    %c0_66 = arith.constant 0 : index
    %c0_67 = arith.constant 0 : index
    %102 = vector.load %arg14[%c3_65, %c0_66, %c0_67] : memref<4x8x8xbf16, #tpu.memory_space<vmem>>, vector<1x8x8xbf16>
    %103 = vector.shape_cast %102 : vector<1x8x8xbf16> to vector<8x8xbf16>
    %cst_68 = arith.constant dense<0.000000e+00> : vector<8x8xf32>
    %104 = tpu.matmul %101, %103, %cst_68 {dimension_numbers = #tpu.dot_dimension_numbers<[1], [0], [0], [1], [0, 0, 1, 1], [], []>} : vector<8x8xbf16>, vector<8x8xbf16>, vector<8x8xf32> -> vector<8x8xf32>
    %cst_69 = arith.constant dense<0xFF800000> : vector<8xf32>
    %105 = vector.multi_reduction <maximumf>, %104, %cst_69 [1] : vector<8x8xf32> to vector<8xf32>
    %106 = vector.shape_cast %105 : vector<8xf32> to vector<8x1xf32>
    %107 = vector.broadcast %106 : vector<8x1xf32> to vector<8x8xf32>
    %108 = arith.subf %104, %107 : vector<8x8xf32>
    %109 = math.exp %108 : vector<8x8xf32>
    %cst_70 = arith.constant dense<0.000000e+00> : vector<8xf32>
    %110 = vector.multi_reduction <add>, %109, %cst_70 [1] : vector<8x8xf32> to vector<8xf32>
    %111 = vector.shape_cast %110 : vector<8xf32> to vector<8x1xf32>
    %112 = arith.truncf %109 : vector<8x8xf32> to vector<8x8xbf16>
    %c3_71 = arith.constant 3 : index
    %c0_72 = arith.constant 0 : index
    %c0_73 = arith.constant 0 : index
    %113 = vector.load %arg15[%c3_71, %c0_72, %c0_73] : memref<4x8x8xbf16, #tpu.memory_space<vmem>>, vector<1x8x8xbf16>
    %114 = vector.shape_cast %113 : vector<1x8x8xbf16> to vector<8x8xbf16>
    %cst_74 = arith.constant dense<0.000000e+00> : vector<8x8xf32>
    %115 = tpu.matmul %112, %114, %cst_74 {dimension_numbers = #tpu.dot_dimension_numbers<[1], [0], [0], [1], [0, 0, 1, 1], [], []>} : vector<8x8xbf16>, vector<8x8xbf16>, vector<8x8xf32> -> vector<8x8xf32>
    %116 = tpu.reciprocal %111 {approx = true} : vector<8x1xf32> -> vector<8x1xf32>
    %117 = vector.broadcast %116 : vector<8x1xf32> to vector<8x8xf32>
    %118 = arith.mulf %115, %117 : vector<8x8xf32>
    %119 = arith.truncf %118 : vector<8x8xf32> to vector<8x8xbf16>
    %c0_75 = arith.constant 0 : index
    %c24 = arith.constant 24 : index
    %120 = vector.load %arg16[%c0_75, %c24] : memref<8x32xbf16, #tpu.memory_space<vmem>>, vector<8x8xbf16>
    tpu.vector_store %arg16[%c0_75, %c24], %119 {strides = array<i32>} : memref<8x32xbf16, #tpu.memory_space<vmem>>, vector<8x8xbf16>,
    %c0_76 = arith.constant 0 : index
    %c0_77 = arith.constant 0 : index
    %121 = vector.load %arg16[%c0_76, %c0_77] : memref<8x32xbf16, #tpu.memory_space<vmem>>, vector<8x32xbf16>
    %c0_78 = arith.constant 0 : index
    %c0_79 = arith.constant 0 : index
    %122 = vector.load %arg11[%c0_78, %c0_79] : memref<32x32xbf16, #tpu.memory_space<vmem>>, vector<32x32xbf16>
    %cst_80 = arith.constant dense<0.000000e+00> : vector<8x32xf32>
    %123 = tpu.matmul %121, %122, %cst_80 {dimension_numbers = #tpu.dot_dimension_numbers<[1], [0], [0], [1], [0, 0, 1, 1], [], []>} : vector<8x32xbf16>, vector<32x32xbf16>, vector<8x32xf32> -> vector<8x32xf32>
    %c0_81 = arith.constant 0 : index
    %c0_82 = arith.constant 0 : index
    %124 = vector.load %arg12[%c0_81, %c0_82] : memref<1x32xf32, #tpu.memory_space<vmem>>, vector<1x32xf32>
    %125 = vector.broadcast %124 : vector<1x32xf32> to vector<8x32xf32>
    %126 = arith.addf %123, %125 : vector<8x32xf32>
    %c0_83 = arith.constant 0 : index
    %c0_84 = arith.constant 0 : index
    %c0_85 = arith.constant 0 : index
    %127 = vector.load %arg13[%c0_83, %c0_84, %c0_85] : memref<1x8x32xf32, #tpu.memory_space<vmem>>, vector<1x8x32xf32>
    %128 = vector.shape_cast %127 : vector<1x8x32xf32> to vector<8x32xf32>
    %129 = vector.shape_cast %126 : vector<8x32xf32> to vector<1x8x32xf32>
    tpu.vector_store %arg13[%c0_83, %c0_84, %c0_85], %129 {strides = array<i32>} : memref<1x8x32xf32, #tpu.memory_space<vmem>>, vector<1x8x32xf32>,
    return
  }
  func.func @transform_0(%arg0: i32, %arg1: i32) -> (i32, i32, i32) {
    %c0_i32 = arith.constant 0 : i32
    %c0_i32_0 = arith.constant 0 : i32
    return %arg0, %arg1, %c0_i32 : i32, i32, i32
  }
  func.func @transform_1(%arg0: i32, %arg1: i32) -> (i32, i32, i32) {
    %c0_i32 = arith.constant 0 : i32
    %c0_i32_0 = arith.constant 0 : i32
    %c0_i32_1 = arith.constant 0 : i32
    return %arg0, %c0_i32, %c0_i32_0 : i32, i32, i32
  }
  func.func @transform_2(%arg0: i32, %arg1: i32) -> (i32, i32, i32) {
    %c0_i32 = arith.constant 0 : i32
    %c0_i32_0 = arith.constant 0 : i32
    %c0_i32_1 = arith.constant 0 : i32
    return %arg0, %c0_i32, %c0_i32_0 : i32, i32, i32
  }
  func.func @transform_3(%arg0: i32, %arg1: i32) -> (i32, i32, i32) {
    %c0_i32 = arith.constant 0 : i32
    %c0_i32_0 = arith.constant 0 : i32
    %c0_i32_1 = arith.constant 0 : i32
    %c0_i32_2 = arith.constant 0 : i32
    return %c0_i32, %c0_i32_0, %c0_i32_1 : i32, i32, i32
  }
  func.func @transform_4(%arg0: i32, %arg1: i32) -> (i32, i32, i32) {
    %c0_i32 = arith.constant 0 : i32
    %c0_i32_0 = arith.constant 0 : i32
    %c0_i32_1 = arith.constant 0 : i32
    %c0_i32_2 = arith.constant 0 : i32
    return %c0_i32, %c0_i32_0, %c0_i32_1 : i32, i32, i32
  }
  func.func @transform_5(%arg0: i32, %arg1: i32) -> (i32, i32, i32) {
    %c0_i32 = arith.constant 0 : i32
    %c0_i32_0 = arith.constant 0 : i32
    %c0_i32_1 = arith.constant 0 : i32
    %c0_i32_2 = arith.constant 0 : i32
    return %c0_i32, %c0_i32_0, %c0_i32_1 : i32, i32, i32
  }
  func.func @transform_6(%arg0: i32, %arg1: i32) -> (i32, i32, i32) {
    %c0_i32 = arith.constant 0 : i32
    %c0_i32_0 = arith.constant 0 : i32
    %c0_i32_1 = arith.constant 0 : i32
    %c0_i32_2 = arith.constant 0 : i32
    return %c0_i32, %c0_i32_0, %c0_i32_1 : i32, i32, i32
  }
  func.func @transform_7(%arg0: i32, %arg1: i32) -> (i32, i32, i32) {
    %c0_i32 = arith.constant 0 : i32
    %c0_i32_0 = arith.constant 0 : i32
    %c0_i32_1 = arith.constant 0 : i32
    %c0_i32_2 = arith.constant 0 : i32
    return %c0_i32, %c0_i32_0, %c0_i32_1 : i32, i32, i32
  }
  func.func @transform_8(%arg0: i32, %arg1: i32) -> (i32, i32, i32) {
    %c0_i32 = arith.constant 0 : i32
    %c0_i32_0 = arith.constant 0 : i32
    %c0_i32_1 = arith.constant 0 : i32
    %c0_i32_2 = arith.constant 0 : i32
    return %c0_i32, %c0_i32_0, %c0_i32_1 : i32, i32, i32
  }
  func.func @transform_9(%arg0: i32, %arg1: i32) -> (i32, i32) {
    %c0_i32 = arith.constant 0 : i32
    %c0_i32_0 = arith.constant 0 : i32
    %c0_i32_1 = arith.constant 0 : i32
    return %c0_i32, %c0_i32_0 : i32, i32
  }
  func.func @transform_10(%arg0: i32, %arg1: i32) -> (i32, i32) {
    %c0_i32 = arith.constant 0 : i32
    %c0_i32_0 = arith.constant 0 : i32
    %c0_i32_1 = arith.constant 0 : i32
    return %c0_i32, %c0_i32_0 : i32, i32
  }
  func.func @transform_11(%arg0: i32, %arg1: i32) -> (i32, i32, i32) {
    %c0_i32 = arith.constant 0 : i32
    %c0_i32_0 = arith.constant 0 : i32
    return %arg0, %arg1, %c0_i32 : i32, i32, i32
  }
}

module attributes {stable_mosaic.version = 11 : i64} {
  func.func @mha_kernel(%arg0: i32, %arg1: i32, %arg2: memref<1x8x32xbf16, #tpu.memory_space<vmem>>, %arg3: memref<1x32x8xbf16, #tpu.memory_space<vmem>>, %arg4: memref<1x8x32xbf16, #tpu.memory_space<vmem>>, %arg5: memref<4x32x8xbf16, #tpu.memory_space<vmem>>, %arg6: memref<4x1x8xf32, #tpu.memory_space<vmem>>, %arg7: memref<4x8x32xbf16, #tpu.memory_space<vmem>>, %arg8: memref<4x8x1xf32, #tpu.memory_space<vmem>>, %arg9: memref<4x32x8xbf16, #tpu.memory_space<vmem>>, %arg10: memref<4x1x8xf32, #tpu.memory_space<vmem>>, %arg11: memref<32x32xbf16, #tpu.memory_space<vmem>>, %arg12: memref<1x32xf32, #tpu.memory_space<vmem>>, %arg13: memref<1x8x32xf32, #tpu.memory_space<vmem>>, %arg14: memref<4x8x8xbf16, #tpu.memory_space<vmem>>, %arg15: memref<4x8x8xbf16, #tpu.memory_space<vmem>>, %arg16: memref<8x32xbf16, #tpu.memory_space<vmem>>) attributes {dimension_semantics = [#tpu.dimension_semantics<parallel>, #tpu.dimension_semantics<arbitrary>], iteration_bounds = array<i64: 2, 1>, scalar_prefetch = 0 : i64, scratch_operands = 3 : i64, tpu.core_type = #tpu.core_type<tc>, window_params = [{transform_indices = @transform_0, window_bounds = array<i64: 1, 8, 32>}, {transform_indices = @transform_1, window_bounds = array<i64: 1, 32, 8>}, {transform_indices = @transform_2, window_bounds = array<i64: 1, 8, 32>}, {pipeline_mode = #tpu.pipeline_mode<synchronous>, transform_indices = @transform_3, window_bounds = array<i64: 4, 32, 8>}, {pipeline_mode = #tpu.pipeline_mode<synchronous>, transform_indices = @transform_4, window_bounds = array<i64: 4, 1, 8>}, {pipeline_mode = #tpu.pipeline_mode<synchronous>, transform_indices = @transform_5, window_bounds = array<i64: 4, 8, 32>}, {pipeline_mode = #tpu.pipeline_mode<synchronous>, transform_indices = @transform_6, window_bounds = array<i64: 4, 8, 1>}, {pipeline_mode = #tpu.pipeline_mode<synchronous>, transform_indices = @transform_7, window_bounds = array<i64: 4, 32, 8>}, {pipeline_mode = #tpu.pipeline_mode<synchronous>, transform_indices = @transform_8, window_bounds = array<i64: 4, 1, 8>}, {pipeline_mode = #tpu.pipeline_mode<synchronous>, transform_indices = @transform_9, window_bounds = array<i64: 32, 32>}, {pipeline_mode = #tpu.pipeline_mode<synchronous>, transform_indices = @transform_10, window_bounds = array<i64: 1, 32>}, {transform_indices = @transform_11, window_bounds = array<i64: 1, 8, 32>}]} {
    %c0_i32 = arith.constant 0 : i32
    %0 = arith.cmpi eq, %arg1, %c0_i32 : i32
    %1 = arith.extui %0 : i1 to i32
    %c0_i32_0 = arith.constant 0 : i32
    %2 = arith.cmpi ne, %1, %c0_i32_0 : i32
    scf.if %2 {
      %c0_86 = arith.constant 0 : index
      %c0_87 = arith.constant 0 : index
      %c0_88 = arith.constant 0 : index
      %130 = vector.load %arg3[%c0_86, %c0_87, %c0_88] : memref<1x32x8xbf16, #tpu.memory_space<vmem>>, vector<1x32x8xbf16>
      %131 = vector.shape_cast %130 : vector<1x32x8xbf16> to vector<32x8xbf16>
      %c0_89 = arith.constant 0 : index
      %c0_90 = arith.constant 0 : index
      %c0_91 = arith.constant 0 : index
      %132 = vector.load %arg4[%c0_89, %c0_90, %c0_91] : memref<1x8x32xbf16, #tpu.memory_space<vmem>>, vector<1x8x32xbf16>
      %133 = vector.shape_cast %132 : vector<1x8x32xbf16> to vector<8x32xbf16>
      %c0_92 = arith.constant 0 : index
      %c0_93 = arith.constant 0 : index
      %c0_94 = arith.constant 0 : index
      %134 = vector.load %arg7[%c0_92, %c0_93, %c0_94] : memref<4x8x32xbf16, #tpu.memory_space<vmem>>, vector<1x8x32xbf16>
      %135 = vector.shape_cast %134 : vector<1x8x32xbf16> to vector<8x32xbf16>
      %cst_95 = arith.constant dense<0.000000e+00> : vector<8x8xf32>
      %136 = tpu.matmul %135, %131, %cst_95 {dimension_numbers = #tpu.dot_dimension_numbers<[1], [0], [0], [1], [0, 0, 1, 1], [], []>} : vector<8x32xbf16>, vector<32x8xbf16>, vector<8x8xf32> -> vector<8x8xf32>
      %c0_96 = arith.constant 0 : index
      %c0_97 = arith.constant 0 : index
      %c0_98 = arith.constant 0 : index
      %137 = vector.load %arg8[%c0_96, %c0_97, %c0_98] : memref<4x8x1xf32, #tpu.memory_space<vmem>>, vector<1x8x1xf32>
      %138 = vector.shape_cast %137 : vector<1x8x1xf32> to vector<8x1xf32>
      %139 = vector.broadcast %138 : vector<8x1xf32> to vector<8x8xf32>
      %140 = arith.addf %136, %139 : vector<8x8xf32>
      %141 = arith.truncf %140 : vector<8x8xf32> to vector<8x8xbf16>
      %c0_99 = arith.constant 0 : index
      %c0_100 = arith.constant 0 : index
      %c0_101 = arith.constant 0 : index
      %142 = vector.load %arg14[%c0_99, %c0_100, %c0_101] : memref<4x8x8xbf16, #tpu.memory_space<vmem>>, vector<1x8x8xbf16>
      %143 = vector.shape_cast %142 : vector<1x8x8xbf16> to vector<8x8xbf16>
      %144 = vector.shape_cast %141 : vector<8x8xbf16> to vector<1x8x8xbf16>
      tpu.vector_store %arg14[%c0_99, %c0_100, %c0_101], %144 {strides = array<i32>} : memref<4x8x8xbf16, #tpu.memory_space<vmem>>, vector<1x8x8xbf16>,
      %c0_102 = arith.constant 0 : index
      %c0_103 = arith.constant 0 : index
      %c0_104 = arith.constant 0 : index
      %145 = vector.load %arg9[%c0_102, %c0_103, %c0_104] : memref<4x32x8xbf16, #tpu.memory_space<vmem>>, vector<1x32x8xbf16>
      %146 = vector.shape_cast %145 : vector<1x32x8xbf16> to vector<32x8xbf16>
      %cst_105 = arith.constant dense<0.000000e+00> : vector<8x8xf32>
      %147 = tpu.matmul %133, %146, %cst_105 {dimension_numbers = #tpu.dot_dimension_numbers<[1], [0], [0], [1], [0, 0, 1, 1], [], []>} : vector<8x32xbf16>, vector<32x8xbf16>, vector<8x8xf32> -> vector<8x8xf32>
      %c0_106 = arith.constant 0 : index
      %c0_107 = arith.constant 0 : index
      %c0_108 = arith.constant 0 : index
      %148 = vector.load %arg10[%c0_106, %c0_107, %c0_108] : memref<4x1x8xf32, #tpu.memory_space<vmem>>, vector<1x1x8xf32>
      %149 = vector.shape_cast %148 : vector<1x1x8xf32> to vector<1x8xf32>
      %150 = vector.broadcast %149 : vector<1x8xf32> to vector<8x8xf32>
      %151 = arith.addf %147, %150 : vector<8x8xf32>
      %152 = arith.truncf %151 : vector<8x8xf32> to vector<8x8xbf16>
      %c0_109 = arith.constant 0 : index
      %c0_110 = arith.constant 0 : index
      %c0_111 = arith.constant 0 : index
      %153 = vector.load %arg15[%c0_109, %c0_110, %c0_111] : memref<4x8x8xbf16, #tpu.memory_space<vmem>>, vector<1x8x8xbf16>
      %154 = vector.shape_cast %153 : vector<1x8x8xbf16> to vector<8x8xbf16>
      %155 = vector.shape_cast %152 : vector<8x8xbf16> to vector<1x8x8xbf16>
      tpu.vector_store %arg15[%c0_109, %c0_110, %c0_111], %155 {strides = array<i32>} : memref<4x8x8xbf16, #tpu.memory_space<vmem>>, vector<1x8x8xbf16>,
      %c1_112 = arith.constant 1 : index
      %c0_113 = arith.constant 0 : index
      %c0_114 = arith.constant 0 : index
      %156 = vector.load %arg7[%c1_112, %c0_113, %c0_114] : memref<4x8x32xbf16, #tpu.memory_space<vmem>>, vector<1x8x32xbf16>
      %157 = vector.shape_cast %156 : vector<1x8x32xbf16> to vector<8x32xbf16>
      %cst_115 = arith.constant dense<0.000000e+00> : vector<8x8xf32>
      %158 = tpu.matmul %157, %131, %cst_115 {dimension_numbers = #tpu.dot_dimension_numbers<[1], [0], [0], [1], [0, 0, 1, 1], [], []>} : vector<8x32xbf16>, vector<32x8xbf16>, vector<8x8xf32> -> vector<8x8xf32>
      %c1_116 = arith.constant 1 : index
      %c0_117 = arith.constant 0 : index
      %c0_118 = arith.constant 0 : index
      %159 = vector.load %arg8[%c1_116, %c0_117, %c0_118] : memref<4x8x1xf32, #tpu.memory_space<vmem>>, vector<1x8x1xf32>
      %160 = vector.shape_cast %159 : vector<1x8x1xf32> to vector<8x1xf32>
      %161 = vector.broadcast %160 : vector<8x1xf32> to vector<8x8xf32>
      %162 = arith.addf %158, %161 : vector<8x8xf32>
      %163 = arith.truncf %162 : vector<8x8xf32> to vector<8x8xbf16>
      %c1_119 = arith.constant 1 : index
      %c0_120 = arith.constant 0 : index
      %c0_121 = arith.constant 0 : index
      %164 = vector.load %arg14[%c1_119, %c0_120, %c0_121] : memref<4x8x8xbf16, #tpu.memory_space<vmem>>, vector<1x8x8xbf16>
      %165 = vector.shape_cast %164 : vector<1x8x8xbf16> to vector<8x8xbf16>
      %166 = vector.shape_cast %163 : vector<8x8xbf16> to vector<1x8x8xbf16>
      tpu.vector_store %arg14[%c1_119, %c0_120, %c0_121], %166 {strides = array<i32>} : memref<4x8x8xbf16, #tpu.memory_space<vmem>>, vector<1x8x8xbf16>,
      %c1_122 = arith.constant 1 : index
      %c0_123 = arith.constant 0 : index
      %c0_124 = arith.constant 0 : index
      %167 = vector.load %arg9[%c1_122, %c0_123, %c0_124] : memref<4x32x8xbf16, #tpu.memory_space<vmem>>, vector<1x32x8xbf16>
      %168 = vector.shape_cast %167 : vector<1x32x8xbf16> to vector<32x8xbf16>
      %cst_125 = arith.constant dense<0.000000e+00> : vector<8x8xf32>
      %169 = tpu.matmul %133, %168, %cst_125 {dimension_numbers = #tpu.dot_dimension_numbers<[1], [0], [0], [1], [0, 0, 1, 1], [], []>} : vector<8x32xbf16>, vector<32x8xbf16>, vector<8x8xf32> -> vector<8x8xf32>
      %c1_126 = arith.constant 1 : index
      %c0_127 = arith.constant 0 : index
      %c0_128 = arith.constant 0 : index
      %170 = vector.load %arg10[%c1_126, %c0_127, %c0_128] : memref<4x1x8xf32, #tpu.memory_space<vmem>>, vector<1x1x8xf32>
      %171 = vector.shape_cast %170 : vector<1x1x8xf32> to vector<1x8xf32>
      %172 = vector.broadcast %171 : vector<1x8xf32> to vector<8x8xf32>
      %173 = arith.addf %169, %172 : vector<8x8xf32>
      %174 = arith.truncf %173 : vector<8x8xf32> to vector<8x8xbf16>
      %c1_129 = arith.constant 1 : index
      %c0_130 = arith.constant 0 : index
      %c0_131 = arith.constant 0 : index
      %175 = vector.load %arg15[%c1_129, %c0_130, %c0_131] : memref<4x8x8xbf16, #tpu.memory_space<vmem>>, vector<1x8x8xbf16>
      %176 = vector.shape_cast %175 : vector<1x8x8xbf16> to vector<8x8xbf16>
      %177 = vector.shape_cast %174 : vector<8x8xbf16> to vector<1x8x8xbf16>
      tpu.vector_store %arg15[%c1_129, %c0_130, %c0_131], %177 {strides = array<i32>} : memref<4x8x8xbf16, #tpu.memory_space<vmem>>, vector<1x8x8xbf16>,
      %c2_132 = arith.constant 2 : index
      %c0_133 = arith.constant 0 : index
      %c0_134 = arith.constant 0 : index
      %178 = vector.load %arg7[%c2_132, %c0_133, %c0_134] : memref<4x8x32xbf16, #tpu.memory_space<vmem>>, vector<1x8x32xbf16>
      %179 = vector.shape_cast %178 : vector<1x8x32xbf16> to vector<8x32xbf16>
      %cst_135 = arith.constant dense<0.000000e+00> : vector<8x8xf32>
      %180 = tpu.matmul %179, %131, %cst_135 {dimension_numbers = #tpu.dot_dimension_numbers<[1], [0], [0], [1], [0, 0, 1, 1], [], []>} : vector<8x32xbf16>, vector<32x8xbf16>, vector<8x8xf32> -> vector<8x8xf32>
      %c2_136 = arith.constant 2 : index
      %c0_137 = arith.constant 0 : index
      %c0_138 = arith.constant 0 : index
      %181 = vector.load %arg8[%c2_136, %c0_137, %c0_138] : memref<4x8x1xf32, #tpu.memory_space<vmem>>, vector<1x8x1xf32>
      %182 = vector.shape_cast %181 : vector<1x8x1xf32> to vector<8x1xf32>
      %183 = vector.broadcast %182 : vector<8x1xf32> to vector<8x8xf32>
      %184 = arith.addf %180, %183 : vector<8x8xf32>
      %185 = arith.truncf %184 : vector<8x8xf32> to vector<8x8xbf16>
      %c2_139 = arith.constant 2 : index
      %c0_140 = arith.constant 0 : index
      %c0_141 = arith.constant 0 : index
      %186 = vector.load %arg14[%c2_139, %c0_140, %c0_141] : memref<4x8x8xbf16, #tpu.memory_space<vmem>>, vector<1x8x8xbf16>
      %187 = vector.shape_cast %186 : vector<1x8x8xbf16> to vector<8x8xbf16>
      %188 = vector.shape_cast %185 : vector<8x8xbf16> to vector<1x8x8xbf16>
      tpu.vector_store %arg14[%c2_139, %c0_140, %c0_141], %188 {strides = array<i32>} : memref<4x8x8xbf16, #tpu.memory_space<vmem>>, vector<1x8x8xbf16>,
      %c2_142 = arith.constant 2 : index
      %c0_143 = arith.constant 0 : index
      %c0_144 = arith.constant 0 : index
      %189 = vector.load %arg9[%c2_142, %c0_143, %c0_144] : memref<4x32x8xbf16, #tpu.memory_space<vmem>>, vector<1x32x8xbf16>
      %190 = vector.shape_cast %189 : vector<1x32x8xbf16> to vector<32x8xbf16>
      %cst_145 = arith.constant dense<0.000000e+00> : vector<8x8xf32>
      %191 = tpu.matmul %133, %190, %cst_145 {dimension_numbers = #tpu.dot_dimension_numbers<[1], [0], [0], [1], [0, 0, 1, 1], [], []>} : vector<8x32xbf16>, vector<32x8xbf16>, vector<8x8xf32> -> vector<8x8xf32>
      %c2_146 = arith.constant 2 : index
      %c0_147 = arith.constant 0 : index
      %c0_148 = arith.constant 0 : index
      %192 = vector.load %arg10[%c2_146, %c0_147, %c0_148] : memref<4x1x8xf32, #tpu.memory_space<vmem>>, vector<1x1x8xf32>
      %193 = vector.shape_cast %192 : vector<1x1x8xf32> to vector<1x8xf32>
      %194 = vector.broadcast %193 : vector<1x8xf32> to vector<8x8xf32>
      %195 = arith.addf %191, %194 : vector<8x8xf32>
      %196 = arith.truncf %195 : vector<8x8xf32> to vector<8x8xbf16>
      %c2_149 = arith.constant 2 : index
      %c0_150 = arith.constant 0 : index
      %c0_151 = arith.constant 0 : index
      %197 = vector.load %arg15[%c2_149, %c0_150, %c0_151] : memref<4x8x8xbf16, #tpu.memory_space<vmem>>, vector<1x8x8xbf16>
      %198 = vector.shape_cast %197 : vector<1x8x8xbf16> to vector<8x8xbf16>
      %199 = vector.shape_cast %196 : vector<8x8xbf16> to vector<1x8x8xbf16>
      tpu.vector_store %arg15[%c2_149, %c0_150, %c0_151], %199 {strides = array<i32>} : memref<4x8x8xbf16, #tpu.memory_space<vmem>>, vector<1x8x8xbf16>,
      %c3_152 = arith.constant 3 : index
      %c0_153 = arith.constant 0 : index
      %c0_154 = arith.constant 0 : index
      %200 = vector.load %arg7[%c3_152, %c0_153, %c0_154] : memref<4x8x32xbf16, #tpu.memory_space<vmem>>, vector<1x8x32xbf16>
      %201 = vector.shape_cast %200 : vector<1x8x32xbf16> to vector<8x32xbf16>
      %cst_155 = arith.constant dense<0.000000e+00> : vector<8x8xf32>
      %202 = tpu.matmul %201, %131, %cst_155 {dimension_numbers = #tpu.dot_dimension_numbers<[1], [0], [0], [1], [0, 0, 1, 1], [], []>} : vector<8x32xbf16>, vector<32x8xbf16>, vector<8x8xf32> -> vector<8x8xf32>
      %c3_156 = arith.constant 3 : index
      %c0_157 = arith.constant 0 : index
      %c0_158 = arith.constant 0 : index
      %203 = vector.load %arg8[%c3_156, %c0_157, %c0_158] : memref<4x8x1xf32, #tpu.memory_space<vmem>>, vector<1x8x1xf32>
      %204 = vector.shape_cast %203 : vector<1x8x1xf32> to vector<8x1xf32>
      %205 = vector.broadcast %204 : vector<8x1xf32> to vector<8x8xf32>
      %206 = arith.addf %202, %205 : vector<8x8xf32>
      %207 = arith.truncf %206 : vector<8x8xf32> to vector<8x8xbf16>
      %c3_159 = arith.constant 3 : index
      %c0_160 = arith.constant 0 : index
      %c0_161 = arith.constant 0 : index
      %208 = vector.load %arg14[%c3_159, %c0_160, %c0_161] : memref<4x8x8xbf16, #tpu.memory_space<vmem>>, vector<1x8x8xbf16>
      %209 = vector.shape_cast %208 : vector<1x8x8xbf16> to vector<8x8xbf16>
      %210 = vector.shape_cast %207 : vector<8x8xbf16> to vector<1x8x8xbf16>
      tpu.vector_store %arg14[%c3_159, %c0_160, %c0_161], %210 {strides = array<i32>} : memref<4x8x8xbf16, #tpu.memory_space<vmem>>, vector<1x8x8xbf16>,
      %c3_162 = arith.constant 3 : index
      %c0_163 = arith.constant 0 : index
      %c0_164 = arith.constant 0 : index
      %211 = vector.load %arg9[%c3_162, %c0_163, %c0_164] : memref<4x32x8xbf16, #tpu.memory_space<vmem>>, vector<1x32x8xbf16>
      %212 = vector.shape_cast %211 : vector<1x32x8xbf16> to vector<32x8xbf16>
      %cst_165 = arith.constant dense<0.000000e+00> : vector<8x8xf32>
      %213 = tpu.matmul %133, %212, %cst_165 {dimension_numbers = #tpu.dot_dimension_numbers<[1], [0], [0], [1], [0, 0, 1, 1], [], []>} : vector<8x32xbf16>, vector<32x8xbf16>, vector<8x8xf32> -> vector<8x8xf32>
      %c3_166 = arith.constant 3 : index
      %c0_167 = arith.constant 0 : index
      %c0_168 = arith.constant 0 : index
      %214 = vector.load %arg10[%c3_166, %c0_167, %c0_168] : memref<4x1x8xf32, #tpu.memory_space<vmem>>, vector<1x1x8xf32>
      %215 = vector.shape_cast %214 : vector<1x1x8xf32> to vector<1x8xf32>
      %216 = vector.broadcast %215 : vector<1x8xf32> to vector<8x8xf32>
      %217 = arith.addf %213, %216 : vector<8x8xf32>
      %218 = arith.truncf %217 : vector<8x8xf32> to vector<8x8xbf16>
      %c3_169 = arith.constant 3 : index
      %c0_170 = arith.constant 0 : index
      %c0_171 = arith.constant 0 : index
      %219 = vector.load %arg15[%c3_169, %c0_170, %c0_171] : memref<4x8x8xbf16, #tpu.memory_space<vmem>>, vector<1x8x8xbf16>
      %220 = vector.shape_cast %219 : vector<1x8x8xbf16> to vector<8x8xbf16>
      %221 = vector.shape_cast %218 : vector<8x8xbf16> to vector<1x8x8xbf16>
      tpu.vector_store %arg15[%c3_169, %c0_170, %c0_171], %221 {strides = array<i32>} : memref<4x8x8xbf16, #tpu.memory_space<vmem>>, vector<1x8x8xbf16>,
    } else {
    }
    %c0 = arith.constant 0 : index
    %c0_1 = arith.constant 0 : index
    %c0_2 = arith.constant 0 : index
    %3 = vector.load %arg2[%c0, %c0_1, %c0_2] : memref<1x8x32xbf16, #tpu.memory_space<vmem>>, vector<1x8x32xbf16>
    %4 = vector.shape_cast %3 : vector<1x8x32xbf16> to vector<8x32xbf16>
    %c0_3 = arith.constant 0 : index
    %c0_4 = arith.constant 0 : index
    %c0_5 = arith.constant 0 : index
    %5 = vector.load %arg5[%c0_3, %c0_4, %c0_5] : memref<4x32x8xbf16, #tpu.memory_space<vmem>>, vector<1x32x8xbf16>
    %6 = vector.shape_cast %5 : vector<1x32x8xbf16> to vector<32x8xbf16>
    %cst = arith.constant dense<0.000000e+00> : vector<8x8xf32>
    %7 = tpu.matmul %4, %6, %cst {dimension_numbers = #tpu.dot_dimension_numbers<[1], [0], [0], [1], [0, 0, 1, 1], [], []>} : vector<8x32xbf16>, vector<32x8xbf16>, vector<8x8xf32> -> vector<8x8xf32>
    %c0_6 = arith.constant 0 : index
    %c0_7 = arith.constant 0 : index
    %c0_8 = arith.constant 0 : index
    %8 = vector.load %arg6[%c0_6, %c0_7, %c0_8] : memref<4x1x8xf32, #tpu.memory_space<vmem>>, vector<1x1x8xf32>
    %9 = vector.shape_cast %8 : vector<1x1x8xf32> to vector<1x8xf32>
    %10 = vector.broadcast %9 : vector<1x8xf32> to vector<8x8xf32>
    %11 = arith.addf %7, %10 : vector<8x8xf32>
    %cst_9 = arith.constant 0.353553385 : f32
    %12 = vector.broadcast %cst_9 : f32 to vector<8x8xf32>
    %13 = arith.mulf %11, %12 : vector<8x8xf32>
    %14 = arith.truncf %13 : vector<8x8xf32> to vector<8x8xbf16>
    %c0_10 = arith.constant 0 : index
    %c0_11 = arith.constant 0 : index
    %c0_12 = arith.constant 0 : index
    %15 = vector.load %arg14[%c0_10, %c0_11, %c0_12] : memref<4x8x8xbf16, #tpu.memory_space<vmem>>, vector<1x8x8xbf16>
    %16 = vector.shape_cast %15 : vector<1x8x8xbf16> to vector<8x8xbf16>
    %cst_13 = arith.constant dense<0.000000e+00> : vector<8x8xf32>
    %17 = tpu.matmul %14, %16, %cst_13 {dimension_numbers = #tpu.dot_dimension_numbers<[1], [0], [0], [1], [0, 0, 1, 1], [], []>} : vector<8x8xbf16>, vector<8x8xbf16>, vector<8x8xf32> -> vector<8x8xf32>
    %cst_14 = arith.constant dense<0xFF800000> : vector<8xf32>
    %18 = vector.multi_reduction <maximumf>, %17, %cst_14 [1] : vector<8x8xf32> to vector<8xf32>
    %19 = vector.shape_cast %18 : vector<8xf32> to vector<8x1xf32>
    %20 = vector.broadcast %19 : vector<8x1xf32> to vector<8x8xf32>
    %21 = arith.subf %17, %20 : vector<8x8xf32>
    %22 = math.exp %21 : vector<8x8xf32>
    %cst_15 = arith.constant dense<0.000000e+00> : vector<8xf32>
    %23 = vector.multi_reduction <add>, %22, %cst_15 [1] : vector<8x8xf32> to vector<8xf32>
    %24 = vector.shape_cast %23 : vector<8xf32> to vector<8x1xf32>
    %25 = arith.truncf %22 : vector<8x8xf32> to vector<8x8xbf16>
    %c0_16 = arith.constant 0 : index
    %c0_17 = arith.constant 0 : index
    %c0_18 = arith.constant 0 : index
    %26 = vector.load %arg15[%c0_16, %c0_17, %c0_18] : memref<4x8x8xbf16, #tpu.memory_space<vmem>>, vector<1x8x8xbf16>
    %27 = vector.shape_cast %26 : vector<1x8x8xbf16> to vector<8x8xbf16>
    %cst_19 = arith.constant dense<0.000000e+00> : vector<8x8xf32>
    %28 = tpu.matmul %25, %27, %cst_19 {dimension_numbers = #tpu.dot_dimension_numbers<[1], [0], [0], [1], [0, 0, 1, 1], [], []>} : vector<8x8xbf16>, vector<8x8xbf16>, vector<8x8xf32> -> vector<8x8xf32>
    %29 = tpu.reciprocal %24 {approx = true} : vector<8x1xf32> -> vector<8x1xf32>
    %30 = vector.broadcast %29 : vector<8x1xf32> to vector<8x8xf32>
    %31 = arith.mulf %28, %30 : vector<8x8xf32>
    %32 = arith.truncf %31 : vector<8x8xf32> to vector<8x8xbf16>
    %c0_20 = arith.constant 0 : index
    %c0_21 = arith.constant 0 : index
    %33 = vector.load %arg16[%c0_20, %c0_21] : memref<8x32xbf16, #tpu.memory_space<vmem>>, vector<8x8xbf16>
    tpu.vector_store %arg16[%c0_20, %c0_21], %32 {strides = array<i32>} : memref<8x32xbf16, #tpu.memory_space<vmem>>, vector<8x8xbf16>,
    %c1 = arith.constant 1 : index
    %c0_22 = arith.constant 0 : index
    %c0_23 = arith.constant 0 : index
    %34 = vector.load %arg5[%c1, %c0_22, %c0_23] : memref<4x32x8xbf16, #tpu.memory_space<vmem>>, vector<1x32x8xbf16>
    %35 = vector.shape_cast %34 : vector<1x32x8xbf16> to vector<32x8xbf16>
    %cst_24 = arith.constant dense<0.000000e+00> : vector<8x8xf32>
    %36 = tpu.matmul %4, %35, %cst_24 {dimension_numbers = #tpu.dot_dimension_numbers<[1], [0], [0], [1], [0, 0, 1, 1], [], []>} : vector<8x32xbf16>, vector<32x8xbf16>, vector<8x8xf32> -> vector<8x8xf32>
    %c1_25 = arith.constant 1 : index
    %c0_26 = arith.constant 0 : index
    %c0_27 = arith.constant 0 : index
    %37 = vector.load %arg6[%c1_25, %c0_26, %c0_27] : memref<4x1x8xf32, #tpu.memory_space<vmem>>, vector<1x1x8xf32>
    %38 = vector.shape_cast %37 : vector<1x1x8xf32> to vector<1x8xf32>
    %39 = vector.broadcast %38 : vector<1x8xf32> to vector<8x8xf32>
    %40 = arith.addf %36, %39 : vector<8x8xf32>
    %cst_28 = arith.constant 0.353553385 : f32
    %41 = vector.broadcast %cst_28 : f32 to vector<8x8xf32>
    %42 = arith.mulf %40, %41 : vector<8x8xf32>
    %43 = arith.truncf %42 : vector<8x8xf32> to vector<8x8xbf16>
    %c1_29 = arith.constant 1 : index
    %c0_30 = arith.constant 0 : index
    %c0_31 = arith.constant 0 : index
    %44 = vector.load %arg14[%c1_29, %c0_30, %c0_31] : memref<4x8x8xbf16, #tpu.memory_space<vmem>>, vector<1x8x8xbf16>
    %45 = vector.shape_cast %44 : vector<1x8x8xbf16> to vector<8x8xbf16>
    %cst_32 = arith.constant dense<0.000000e+00> : vector<8x8xf32>
    %46 = tpu.matmul %43, %45, %cst_32 {dimension_numbers = #tpu.dot_dimension_numbers<[1], [0], [0], [1], [0, 0, 1, 1], [], []>} : vector<8x8xbf16>, vector<8x8xbf16>, vector<8x8xf32> -> vector<8x8xf32>
    %cst_33 = arith.constant dense<0xFF800000> : vector<8xf32>
    %47 = vector.multi_reduction <maximumf>, %46, %cst_33 [1] : vector<8x8xf32> to vector<8xf32>
    %48 = vector.shape_cast %47 : vector<8xf32> to vector<8x1xf32>
    %49 = vector.broadcast %48 : vector<8x1xf32> to vector<8x8xf32>
    %50 = arith.subf %46, %49 : vector<8x8xf32>
    %51 = math.exp %50 : vector<8x8xf32>
    %cst_34 = arith.constant dense<0.000000e+00> : vector<8xf32>
    %52 = vector.multi_reduction <add>, %51, %cst_34 [1] : vector<8x8xf32> to vector<8xf32>
    %53 = vector.shape_cast %52 : vector<8xf32> to vector<8x1xf32>
    %54 = arith.truncf %51 : vector<8x8xf32> to vector<8x8xbf16>
    %c1_35 = arith.constant 1 : index
    %c0_36 = arith.constant 0 : index
    %c0_37 = arith.constant 0 : index
    %55 = vector.load %arg15[%c1_35, %c0_36, %c0_37] : memref<4x8x8xbf16, #tpu.memory_space<vmem>>, vector<1x8x8xbf16>
    %56 = vector.shape_cast %55 : vector<1x8x8xbf16> to vector<8x8xbf16>
    %cst_38 = arith.constant dense<0.000000e+00> : vector<8x8xf32>
    %57 = tpu.matmul %54, %56, %cst_38 {dimension_numbers = #tpu.dot_dimension_numbers<[1], [0], [0], [1], [0, 0, 1, 1], [], []>} : vector<8x8xbf16>, vector<8x8xbf16>, vector<8x8xf32> -> vector<8x8xf32>
    %58 = tpu.reciprocal %53 {approx = true} : vector<8x1xf32> -> vector<8x1xf32>
    %59 = vector.broadcast %58 : vector<8x1xf32> to vector<8x8xf32>
    %60 = arith.mulf %57, %59 : vector<8x8xf32>
    %61 = arith.truncf %60 : vector<8x8xf32> to vector<8x8xbf16>
    %c0_39 = arith.constant 0 : index
    %c8 = arith.constant 8 : index
    %62 = vector.load %arg16[%c0_39, %c8] : memref<8x32xbf16, #tpu.memory_space<vmem>>, vector<8x8xbf16>
    tpu.vector_store %arg16[%c0_39, %c8], %61 {strides = array<i32>} : memref<8x32xbf16, #tpu.memory_space<vmem>>, vector<8x8xbf16>,
    %c2 = arith.constant 2 : index
    %c0_40 = arith.constant 0 : index
    %c0_41 = arith.constant 0 : index
    %63 = vector.load %arg5[%c2, %c0_40, %c0_41] : memref<4x32x8xbf16, #tpu.memory_space<vmem>>, vector<1x32x8xbf16>
    %64 = vector.shape_cast %63 : vector<1x32x8xbf16> to vector<32x8xbf16>
    %cst_42 = arith.constant dense<0.000000e+00> : vector<8x8xf32>
    %65 = tpu.matmul %4, %64, %cst_42 {dimension_numbers = #tpu.dot_dimension_numbers<[1], [0], [0], [1], [0, 0, 1, 1], [], []>} : vector<8x32xbf16>, vector<32x8xbf16>, vector<8x8xf32> -> vector<8x8xf32>
    %c2_43 = arith.constant 2 : index
    %c0_44 = arith.constant 0 : index
    %c0_45 = arith.constant 0 : index
    %66 = vector.load %arg6[%c2_43, %c0_44, %c0_45] : memref<4x1x8xf32, #tpu.memory_space<vmem>>, vector<1x1x8xf32>
    %67 = vector.shape_cast %66 : vector<1x1x8xf32> to vector<1x8xf32>
    %68 = vector.broadcast %67 : vector<1x8xf32> to vector<8x8xf32>
    %69 = arith.addf %65, %68 : vector<8x8xf32>
    %cst_46 = arith.constant 0.353553385 : f32
    %70 = vector.broadcast %cst_46 : f32 to vector<8x8xf32>
    %71 = arith.mulf %69, %70 : vector<8x8xf32>
    %72 = arith.truncf %71 : vector<8x8xf32> to vector<8x8xbf16>
    %c2_47 = arith.constant 2 : index
    %c0_48 = arith.constant 0 : index
    %c0_49 = arith.constant 0 : index
    %73 = vector.load %arg14[%c2_47, %c0_48, %c0_49] : memref<4x8x8xbf16, #tpu.memory_space<vmem>>, vector<1x8x8xbf16>
    %74 = vector.shape_cast %73 : vector<1x8x8xbf16> to vector<8x8xbf16>
    %cst_50 = arith.constant dense<0.000000e+00> : vector<8x8xf32>
    %75 = tpu.matmul %72, %74, %cst_50 {dimension_numbers = #tpu.dot_dimension_numbers<[1], [0], [0], [1], [0, 0, 1, 1], [], []>} : vector<8x8xbf16>, vector<8x8xbf16>, vector<8x8xf32> -> vector<8x8xf32>
    %cst_51 = arith.constant dense<0xFF800000> : vector<8xf32>
    %76 = vector.multi_reduction <maximumf>, %75, %cst_51 [1] : vector<8x8xf32> to vector<8xf32>
    %77 = vector.shape_cast %76 : vector<8xf32> to vector<8x1xf32>
    %78 = vector.broadcast %77 : vector<8x1xf32> to vector<8x8xf32>
    %79 = arith.subf %75, %78 : vector<8x8xf32>
    %80 = math.exp %79 : vector<8x8xf32>
    %cst_52 = arith.constant dense<0.000000e+00> : vector<8xf32>
    %81 = vector.multi_reduction <add>, %80, %cst_52 [1] : vector<8x8xf32> to vector<8xf32>
    %82 = vector.shape_cast %81 : vector<8xf32> to vector<8x1xf32>
    %83 = arith.truncf %80 : vector<8x8xf32> to vector<8x8xbf16>
    %c2_53 = arith.constant 2 : index
    %c0_54 = arith.constant 0 : index
    %c0_55 = arith.constant 0 : index
    %84 = vector.load %arg15[%c2_53, %c0_54, %c0_55] : memref<4x8x8xbf16, #tpu.memory_space<vmem>>, vector<1x8x8xbf16>
    %85 = vector.shape_cast %84 : vector<1x8x8xbf16> to vector<8x8xbf16>
    %cst_56 = arith.constant dense<0.000000e+00> : vector<8x8xf32>
    %86 = tpu.matmul %83, %85, %cst_56 {dimension_numbers = #tpu.dot_dimension_numbers<[1], [0], [0], [1], [0, 0, 1, 1], [], []>} : vector<8x8xbf16>, vector<8x8xbf16>, vector<8x8xf32> -> vector<8x8xf32>
    %87 = tpu.reciprocal %82 {approx = true} : vector<8x1xf32> -> vector<8x1xf32>
    %88 = vector.broadcast %87 : vector<8x1xf32> to vector<8x8xf32>
    %89 = arith.mulf %86, %88 : vector<8x8xf32>
    %90 = arith.truncf %89 : vector<8x8xf32> to vector<8x8xbf16>
    %c0_57 = arith.constant 0 : index
    %c16 = arith.constant 16 : index
    %91 = vector.load %arg16[%c0_57, %c16] : memref<8x32xbf16, #tpu.memory_space<vmem>>, vector<8x8xbf16>
    tpu.vector_store %arg16[%c0_57, %c16], %90 {strides = array<i32>} : memref<8x32xbf16, #tpu.memory_space<vmem>>, vector<8x8xbf16>,
    %c3 = arith.constant 3 : index
    %c0_58 = arith.constant 0 : index
    %c0_59 = arith.constant 0 : index
    %92 = vector.load %arg5[%c3, %c0_58, %c0_59] : memref<4x32x8xbf16, #tpu.memory_space<vmem>>, vector<1x32x8xbf16>
    %93 = vector.shape_cast %92 : vector<1x32x8xbf16> to vector<32x8xbf16>
    %cst_60 = arith.constant dense<0.000000e+00> : vector<8x8xf32>
    %94 = tpu.matmul %4, %93, %cst_60 {dimension_numbers = #tpu.dot_dimension_numbers<[1], [0], [0], [1], [0, 0, 1, 1], [], []>} : vector<8x32xbf16>, vector<32x8xbf16>, vector<8x8xf32> -> vector<8x8xf32>
    %c3_61 = arith.constant 3 : index
    %c0_62 = arith.constant 0 : index
    %c0_63 = arith.constant 0 : index
    %95 = vector.load %arg6[%c3_61, %c0_62, %c0_63] : memref<4x1x8xf32, #tpu.memory_space<vmem>>, vector<1x1x8xf32>
    %96 = vector.shape_cast %95 : vector<1x1x8xf32> to vector<1x8xf32>
    %97 = vector.broadcast %96 : vector<1x8xf32> to vector<8x8xf32>
    %98 = arith.addf %94, %97 : vector<8x8xf32>
    %cst_64 = arith.constant 0.353553385 : f32
    %99 = vector.broadcast %cst_64 : f32 to vector<8x8xf32>
    %100 = arith.mulf %98, %99 : vector<8x8xf32>
    %101 = arith.truncf %100 : vector<8x8xf32> to vector<8x8xbf16>
    %c3_65 = arith.constant 3 : index
    %c0_66 = arith.constant 0 : index
    %c0_67 = arith.constant 0 : index
    %102 = vector.load %arg14[%c3_65, %c0_66, %c0_67] : memref<4x8x8xbf16, #tpu.memory_space<vmem>>, vector<1x8x8xbf16>
    %103 = vector.shape_cast %102 : vector<1x8x8xbf16> to vector<8x8xbf16>
    %cst_68 = arith.constant dense<0.000000e+00> : vector<8x8xf32>
    %104 = tpu.matmul %101, %103, %cst_68 {dimension_numbers = #tpu.dot_dimension_numbers<[1], [0], [0], [1], [0, 0, 1, 1], [], []>} : vector<8x8xbf16>, vector<8x8xbf16>, vector<8x8xf32> -> vector<8x8xf32>
    %cst_69 = arith.constant dense<0xFF800000> : vector<8xf32>
    %105 = vector.multi_reduction <maximumf>, %104, %cst_69 [1] : vector<8x8xf32> to vector<8xf32>
    %106 = vector.shape_cast %105 : vector<8xf32> to vector<8x1xf32>
    %107 = vector.broadcast %106 : vector<8x1xf32> to vector<8x8xf32>
    %108 = arith.subf %104, %107 : vector<8x8xf32>
    %109 = math.exp %108 : vector<8x8xf32>
    %cst_70 = arith.constant dense<0.000000e+00> : vector<8xf32>
    %110 = vector.multi_reduction <add>, %109, %cst_70 [1] : vector<8x8xf32> to vector<8xf32>
    %111 = vector.shape_cast %110 : vector<8xf32> to vector<8x1xf32>
    %112 = arith.truncf %109 : vector<8x8xf32> to vector<8x8xbf16>
    %c3_71 = arith.constant 3 : index
    %c0_72 = arith.constant 0 : index
    %c0_73 = arith.constant 0 : index
    %113 = vector.load %arg15[%c3_71, %c0_72, %c0_73] : memref<4x8x8xbf16, #tpu.memory_space<vmem>>, vector<1x8x8xbf16>
    %114 = vector.shape_cast %113 : vector<1x8x8xbf16> to vector<8x8xbf16>
    %cst_74 = arith.constant dense<0.000000e+00> : vector<8x8xf32>
    %115 = tpu.matmul %112, %114, %cst_74 {dimension_numbers = #tpu.dot_dimension_numbers<[1], [0], [0], [1], [0, 0, 1, 1], [], []>} : vector<8x8xbf16>, vector<8x8xbf16>, vector<8x8xf32> -> vector<8x8xf32>
    %116 = tpu.reciprocal %111 {approx = true} : vector<8x1xf32> -> vector<8x1xf32>
    %117 = vector.broadcast %116 : vector<8x1xf32> to vector<8x8xf32>
    %118 = arith.mulf %115, %117 : vector<8x8xf32>
    %119 = arith.truncf %118 : vector<8x8xf32> to vector<8x8xbf16>
    %c0_75 = arith.constant 0 : index
    %c24 = arith.constant 24 : index
    %120 = vector.load %arg16[%c0_75, %c24] : memref<8x32xbf16, #tpu.memory_space<vmem>>, vector<8x8xbf16>
    tpu.vector_store %arg16[%c0_75, %c24], %119 {strides = array<i32>} : memref<8x32xbf16, #tpu.memory_space<vmem>>, vector<8x8xbf16>,
    %c0_76 = arith.constant 0 : index
    %c0_77 = arith.constant 0 : index
    %121 = vector.load %arg16[%c0_76, %c0_77] : memref<8x32xbf16, #tpu.memory_space<vmem>>, vector<8x32xbf16>
    %c0_78 = arith.constant 0 : index
    %c0_79 = arith.constant 0 : index
    %122 = vector.load %arg11[%c0_78, %c0_79] : memref<32x32xbf16, #tpu.memory_space<vmem>>, vector<32x32xbf16>
    %cst_80 = arith.constant dense<0.000000e+00> : vector<8x32xf32>
    %123 = tpu.matmul %121, %122, %cst_80 {dimension_numbers = #tpu.dot_dimension_numbers<[1], [0], [0], [1], [0, 0, 1, 1], [], []>} : vector<8x32xbf16>, vector<32x32xbf16>, vector<8x32xf32> -> vector<8x32xf32>
    %c0_81 = arith.constant 0 : index
    %c0_82 = arith.constant 0 : index
    %124 = vector.load %arg12[%c0_81, %c0_82] : memref<1x32xf32, #tpu.memory_space<vmem>>, vector<1x32xf32>
    %125 = vector.broadcast %124 : vector<1x32xf32> to vector<8x32xf32>
    %126 = arith.addf %123, %125 : vector<8x32xf32>
    %c0_83 = arith.constant 0 : index
    %c0_84 = arith.constant 0 : index
    %c0_85 = arith.constant 0 : index
    %127 = vector.load %arg13[%c0_83, %c0_84, %c0_85] : memref<1x8x32xf32, #tpu.memory_space<vmem>>, vector<1x8x32xf32>
    %128 = vector.shape_cast %127 : vector<1x8x32xf32> to vector<8x32xf32>
    %129 = vector.shape_cast %126 : vector<8x32xf32> to vector<1x8x32xf32>
    tpu.vector_store %arg13[%c0_83, %c0_84, %c0_85], %129 {strides = array<i32>} : memref<1x8x32xf32, #tpu.memory_space<vmem>>, vector<1x8x32xf32>,
    return
  }
  func.func @transform_0(%arg0: i32, %arg1: i32) -> (i32, i32, i32) {
    %c0_i32 = arith.constant 0 : i32
    %c0_i32_0 = arith.constant 0 : i32
    return %arg0, %arg1, %c0_i32 : i32, i32, i32
  }
  func.func @transform_1(%arg0: i32, %arg1: i32) -> (i32, i32, i32) {
    %c0_i32 = arith.constant 0 : i32
    %c0_i32_0 = arith.constant 0 : i32
    %c0_i32_1 = arith.constant 0 : i32
    return %arg0, %c0_i32, %c0_i32_0 : i32, i32, i32
  }
  func.func @transform_2(%arg0: i32, %arg1: i32) -> (i32, i32, i32) {
    %c0_i32 = arith.constant 0 : i32
    %c0_i32_0 = arith.constant 0 : i32
    %c0_i32_1 = arith.constant 0 : i32
    return %arg0, %c0_i32, %c0_i32_0 : i32, i32, i32
  }
  func.func @transform_3(%arg0: i32, %arg1: i32) -> (i32, i32, i32) {
    %c0_i32 = arith.constant 0 : i32
    %c0_i32_0 = arith.constant 0 : i32
    %c0_i32_1 = arith.constant 0 : i32
    %c0_i32_2 = arith.constant 0 : i32
    return %c0_i32, %c0_i32_0, %c0_i32_1 : i32, i32, i32
  }
  func.func @transform_4(%arg0: i32, %arg1: i32) -> (i32, i32, i32) {
    %c0_i32 = arith.constant 0 : i32
    %c0_i32_0 = arith.constant 0 : i32
    %c0_i32_1 = arith.constant 0 : i32
    %c0_i32_2 = arith.constant 0 : i32
    return %c0_i32, %c0_i32_0, %c0_i32_1 : i32, i32, i32
  }
  func.func @transform_5(%arg0: i32, %arg1: i32) -> (i32, i32, i32) {
    %c0_i32 = arith.constant 0 : i32
    %c0_i32_0 = arith.constant 0 : i32
    %c0_i32_1 = arith.constant 0 : i32
    %c0_i32_2 = arith.constant 0 : i32
    return %c0_i32, %c0_i32_0, %c0_i32_1 : i32, i32, i32
  }
  func.func @transform_6(%arg0: i32, %arg1: i32) -> (i32, i32, i32) {
    %c0_i32 = arith.constant 0 : i32
    %c0_i32_0 = arith.constant 0 : i32
    %c0_i32_1 = arith.constant 0 : i32
    %c0_i32_2 = arith.constant 0 : i32
    return %c0_i32, %c0_i32_0, %c0_i32_1 : i32, i32, i32
  }
  func.func @transform_7(%arg0: i32, %arg1: i32) -> (i32, i32, i32) {
    %c0_i32 = arith.constant 0 : i32
    %c0_i32_0 = arith.constant 0 : i32
    %c0_i32_1 = arith.constant 0 : i32
    %c0_i32_2 = arith.constant 0 : i32
    return %c0_i32, %c0_i32_0, %c0_i32_1 : i32, i32, i32
  }
  func.func @transform_8(%arg0: i32, %arg1: i32) -> (i32, i32, i32) {
    %c0_i32 = arith.constant 0 : i32
    %c0_i32_0 = arith.constant 0 : i32
    %c0_i32_1 = arith.constant 0 : i32
    %c0_i32_2 = arith.constant 0 : i32
    return %c0_i32, %c0_i32_0, %c0_i32_1 : i32, i32, i32
  }
  func.func @transform_9(%arg0: i32, %arg1: i32) -> (i32, i32) {
    %c0_i32 = arith.constant 0 : i32
    %c0_i32_0 = arith.constant 0 : i32
    %c0_i32_1 = arith.constant 0 : i32
    return %c0_i32, %c0_i32_0 : i32, i32
  }
  func.func @transform_10(%arg0: i32, %arg1: i32) -> (i32, i32) {
    %c0_i32 = arith.constant 0 : i32
    %c0_i32_0 = arith.constant 0 : i32
    %c0_i32_1 = arith.constant 0 : i32
    return %c0_i32, %c0_i32_0 : i32, i32
  }
  func.func @transform_11(%arg0: i32, %arg1: i32) -> (i32, i32, i32) {
    %c0_i32 = arith.constant 0 : i32
    %c0_i32_0 = arith.constant 0 : i32
    return %arg0, %arg1, %c0_i32 : i32, i32, i32
  }
}

</mosaic_0001>

<bundles_post_ra>
// kernel: tpu_custom_call.1
= control target key start
LH: loop header
LB: loop body
LE: loop exit
PB: predicated region body
PF: predicated region fallthrough
CT: control target
= control target key end

     0   :  { %16 = vsyncpa [#allocation6], 0  ;;  %s2805_s0 = inlined_call_operand.vmem [shape: bf16[2,8,32], index: 0, kind: input, shape index: {}]   ;;  %s2806_s1 = inlined_call_operand.vmem [shape: bf16[2,32,8], index: 1, kind: input, shape index: {}]   ;;  %s2807_s2 = inlined_call_operand.vmem [shape: bf16[2,8,32], index: 2, kind: input, shape index: {}]   ;;  %s2808_s3 = inlined_call_operand.vmem [shape: bf16[4,32,8], index: 3, kind: input, shape index: {}]   ;;  %s2809_s4 = inlined_call_operand.vmem [shape: f32[4,1,8], index: 4, kind: input, shape index: {}]   ;;  %s2810_s5 = inlined_call_operand.vmem [shape: bf16[4,8,32], index: 5, kind: input, shape index: {}]   ;;  %s2811_s6 = inlined_call_operand.vmem [shape: f32[4,8,1], index: 6, kind: input, shape index: {}]   ;;  %s2812_s7 = inlined_call_operand.vmem [shape: bf16[4,32,8], index: 7, kind: input, shape index: {}]   ;;  %s2813_s8 = inlined_call_operand.vmem [shape: f32[4,1,8], index: 8, kind: input, shape index: {}]   ;;  %s2814_s9 = inlined_call_operand.vmem [shape: bf16[32,32], index: 9, kind: input, shape index: {}]   ;;  %s2815_s10 = inlined_call_operand.vmem [shape: f32[1,32], index: 10, kind: input, shape index: {}]   ;;  %s2816_s11 = inlined_call_operand.hbm [shape: f32[2,8,32], index: 11, kind: output, shape index: {}]  }
   0x1   :  { %18 = vsyncpa [#allocation6 + $0x1], 0  ;;  %s2426_s17 = smov 0   ;;  %s2428_s18 = smov 0  }
   0x2   :  { %s2430_s19 = smov 0   ;;  %s2432_s20 = smov 0  }
   0x3   :  { %s2434_s21 = smov 0   ;;  %s2436_s22 = smov 0  }
   0x4 LB: > { %2820 = sst [smem:[#allocation8_spill]] %s2345_s19  ;;  %s1868_s23 = sadd.s32 4294967295, %s2357_s22   ;;  %s2357_s22 = sphi %s2436_s22, %s24_s22   ;;  %s2353_s21 = sphi %s2434_s21, %s2829_s21   ;;  %s2349_s20 = sphi %s2432_s20, %s2828_s20   ;;  %s2345_s19 = sphi %s2430_s19, %s2827_s19   ;;  %s2341_s18 = sphi %s2428_s18, %s2831_s18   ;;  %s2337_s17 = sphi %s2426_s17, %s2830_s17  }
   0x5   : > { %2821 = sst [smem:[#allocation9_spill]] %s2353_s21  ;;  %s1869_s24 = sadd.s32 4294967294, %s2357_s22  }
   0x6   : > { %s36_s25 = sadd.s32 1, %s2353_s21  ;;  %s293_s26 = sadd.s32 1, %s2345_s19 }
   0x7   : > { %p38_p0 = scmp.ge.s32.totalorder %s36_s25, 2  ;;  %p303_p1 = scmp.ne.s32.totalorder %s2345_s19, %s2341_s18 }
   0x8   : > { %p304_p2 = scmp.eq.s32.totalorder %s1868_s23, 1  ;;  %p309_p3 = scmp.ne.s32.totalorder %s2341_s18, %s2337_s17 }
   0x9   : > { %s2833_s25 = smov (%p38_p0, %s36_s25), 0  ;;  %p310_p5 = scmp.eq.s32.totalorder %s1869_s24, 1 }
   0xa   : > { %2822 = sst [smem:[#allocation10_spill]] %s2833_s25  ;;  %p2466_p4 = por %p304_p2, %p303_p1 }
   0xb   : > { %s288_s28 = ssub.s32 %s2353_s21, %s2833_s25  ;;  %p1872_p6 = scmp.ge.s32.totalorder %s2357_s22, 1 }
   0xc   : > { %p291_p7 = scmp.eq.s32.totalorder %s288_s28, 0  ;;  %p2473_p8 = por %p310_p5, %p309_p3 }
   0xd   : > { %p377_p9 = scmp.lt.s32.totalorder %s2357_s22, 3 }
   0xe   : > { %s2479_s30 = scalar_select %p291_p7, %s2345_s19, %s293_s26  }
   0xf   : > { %p378_p10 = pnand %p1872_p6, %p377_p9 }
  0x10   : > { %2825 = sst [smem:[#allocation11_spill]] %s2479_s30  ;;  %p428_p11 = scmp.lt.s32.totalorder (!%p378_p10), %s2349_s20, 1 }
  0x11   : > { %381 = sbr.rel (%p378_p10) target bundleno = 2226 (0x8b2), region = 64  ;;  %s2364_s23 = smov (!%p378_p10), 24  }
  0x12   : > { %s425_s24 = sand.u32 (!%p378_p10), 1, %s2341_s18   ;;  %s1968_s14 = sshll.u32 (!%p378_p10), %s2349_s20, 7 }
  0x13   : > { %s1873_s26 = sshll.u32 (!%p378_p10), %s425_s24, 3  ;;  %s2365_s25 = smov (!%p378_p10), [#allocation5]  }
  0x14   : > { %s427_s15 = scalar_lea.vmem (!%p378_p10), [#allocation5], %s1873_s26 }
  0x16   : > { %v2359_v0 = vmov 0.0   ;;  %vm2360_vm0 = vmmov 0   ;;  %s2486_s12 = scalar_select %p428_p11, %s2349_s20, 1  ;;  %v2361_v1 = vmov 0   ;;  %v455_v2 = vld [vmem:[%s2811_s6] sm:$0xff]  ;;  %v1886_v3 = vld [vmem:[%s2811_s6 + $0x8] sm:$0xff] }
  0x17   : > { %2030 = vmatprep.subr.bf16.mxu0 %v2359_v0  ;;  %2034 = vmatprep.mubr.msk.bf16.mxu0 %vm2360_vm0, %v2359_v0  ;;  %v2249_v4 = vld [vmem:[%s2812_s7 + $0x8] sm:$0xff]   ;;  %v2250_v7 = vld [vmem:[%s2812_s7] sm:$0xff]   ;;  %v2251_v10 = vld [vmem:[%s2812_s7 + $0x18] sm:$0xff]   ;;  %vm473_vm1 = vcmask 261120   ;;  %vm518_vm2 = vcmask 60416   ;;  %vm1032_vm3 = vcmask 1043456  }
  0x18   : > { %2038 = vmatprep.subr.bf16.mxu1 %v2359_v0  ;;  %2042 = vmatprep.mubr.msk.bf16.mxu1 %vm2360_vm0, %v2359_v0  ;;  %s1971_s13 = sshll.u32 %s2486_s12, 4  ;;  %s1874_s30 = sshll.u32 %s2486_s12, 2  ;;  %v454_v8 = vld [vmem:[%s2810_s5] sm:$0xf]  ;;  %v2252_v11 = vld [vmem:[%s2812_s7 + $0x10] sm:$0xff]   ;;  %v2253_v12 = vld [vmem:[%s2812_s7 + $0x28] sm:$0xff]  }
  0x19   : > { %2243 = vset.pattern.permute.xlu0 %v2361_v1  ;;  %2244 = vset.pattern.permute.xlu1 %v2361_v1  ;;  %s439_s28 = scalar_lea.vmem %s2806_s1, %s1971_s13  ;;  %s443_s19 = scalar_lea.vmem %s2807_s2, %s1874_s30  ;;  %v1885_v13 = vld [vmem:[%s2810_s5 + $0x4] sm:$0xf]  ;;  %v1897_v14 = vld [vmem:[%s2810_s5 + $0x8] sm:$0xf]  ;;  %v1909_v15 = vld [vmem:[%s2810_s5 + $0xc] sm:$0xf] }
  0x1a   : > { %458 = vperm.xlu0 %2243, %v455_v2   ;;  %594 = vperm.xlu1 %2244, %v1886_v3   ;;  %v2245_v5 = vld [vmem:[%s439_s28 + $0x8] sm:$0xff]   ;;  %v2246_v6 = vld [vmem:[%s439_s28] sm:$0xff]   ;;  %s434_s16 = scalar_lea.vmem %s2805_s0, %s1874_s30  ;;  %v2255_v20 = vld [vmem:[%s2812_s7 + $0x38] sm:$0xff]   ;;  %vm1028_vm4 = vcmask 64512   ;;  %s2363_s13 = smov 16   ;;  %vm1320_vm5 = vcmask 126016  }
  0x1b   : > { %2039 = vmatpush3.bf16.msra.mxu1 %v2249_v4  ;;  %2031 = vmatpush3.bf16.msra.mxu0 %v2245_v5  ;;  %v2518_v9 = vld [vmem:[%s443_s19] sm:$0xf]  ;;  %v2247_v16 = vld [vmem:[%s2808_s3 + $0x8] sm:$0xff]   ;;  %v2256_v21 = vld [vmem:[%s2812_s7 + $0x30] sm:$0xff]   ;;  %vm1504_vm6 = vcmask 191616   ;;  %vm1688_vm7 = vcmask 257216   ;;  %s2758_s12 = scalar_lea.hbm %s2816_s11, %s1968_s14 }
  0x1c   : > { %2040 = vmatprep.subr.bf16.mxu1 %v2359_v0  ;;  %2032 = vmatprep.subr.bf16.mxu0 %v2359_v0  ;;  %v2248_v17 = vld [vmem:[%s2808_s3] sm:$0xff]   ;;  %s1759_s30 = scalar_lea.sflag [#allocation6], %s425_s24 }
  0x1d   : > { %v2581_v18 = vld [vmem:[%s434_s16] sm:$0xf]  ;;  %s2362_s16 = smov 8  }
  0x1e   : > { %v2254_v19 = vld [vmem:[%s2812_s7 + $0x20] sm:$0xff]  }
  0x1f   : > { %2041 = vmatpush3.bf16.msra.mxu1 %v2250_v7  ;;  %2033 = vmatpush3.bf16.msra.mxu0 %v2246_v6  ;;  %v1881_v22 = vld [vmem:[%s2813_s8] ss:$0 sm:$0xff]  ;;  %v1893_v35 = vld [vmem:[%s2813_s8 + $0x1] ss:$0 sm:$0xff] }
  0x20   : > { %2054 = vmatprep.subr.bf16.mxu1 %v2359_v0  ;;  %2046 = vmatprep.subr.bf16.mxu0 %v2359_v0  ;;  %v1921_v62 = vld [vmem:[%s2809_s4] ss:$0 sm:$0xff] }
  0x22   : > { %2043 = vmatmul.mubr.msk.bf16.vlgmr.msra.gmra.mxu1 %vm473_vm1, %v2518_v9  ;;  %2035 = vmatmul.mubr.msk.bf16.vlgmr.msra.gmra.mxu0 %vm473_vm1, %v454_v8  ;;  %v2258_v8 = vld [vmem:[%s2808_s3 + $0x10] sm:$0xff]  }
  0x23   : > { %2055 = vmatpush3.bf16.msra.mxu1 %v2251_v10  ;;  %2047 = vmatpush3.bf16.msra.mxu0 %v2245_v5 }
  0x24   : > { %2050 = vmatprep.mubr.msk.bf16.mxu0 %vm2360_vm0, %v2359_v0  ;;  %2048 = vmatprep.subr.bf16.mxu0 %v2359_v0 }
  0x25   : > { %2056 = vmatprep.subr.bf16.mxu1 %v2359_v0  ;;  %2058 = vmatprep.mubr.msk.bf16.mxu1 %vm2360_vm0, %v2359_v0 }
  0x27   : > { %2057 = vmatpush3.bf16.msra.mxu1 %v2252_v11  ;;  %2049 = vmatpush3.bf16.msra.mxu0 %v2246_v6  ;;  %v1905_v11 = vld [vmem:[%s2813_s8 + $0x2] ss:$0 sm:$0xff] }
  0x28   : > { %2070 = vmatprep.subr.bf16.mxu1 %v2359_v0  ;;  %2062 = vmatprep.subr.bf16.mxu0 %v2359_v0 }
  0x2a   : > { %2059 = vmatmul.mubr.msk.bf16.vlgmr.msra.gmra.mxu1 %vm473_vm1, %v2518_v9  ;;  %2051 = vmatmul.mubr.msk.bf16.vlgmr.msra.gmra.mxu0 %vm473_vm1, %v1885_v13 }
  0x2b   : > { %2071 = vmatpush3.bf16.msra.mxu1 %v2253_v12  ;;  %2063 = vmatpush3.bf16.msra.mxu0 %v2245_v5 }
  0x2c   : > { %2066 = vmatprep.mubr.msk.bf16.mxu0 %vm2360_vm0, %v2359_v0  ;;  %2064 = vmatprep.subr.bf16.mxu0 %v2359_v0 }
  0x2d   : > { %2072 = vmatprep.subr.bf16.mxu1 %v2359_v0  ;;  %2074 = vmatprep.mubr.msk.bf16.mxu1 %vm2360_vm0, %v2359_v0 }
  0x2f   : > { %2065 = vmatpush3.bf16.msra.mxu0 %v2246_v6  ;;  %2073 = vmatpush3.bf16.msra.mxu1 %v2254_v19  ;;  %v1917_v19 = vld [vmem:[%s2813_s8 + $0x3] ss:$0 sm:$0xff] }
  0x30   : > { %2078 = vmatprep.subr.bf16.mxu0 %v2359_v0  ;;  %2086 = vmatprep.subr.bf16.mxu1 %v2359_v0 }
  0x32   : > { %2067 = vmatmul.mubr.msk.bf16.vlgmr.msra.gmra.mxu0 %vm473_vm1, %v1897_v14  ;;  %2075 = vmatmul.mubr.msk.bf16.vlgmr.msra.gmra.mxu1 %vm473_vm1, %v2518_v9 }
  0x33   : > { %2079 = vmatpush3.bf16.msra.mxu0 %v2245_v5  ;;  %2082 = vmatprep.mubr.msk.bf16.mxu0 %vm2360_vm0, %v2359_v0  ;;  %v2257_v5 = vld [vmem:[%s2808_s3 + $0x18] sm:$0xff]  }
  0x34   : > { %2080 = vmatprep.subr.bf16.mxu0 %v2359_v0  ;;  %2087 = vmatpush3.bf16.msra.mxu1 %v2255_v20 }
  0x35   : > { %2090 = vmatprep.mubr.msk.bf16.mxu1 %vm2360_vm0, %v2359_v0  ;;  %2088 = vmatprep.subr.bf16.mxu1 %v2359_v0 }
  0x37   : > { %2081 = vmatpush3.bf16.msra.mxu0 %v2246_v6 }
  0x38   : > { %2094 = vmatprep.subr.bf16.mxu0 %v2359_v0  ;;  %2089 = vmatpush3.bf16.msra.mxu1 %v2256_v21 }
  0x39   : > { %2102 = vmatprep.subr.bf16.mxu1 %v2359_v0 }
  0x3a   : > { %2083 = vmatmul.mubr.msk.bf16.vlgmr.msra.gmra.mxu0 %vm473_vm1, %v1909_v15 }
  0x3b   : > { %2095 = vmatpush3.bf16.msra.mxu0 %v2247_v16  ;;  %2098 = vmatprep.mubr.msk.bf16.mxu0 %vm2360_vm0, %v2359_v0 }
  0x3c   : > { %2096 = vmatprep.subr.bf16.mxu0 %v2359_v0  ;;  %2091 = vmatmul.mubr.msk.bf16.vlgmr.msra.gmra.mxu1 %vm473_vm1, %v2518_v9 }
  0x3d   : > { %2104 = vmatprep.mubr.msk.bf16.mxu1 %vm2360_vm0, %v2359_v0 }
  0x3f   : > { %2097 = vmatpush3.bf16.msra.mxu0 %v2248_v17 }
  0x40   : > { %2108 = vmatprep.subr.bf16.mxu0 %v2359_v0 }
  0x42   : > { %2099 = vmatmul.mubr.msk.bf16.vlgmr.msra.gmra.mxu0 %vm473_vm1, %v2581_v18 }
  0x43   : > { %2110 = vmatprep.mubr.msk.bf16.mxu0 %vm2360_vm0, %v2359_v0 }
  0x95   : > { %v459_v23 = vpop.permute.xlu0 %458  ;;  %v595_v37 = vpop.permute.xlu1 %594 }
  0xe2   : > { %v580_v24 = vpop.f32.mrf.mxu1  ;;  %v511_v25 = vpop.f32.mrf.mxu0 }
  0xe3   : > { %v581_v26 = vadd.f32 %v1881_v22, %v580_v24  ;;  %v512_v27 = vadd.f32 %v511_v25, %v459_v23 }
  0xe4   : > { %v2044_v28 = vpop.f32.mrf.mxu1  ;;  %v2036_v29 = vpop.f32.mrf.mxu0 }
  0xe5   : > { %v586_v30 = vpack.c.bf16 %v581_v26, %v581_v26  ;;  %v517_v31 = vpack.c.bf16 %v512_v27, %v512_v27 }
  0xe6   : > { %v583_v32 = vpop.f32.mrf.mxu1  ;;  %v514_v33 = vpop.f32.mrf.mxu0 }
  0xe7   : > { %587 = vst.msk [vmem:[#allocation3] sm:$0xf] %vm518_vm2, %v586_v30  ;;  %519 = vst.msk [vmem:[#allocation2] sm:$0xf] %vm518_vm2, %v517_v31  ;;  %v1898_v31 = vld [vmem:[%s2811_s6 + $0x10] sm:$0xff] }
  0xe8   : > { %v2045_v34 = vpop.f32.mrf.mxu1  ;;  %v2037_v36 = vpop.f32.mrf.mxu0 }
  0xea   : > { %v702_v38 = vpop.f32.mrf.mxu1  ;;  %v634_v39 = vpop.f32.mrf.mxu0 }
  0xeb   : > { %v703_v40 = vadd.f32 %v1893_v35, %v702_v38  ;;  %v635_v41 = vadd.f32 %v634_v39, %v595_v37 }
  0xec   : > { %v2060_v42 = vpop.f32.mrf.mxu1  ;;  %v2052_v43 = vpop.f32.mrf.mxu0 }
  0xed   : > { %v708_v44 = vpack.c.bf16 %v703_v40, %v703_v40  ;;  %v640_v45 = vpack.c.bf16 %v635_v41, %v635_v41  ;;  %v1932_v42 = vld [vmem:[%s2809_s4 + $0x1] ss:$0 sm:$0xff] }
  0xee   : > { %v705_v46 = vpop.f32.mrf.mxu1  ;;  %v1086_v47 = vld [vmem:[#allocation3] sm:$0xf]  ;;  %v637_v48 = vpop.f32.mrf.mxu0  ;;  %v1027_v49 = vld [vmem:[#allocation2] sm:$0xf] }
  0xef   : > { %710 = vst.msk [vmem:[#allocation3 + $0x4] sm:$0xf] %vm518_vm2, %v708_v44  ;;  %v1091_v50 = vsel %vm1032_vm3, %v1086_v47, 0  ;;  %642 = vst.msk [vmem:[#allocation2 + $0x4] sm:$0xf] %vm518_vm2, %v640_v45  ;;  %v1034_v51 = vsel %vm1032_vm3, %v1027_v49, 0 }
  0xf0   : > { %v2061_v52 = vpop.f32.mrf.mxu1  ;;  %2109 = vmatpush3.bf16.msra.mxu0 %v1091_v50  ;;  %v2053_v53 = vpop.f32.mrf.mxu0  ;;  %2103 = vmatpush3.bf16.msra.mxu1 %v1034_v51  ;;  %v2259_v50 = vld [vmem:[%s2808_s3 + $0x28] sm:$0xff]   ;;  %v2260_v51 = vld [vmem:[%s2808_s3 + $0x20] sm:$0xff]  }
  0xf1   : > { %2122 = vmatprep.subr.bf16.mxu0 %v2359_v0  ;;  %2114 = vmatprep.subr.bf16.mxu1 %v2359_v0 }
  0xf2   : > { %v2622_v54 = vpop.f32.mrf.mxu0  ;;  %v825_v12 = vpop.f32.mrf.mxu1 }
  0xf3   : > { %v826_v13 = vadd.f32 %v1905_v11, %v825_v12 }
  0xf4   : > { %v2068_v55 = vpop.f32.mrf.mxu0  ;;  %v2076_v14 = vpop.f32.mrf.mxu1 }
  0xf5   : > { %v831_v15 = vpack.c.bf16 %v826_v13, %v826_v13 }
  0xf6   : > { %v760_v56 = vpop.f32.mrf.mxu0  ;;  %v1264_v9 = vld [vmem:[#allocation3 + $0x4] sm:$0xf]  ;;  %v828_v16 = vpop.f32.mrf.mxu1  ;;  %v1206_v45 = vld [vmem:[#allocation2 + $0x4] sm:$0xf] }
  0xf7   : > { %v1269_v10 = vsel %vm1032_vm3, %v1264_v9, 0  ;;  %833 = vst.msk [vmem:[#allocation3 + $0x8] sm:$0xf] %vm518_vm2, %v831_v15  ;;  %v1211_v48 = vsel %vm1032_vm3, %v1206_v45, 0  ;;  %v2261_v16 = vld [vmem:[%s2808_s3 + $0x38] sm:$0xff]  }
  0xf8   : > { %v2069_v57 = vpop.f32.mrf.mxu0  ;;  %v2077_v17 = vpop.f32.mrf.mxu1 }
  0xf9   : > { %v2262_v17 = vld [vmem:[%s2808_s3 + $0x30] sm:$0xff]  }
  0xfa   : > { %v2624_v58 = vpop.f32.mrf.mxu0 }
  0xfc   : > { %v2084_v59 = vpop.f32.mrf.mxu0  ;;  %v948_v20 = vpop.f32.mrf.mxu1 }
  0xfd   : > { %v949_v21 = vadd.f32 %v1917_v19, %v948_v20 }
  0xfe   : > { %v883_v60 = vpop.f32.mrf.mxu0  ;;  %v2092_v22 = vpop.f32.mrf.mxu1  ;;  %v1448_v52 = vld [vmem:[#allocation3 + $0x8] sm:$0xf] }
  0xff   : > { %v954_v23 = vpack.c.bf16 %v949_v21, %v949_v21  ;;  %v1453_v53 = vsel %vm1032_vm3, %v1448_v52, 0 }
 0x100   : > { %v2085_v61 = vpop.f32.mrf.mxu0  ;;  %v951_v24 = vpop.f32.mrf.mxu1 }
 0x101   : > { %956 = vst.msk [vmem:[#allocation3 + $0xc] sm:$0xf] %vm518_vm2, %v954_v23 }
 0x102   : > { %v1019_v63 = vpop.f32.mrf.mxu0  ;;  %v2093_v25 = vpop.f32.mrf.mxu1 }
 0x103   : > { %v1020_v1 = vadd.f32 %v1921_v62, %v1019_v63 }
 0x104   : > { %v2100_v2 = vpop.f32.mrf.mxu0 }
 0x105   : > { %v1025_v3 = vmul.f32 0.35355338, %v1020_v1 }
 0x106   : > { %v1022_v4 = vpop.f32.mrf.mxu0 }
 0x107   : > { %v1026_v6 = vpack.c.bf16 %v1025_v3, %v1025_v3 }
 0x108   : > { %v2101_v7 = vpop.f32.mrf.mxu0  ;;  %v1632_v19 = vld [vmem:[#allocation3 + $0xc] sm:$0xf] }
 0x109   : > { %2105 = vmatmul.mubr.msk.bf16.vlgmr.msra.gmra.mxu1 %vm1028_vm4, %v1026_v6  ;;  %v1637_v20 = vsel %vm1032_vm3, %v1632_v19, 0 }
 0x10a   : > { %2115 = vmatpush3.bf16.msra.mxu1 %v2257_v5  ;;  %2118 = vmatprep.mubr.msk.bf16.mxu1 %vm2360_vm0, %v2359_v0 }
 0x10b   : > { %2116 = vmatprep.subr.bf16.mxu1 %v2359_v0 }
 0x10e   : > { %2117 = vmatpush3.bf16.msra.mxu1 %v2258_v8  ;;  %v1944_v8 = vld [vmem:[%s2809_s4 + $0x2] ss:$0 sm:$0xff] }
 0x10f   : > { %2128 = vmatprep.subr.bf16.mxu1 %v2359_v0 }
 0x111   : > { %2119 = vmatmul.mubr.msk.bf16.vlgmr.msra.gmra.mxu1 %vm473_vm1, %v2581_v18 }
 0x112   : > { %2129 = vmatpush3.bf16.msra.mxu1 %v1269_v10  ;;  %2130 = vmatprep.mubr.msk.bf16.mxu1 %vm2360_vm0, %v2359_v0 }
 0x113   : > { %2142 = vmatprep.subr.bf16.mxu1 %v2359_v0 }
 0x1c9   : > { %v1070_v26 = vpop.f32.mrf.mxu1 }
 0x1ca   : > { %v1076_v27 = vsel %vm1028_vm4, %v1070_v26, -inf }
 0x1cb   : > { %1077 = vmax.xlane.f32.xlu0 %v1076_v27  ;;  %v2106_v28 = vpop.f32.mrf.mxu1 }
 0x1cd   : > { %v1073_v29 = vpop.f32.mrf.mxu1 }
 0x1cf   : > { %v2107_v30 = vpop.f32.mrf.mxu1 }
 0x1d1   : > { %v1197_v32 = vpop.f32.mrf.mxu1 }
 0x1d2   : > { %v1198_v43 = vadd.f32 %v1932_v42, %v1197_v32 }
 0x1d3   : > { %v2120_v33 = vpop.f32.mrf.mxu1 }
 0x1d4   : > { %v1203_v47 = vmul.f32 0.35355338, %v1198_v43 }
 0x1d5   : > { %v1200_v34 = vpop.f32.mrf.mxu1 }
 0x1d6   : > { %v1204_v49 = vpack.c.bf16 %v1203_v47, %v1203_v47 }
 0x1d7   : > { %v2121_v35 = vpop.f32.mrf.mxu1 }
 0x1e1   : > { %717 = vperm.xlu0 %2243, %v1898_v31  }
 0x254   : > { %v1078_v36 = vpop.xlane.xlu0 %1077 }
 0x255   : > { %v1079_v37 = vsub.f32 %v1070_v26, %v1078_v36 }
 0x257   : > { %v1080_v38 = vmul.f32 1.442695, %v1079_v37 }
 0x259   : > { %2265 = vpow2.f32 %v1080_v38 }
 0x25c   : > { %v718_v39 = vpop.permute.xlu0 %717 }
 0x25d   : > { %v758_v40 = vadd.f32 %v2622_v54, %v718_v39 }
 0x25f   : > { %v763_v41 = vpack.c.bf16 %v758_v40, %v758_v40 }
 0x261   : > { %765 = vst.msk [vmem:[#allocation2 + $0x8] sm:$0xf] %vm518_vm2, %v763_v41  ;;  %v1956_v41 = vld [vmem:[%s2809_s4 + $0x3] ss:$0 sm:$0xff] }
 0x266   : > { %v2663_v44 = vpop.eup %2265 }
 0x267   : > { %v1085_v46 = vpack.c.bf16 %v2663_v44, %v2663_v44 }
 0x268   : > { %v1390_v11 = vld [vmem:[#allocation2 + $0x8] sm:$0xf] }
 0x269   : > { %2111 = vmatmul.mubr.msk.bf16.vlgmr.msra.gmra.mxu0 %vm1028_vm4, %v1085_v46  ;;  %v1395_v14 = vsel %vm1032_vm3, %v1390_v11, 0 }
 0x26a   : > { %2123 = vmatpush3.bf16.msra.mxu0 %v1211_v48  ;;  %2124 = vmatprep.mubr.msk.bf16.mxu0 %vm2360_vm0, %v2359_v0 }
 0x26b   : > { %2134 = vmatprep.subr.bf16.mxu0 %v2359_v0 }
 0x271   : > { %2125 = vmatmul.mubr.msk.bf16.vlgmr.msra.gmra.mxu0 %vm1028_vm4, %v1204_v49 }
 0x272   : > { %2135 = vmatpush3.bf16.msra.mxu0 %v2259_v50  ;;  %2138 = vmatprep.mubr.msk.bf16.mxu0 %vm2360_vm0, %v2359_v0 }
 0x273   : > { %2136 = vmatprep.subr.bf16.mxu0 %v2359_v0 }
 0x276   : > { %2137 = vmatpush3.bf16.msra.mxu0 %v2260_v51 }
 0x277   : > { %2148 = vmatprep.subr.bf16.mxu0 %v2359_v0 }
 0x279   : > { %2139 = vmatmul.mubr.msk.bf16.vlgmr.msra.gmra.mxu0 %vm473_vm1, %v2581_v18 }
 0x27a   : > { %2149 = vmatpush3.bf16.msra.mxu0 %v1453_v53  ;;  %2150 = vmatprep.mubr.msk.bf16.mxu0 %vm2360_vm0, %v2359_v0 }
 0x27b   : > { %2162 = vmatprep.subr.bf16.mxu0 %v2359_v0 }
 0x329   : > { %v2689_v54 = vpop.f32.mrf.mxu0 }
 0x32b   : > { %v2112_v55 = vpop.f32.mrf.mxu0 }
 0x32d   : > { %v1130_v56 = vpop.f32.mrf.mxu0 }
 0x32f   : > { %v2113_v57 = vpop.f32.mrf.mxu0 }
 0x331   : > { %v1247_v59 = vpop.f32.mrf.mxu0 }
 0x332   : > { %v1253_v60 = vsel %vm1028_vm4, %v1247_v59, -inf }
 0x333   : > { %1254 = vmax.xlane.f32.xlu1 %v1253_v60  ;;  %v2126_v61 = vpop.f32.mrf.mxu0 }
 0x335   : > { %v1250_v62 = vpop.f32.mrf.mxu0 }
 0x337   : > { %v2127_v63 = vpop.f32.mrf.mxu0 }
 0x339   : > { %v1381_v1 = vpop.f32.mrf.mxu0 }
 0x33a   : > { %v1382_v9 = vadd.f32 %v1944_v8, %v1381_v1 }
 0x33b   : > { %v2140_v2 = vpop.f32.mrf.mxu0 }
 0x33c   : > { %v1387_v13 = vmul.f32 0.35355338, %v1382_v9  ;;  %v1082_v9 = vsel %vm1028_vm4, %v2663_v44, 0.0 }
 0x33d   : > { %v1384_v3 = vpop.f32.mrf.mxu0 }
 0x33e   : > { %v1388_v15 = vpack.c.bf16 %v1387_v13, %v1387_v13 }
 0x33f   : > { %v2141_v4 = vpop.f32.mrf.mxu0 }
 0x3bc   : > { %v1255_v5 = vpop.xlane.xlu1 %1254 }
 0x3bd   : > { %v1256_v6 = vsub.f32 %v1247_v59, %v1255_v5 }
 0x3bf   : > { %v1257_v7 = vmul.f32 1.442695, %v1256_v6 }
 0x3c1   : > { %2267 = vpow2.f32 %v1257_v7 }
 0x3ce   : > { %v2268_v10 = vpop.eup %2267 }
 0x3cf   : > { %v1262_v12 = vpack.c.bf16 %v2268_v10, %v2268_v10  ;;  %v1259_v34 = vsel %vm1028_vm4, %v2268_v10, 0.0 }
 0x3d1   : > { %2131 = vmatmul.mubr.msk.bf16.vlgmr.msra.gmra.mxu1 %vm1028_vm4, %v1262_v12 }
 0x3d2   : > { %2143 = vmatpush3.bf16.msra.mxu1 %v1395_v14  ;;  %2144 = vmatprep.mubr.msk.bf16.mxu1 %vm2360_vm0, %v2359_v0 }
 0x3d3   : > { %2154 = vmatprep.subr.bf16.mxu1 %v2359_v0 }
 0x3d9   : > { %2145 = vmatmul.mubr.msk.bf16.vlgmr.msra.gmra.mxu1 %vm1028_vm4, %v1388_v15 }
 0x3da   : > { %2155 = vmatpush3.bf16.msra.mxu1 %v2261_v16  ;;  %2158 = vmatprep.mubr.msk.bf16.mxu1 %vm2360_vm0, %v2359_v0 }
 0x3db   : > { %2156 = vmatprep.subr.bf16.mxu1 %v2359_v0 }
 0x3de   : > { %2157 = vmatpush3.bf16.msra.mxu1 %v2262_v17 }
 0x3df   : > { %2168 = vmatprep.subr.bf16.mxu1 %v2359_v0 }
 0x3e1   : > { %2159 = vmatmul.mubr.msk.bf16.vlgmr.msra.gmra.mxu1 %vm473_vm1, %v2581_v18  ;;  %v1910_v18 = vld [vmem:[%s2811_s6 + $0x18] sm:$0xff] }
 0x3e2   : > { %2169 = vmatpush3.bf16.msra.mxu1 %v1637_v20  ;;  %2170 = vmatprep.mubr.msk.bf16.mxu1 %vm2360_vm0, %v2359_v0  ;;  %v2263_v20 = vld [vmem:[%s2814_s9 + $0x8] sm:$0xff]  }
 0x491   : > { %v1305_v21 = vpop.f32.mrf.mxu1 }
 0x493   : > { %v2132_v22 = vpop.f32.mrf.mxu1 }
 0x495   : > { %v1308_v23 = vpop.f32.mrf.mxu1 }
 0x497   : > { %v2133_v24 = vpop.f32.mrf.mxu1 }
 0x499   : > { %v1431_v25 = vpop.f32.mrf.mxu1 }
 0x49a   : > { %v1437_v26 = vsel %vm1028_vm4, %v1431_v25, -inf }
 0x49b   : > { %1438 = vmax.xlane.f32.xlu1 %v1437_v26  ;;  %v2146_v27 = vpop.f32.mrf.mxu1 }
 0x49d   : > { %v1434_v28 = vpop.f32.mrf.mxu1 }
 0x49f   : > { %v2147_v29 = vpop.f32.mrf.mxu1 }
 0x4a1   : > { %v1565_v30 = vpop.f32.mrf.mxu1 }
 0x4a2   : > { %v1566_v42 = vadd.f32 %v1956_v41, %v1565_v30 }
 0x4a3   : > { %v2160_v31 = vpop.f32.mrf.mxu1 }
 0x4a4   : > { %v1571_v47 = vmul.f32 0.35355338, %v1566_v42 }
 0x4a5   : > { %v1568_v32 = vpop.f32.mrf.mxu1 }
 0x4a7   : > { %v2161_v33 = vpop.f32.mrf.mxu1 }
 0x4ac   : > { %840 = vperm.xlu1 %2244, %v1910_v18  }
 0x4d0   : > { %1260 = vadd.xlane.f32.xlu1 %v1259_v34 }
 0x524   : > { %v1439_v35 = vpop.xlane.xlu1 %1438 }
 0x525   : > { %v1440_v36 = vsub.f32 %v1431_v25, %v1439_v35 }
 0x527   : > { %v1441_v37 = vmul.f32 1.442695, %v1440_v36 }
 0x528   : > { %v841_v38 = vpop.permute.xlu1 %840 }
 0x529   : > { %2269 = vpow2.f32 %v1441_v37  ;;  %v881_v39 = vadd.f32 %v2624_v58, %v841_v38  ;;  %v1572_v58 = vpack.c.bf16 %v1571_v47, %v1571_v47 }
 0x52b   : > { %v886_v40 = vpack.c.bf16 %v881_v39, %v881_v39 }
 0x52d   : > { %888 = vst.msk [vmem:[#allocation2 + $0xc] sm:$0xf] %vm518_vm2, %v886_v40 }
 0x534   : > { %v1574_v45 = vld [vmem:[#allocation2 + $0xc] sm:$0xf] }
 0x535   : > { %v1579_v48 = vsel %vm1032_vm3, %v1574_v45, 0 }
 0x536   : > { %v2270_v43 = vpop.eup %2269 }
 0x537   : > { %v1446_v46 = vpack.c.bf16 %v2270_v43, %v2270_v43  ;;  %v1443_v63 = vsel %vm1028_vm4, %v2270_v43, 0.0 }
 0x539   : > { %2151 = vmatmul.mubr.msk.bf16.vlgmr.msra.gmra.mxu0 %vm1028_vm4, %v1446_v46 }
 0x53a   : > { %2163 = vmatpush3.bf16.msra.mxu0 %v1579_v48  ;;  %2164 = vmatprep.mubr.msk.bf16.mxu0 %vm2360_vm0, %v2359_v0 }
 0x53b   : > { %2174 = vmatprep.subr.bf16.mxu0 %v2359_v0 }
 0x541   : > { %2165 = vmatmul.mubr.msk.bf16.vlgmr.msra.gmra.mxu0 %vm1028_vm4, %v1572_v58 }
 0x542   : > { %2178 = vmatprep.mubr.msk.bf16.mxu0 %vm2360_vm0, %v2359_v0  ;;  %2175 = vmatpush3.bf16.msra.mxu0 %v2263_v20 }
 0x543   : > { %2176 = vmatprep.subr.bf16.mxu0 %v2359_v0  ;;  %v1963_v0 = vld [vmem:[%s2815_s10] ss:$0 sm:$0xff] }
 0x559   : > { %v1261_v49 = vpop.xlane.xlu1 %1260 }
 0x55a   : > { %2271 = vrcp.f32 %v1261_v49 }
 0x567   : > { %v2272_v50 = vpop.eup %2271 }
 0x568   : > { %v1312_v51 = vmul.f32 %v2272_v50, %v1305_v21  ;;  %v2264_v21 = vld [vmem:[%s2814_s9] sm:$0xff]  }
 0x569   : > { %2177 = vmatpush3.bf16.msra.mxu0 %v2264_v21 }
 0x56a   : > { %v1972_v52 = vpack.c.bf16 %v1312_v51, %v1312_v51 }
 0x56c   : > { %1317 = vrot.lane.b32.xlu1 %v1972_v52, %s2362_s16  ;;  %s1773_s16 = sshll.u32 %s427_s15, 4  ;;  %s2760_s16 = int_to_ptr.vmem [resolvable:$true] %s1773_s16 }
 0x56d   : > { %s2281_s20 = scalar_lea.vmem %s2760_s16, 128 }
 0x56e   : > { %p2282_p12 = scmp.ne.s32.totalorder %s2760_s16, %s2281_s20 }
 0x570   : > { %p2283_p13 = pnand %p2282_p12, %p2466_p4 }
 0x572   : > { %p2284_p0 = pneg %p2283_p13 }
 0x5de   : > { %v1318_v19 = vpop.permute.xlu1 %1317 }
 0x5f9   : > { %v1489_v53 = vpop.f32.mrf.mxu0 }
 0x5fb   : > { %v2152_v55 = vpop.f32.mrf.mxu0 }
 0x5fd   : > { %v1492_v56 = vpop.f32.mrf.mxu0 }
 0x5ff   : > { %v2153_v57 = vpop.f32.mrf.mxu0 }
 0x601   : > { %v1615_v59 = vpop.f32.mrf.mxu0 }
 0x602   : > { %v1621_v60 = vsel %vm1028_vm4, %v1615_v59, -inf }
 0x603   : > { %1622 = vmax.xlane.f32.xlu0 %v1621_v60  ;;  %v2166_v61 = vpop.f32.mrf.mxu0 }
 0x605   : > { %v1618_v62 = vpop.f32.mrf.mxu0 }
 0x607   : > { %1444 = vadd.xlane.f32.xlu0 %v1443_v63  ;;  %v2167_v1 = vpop.f32.mrf.mxu0 }
 0x68c   : > { %v1623_v2 = vpop.xlane.xlu0 %1622 }
 0x68d   : > { %v1624_v3 = vsub.f32 %v1615_v59, %v1623_v2 }
 0x68f   : > { %v1625_v4 = vmul.f32 1.442695, %v1624_v3 }
 0x690   : > { %v1445_v8 = vpop.xlane.xlu0 %1444 }
 0x691   : > { %2273 = vpow2.f32 %v1625_v4 }
 0x692   : > { %2275 = vrcp.f32 %v1445_v8 }
 0x69e   : > { %v2274_v5 = vpop.eup %2273 }
 0x69f   : > { %v1627_v6 = vsel %vm1028_vm4, %v2274_v5, 0.0  ;;  %v1630_v7 = vpack.c.bf16 %v2274_v5, %v2274_v5  ;;  %v2276_v10 = vpop.eup %2275 }
 0x6a0   : > { %1628 = vadd.xlane.f32.xlu0 %v1627_v6  ;;  %v1496_v11 = vmul.f32 %v2276_v10, %v1489_v53 }
 0x6a1   : > { %2171 = vmatmul.mubr.msk.bf16.vlgmr.msra.gmra.mxu1 %vm1028_vm4, %v1630_v7 }
 0x6a2   : > { %v1973_v12 = vpack.c.bf16 %v1496_v11, %v1496_v11 }
 0x6a4   : > { %1083 = vadd.xlane.f32.xlu0 %v1082_v9 }
 0x6ba   : > { %1501 = vrot.lane.b32.xlu0 %v1973_v12, %s2363_s13 }
 0x729   : > { %v1629_v13 = vpop.xlane.xlu0 %1628 }
 0x72d   : > { %v1084_v14 = vpop.xlane.xlu0 %1083 }
 0x72e   : > { %2277 = vrcp.f32 %v1084_v14 }
 0x72f   : > { %2279 = vrcp.f32 %v1629_v13 }
 0x731   : > { %v1502_v44 = vpop.permute.xlu0 %1501 }
 0x73b   : > { %v2278_v15 = vpop.eup %2277 }
 0x73c   : > { %v1134_v16 = vmul.f32 %v2278_v15, %v2689_v54  ;;  %v2280_v54 = vpop.eup %2279 }
 0x73e   : > { %v1135_v17 = vpack.c.bf16 %v1134_v16, %v1134_v16 }
 0x740   : > { %1137 = vst.msk [vmem:[#allocation4] sm:$0xf] %vm518_vm2, %v1135_v17 }
 0x741   : > { %1321 = vst.msk [vmem:[#allocation4] sm:$0xf] %vm1320_vm5, %v1318_v19 }
 0x742   : > { %1505 = vst.msk [vmem:[#allocation4] sm:$0xf] %vm1504_vm6, %v1502_v44 }
 0x761   : > { %v1673_v22 = vpop.f32.mrf.mxu1 }
 0x762   : > { %v1680_v23 = vmul.f32 %v2280_v54, %v1673_v22 }
 0x763   : > { %v2172_v24 = vpop.f32.mrf.mxu1 }
 0x764   : > { %v1974_v25 = vpack.c.bf16 %v1680_v23, %v1680_v23 }
 0x765   : > { %v1676_v26 = vpop.f32.mrf.mxu1 }
 0x766   : > { %1685 = vrot.lane.b32.xlu1 %v1974_v25, %s2364_s23  ;;  %s2285_s23 = sshll.u32 %s2365_s25, 4  ;;  %s2286_s23 = int_to_ptr.vmem [resolvable:$false] %s2285_s23 }
 0x767   : > { %v2173_v27 = vpop.f32.mrf.mxu1  ;;  %s2287_s26 = scalar_lea.vmem %s2286_s23, 256  ;;  %p2288_p1 = scmp.lt.s32.totalorder %s2760_s16, %s2286_s23 }
 0x768   : > { %p2289_p2 = scmp.lt.s32.totalorder %s2287_s26, %s2281_s20 }
 0x76a   : > { %p2290_p3 = por %p2289_p2, %p2288_p1 }
 0x76c   : > { %p2291_p5 = pnand %p2290_p3, %p2284_p0 }
 0x7d8   : > { %v1686_v28 = vpop.permute.xlu1 %1685 }
 0x7d9   : > { %1689 = vst.msk [vmem:[#allocation4] sm:$0xf] %vm1688_vm7, %v1686_v28 }
 0x7e0   : > { %v1690_v29 = vld [vmem:[#allocation4] sm:$0xf] }
 0x7e1   : > { %2179 = vmatmul.mubr.msk.bf16.vlgmr.msra.gmra.mxu0 %vm473_vm1, %v1690_v29 }
 0x8a1   : > { %v1751_v18 = vpop.f32.mrf.mxu0 }
 0x8a2   : > { %v1752_v30 = vadd.f32 %v1963_v0, %v1751_v18 }
 0x8a3   : > { %v2180_v31 = vpop.f32.mrf.mxu0 }
 0x8a4   : > { %1757 = vst.msk [vmem:[%s427_s15] sm:$0xff] %vm473_vm1, %v1752_v30 }
 0x8a5   : > { %v1754_v32 = vpop.f32.mrf.mxu0 }
 0x8a6   : > { %2294 = shalt.err (!%p2291_p5)
}
 0x8a7   : > { %s2295_s28 = scalar_lea.hbm %s2758_s12, 128  ;;  %s2299_s14 = scalar_lea.hbm %s2816_s11, 256 }
 0x8a8   : > { %p2296_p6 = scmp.ne.s32.totalorder %s2758_s12, %s2295_s28  ;;  %p2300_p10 = scmp.lt.s32.totalorder %s2758_s12, %s2816_s11 }
 0x8a9   : > { %p2301_p11 = scmp.lt.s32.totalorder %s2299_s14, %s2295_s28 }
 0x8aa   : > { %p2297_p7 = pnand %p2296_p6, %p2466_p4 }
 0x8ab   : > { %p2302_p12 = por %p2301_p11, %p2300_p10 }
 0x8ac   : > { %p2298_p9 = pneg %p2297_p7 }
 0x8ae   : > { %p2303_p13 = pnand %p2302_p12, %p2298_p9 }
 0x8b0   : > { %2306 = shalt.err (!%p2303_p13)
}
 0x8b1   : > { %2182 = dma.vmem_to_hbm [thread:$0]  (%p2466_p4), %s2760_s16, 128, %s2758_s12, %s1759_s30   ;;  %v2181_v33 = vpop.f32.mrf.mxu0 }
 0x8b2 PF: > { %p2188_p0 = scmp.ge.s32.totalorder %s2357_s22, 2  ;;  %s1785_s21 = sand.u32 1, %s2337_s17  }
 0x8b3   : > { %s1786_s20 = scalar_lea.sflag [#allocation6], %s1785_s21 }
 0x8b4   : > { %p2185_p1 = pnand %p2188_p0, %p2473_p8 }
 0x8b6   : > { %p2186_p2 = pneg %p2185_p1 }
 0x8b8   : > { %2332 = dma.done.wait (%p2186_p2), %s1786_s20, 128  }
 0x8b9   : > { %2334 = vsyncadd (%p2186_p2), %s1786_s20, 4294967168  ;;  %s24_s22 = sadd.s32 1, %s2357_s22   ;;  %s2826_s27 = sld [smem:[#allocation8_spill]] }
 0x8ba   : > { %p21_p3 = scmp.ge.s32.totalorder %s24_s22, 4   ;;  %s2827_s19 = sld [smem:[#allocation11_spill]] }
 0x8bb   : > { %s2828_s20 = sld [smem:[#allocation9_spill]]  ;;  %s2830_s17 = smov %s2341_s18 }
 0x8bc   : > { %s2829_s21 = sld [smem:[#allocation10_spill]]  ;;  %23 = sbr.rel (!%p21_p3) target bundleno = 4 (0x4), region = 139 }
 0x8bf   : > { %s2831_s18 = smov %s2826_s27 }
 0x8c1   :  { %1791 = vsyncpa [#allocation6], 1 }
 0x8c2   :  { %1793 = vsyncpa [#allocation6 + $0x1], 1 }

// kernel: tpu_custom_call.1
= control target key start
LH: loop header
LB: loop body
LE: loop exit
PB: predicated region body
PF: predicated region fallthrough
CT: control target
= control target key end

     0   :  { %16 = vsyncpa [#allocation6], 0  ;;  %s2805_s0 = inlined_call_operand.vmem [shape: bf16[2,8,32], index: 0, kind: input, shape index: {}]   ;;  %s2806_s1 = inlined_call_operand.vmem [shape: bf16[2,32,8], index: 1, kind: input, shape index: {}]   ;;  %s2807_s2 = inlined_call_operand.vmem [shape: bf16[2,8,32], index: 2, kind: input, shape index: {}]   ;;  %s2808_s3 = inlined_call_operand.vmem [shape: bf16[4,32,8], index: 3, kind: input, shape index: {}]   ;;  %s2809_s4 = inlined_call_operand.vmem [shape: f32[4,1,8], index: 4, kind: input, shape index: {}]   ;;  %s2810_s5 = inlined_call_operand.vmem [shape: bf16[4,8,32], index: 5, kind: input, shape index: {}]   ;;  %s2811_s6 = inlined_call_operand.vmem [shape: f32[4,8,1], index: 6, kind: input, shape index: {}]   ;;  %s2812_s7 = inlined_call_operand.vmem [shape: bf16[4,32,8], index: 7, kind: input, shape index: {}]   ;;  %s2813_s8 = inlined_call_operand.vmem [shape: f32[4,1,8], index: 8, kind: input, shape index: {}]   ;;  %s2814_s9 = inlined_call_operand.vmem [shape: bf16[32,32], index: 9, kind: input, shape index: {}]   ;;  %s2815_s10 = inlined_call_operand.vmem [shape: f32[1,32], index: 10, kind: input, shape index: {}]   ;;  %s2816_s11 = inlined_call_operand.hbm [shape: f32[2,8,32], index: 11, kind: output, shape index: {}]  }
   0x1   :  { %18 = vsyncpa [#allocation6 + $0x1], 0  ;;  %s2426_s17 = smov 0   ;;  %s2428_s18 = smov 0  }
   0x2   :  { %s2430_s19 = smov 0   ;;  %s2432_s20 = smov 0  }
   0x3   :  { %s2434_s21 = smov 0   ;;  %s2436_s22 = smov 0  }
   0x4 LB: > { %2820 = sst [smem:[#allocation8_spill]] %s2345_s19  ;;  %s1868_s23 = sadd.s32 4294967295, %s2357_s22   ;;  %s2357_s22 = sphi %s2436_s22, %s24_s22   ;;  %s2353_s21 = sphi %s2434_s21, %s2829_s21   ;;  %s2349_s20 = sphi %s2432_s20, %s2828_s20   ;;  %s2345_s19 = sphi %s2430_s19, %s2827_s19   ;;  %s2341_s18 = sphi %s2428_s18, %s2831_s18   ;;  %s2337_s17 = sphi %s2426_s17, %s2830_s17  }
   0x5   : > { %2821 = sst [smem:[#allocation9_spill]] %s2353_s21  ;;  %s1869_s24 = sadd.s32 4294967294, %s2357_s22  }
   0x6   : > { %s36_s25 = sadd.s32 1, %s2353_s21  ;;  %s293_s26 = sadd.s32 1, %s2345_s19 }
   0x7   : > { %p38_p0 = scmp.ge.s32.totalorder %s36_s25, 2  ;;  %p303_p1 = scmp.ne.s32.totalorder %s2345_s19, %s2341_s18 }
   0x8   : > { %p304_p2 = scmp.eq.s32.totalorder %s1868_s23, 1  ;;  %p309_p3 = scmp.ne.s32.totalorder %s2341_s18, %s2337_s17 }
   0x9   : > { %s2833_s25 = smov (%p38_p0, %s36_s25), 0  ;;  %p310_p5 = scmp.eq.s32.totalorder %s1869_s24, 1 }
   0xa   : > { %2822 = sst [smem:[#allocation10_spill]] %s2833_s25  ;;  %p2466_p4 = por %p304_p2, %p303_p1 }
   0xb   : > { %s288_s28 = ssub.s32 %s2353_s21, %s2833_s25  ;;  %p1872_p6 = scmp.ge.s32.totalorder %s2357_s22, 1 }
   0xc   : > { %p291_p7 = scmp.eq.s32.totalorder %s288_s28, 0  ;;  %p2473_p8 = por %p310_p5, %p309_p3 }
   0xd   : > { %p377_p9 = scmp.lt.s32.totalorder %s2357_s22, 3 }
   0xe   : > { %s2479_s30 = scalar_select %p291_p7, %s2345_s19, %s293_s26  }
   0xf   : > { %p378_p10 = pnand %p1872_p6, %p377_p9 }
  0x10   : > { %2825 = sst [smem:[#allocation11_spill]] %s2479_s30  ;;  %p428_p11 = scmp.lt.s32.totalorder (!%p378_p10), %s2349_s20, 1 }
  0x11   : > { %381 = sbr.rel (%p378_p10) target bundleno = 2226 (0x8b2), region = 64  ;;  %s2364_s23 = smov (!%p378_p10), 24  }
  0x12   : > { %s425_s24 = sand.u32 (!%p378_p10), 1, %s2341_s18   ;;  %s1968_s14 = sshll.u32 (!%p378_p10), %s2349_s20, 7 }
  0x13   : > { %s1873_s26 = sshll.u32 (!%p378_p10), %s425_s24, 3  ;;  %s2365_s25 = smov (!%p378_p10), [#allocation5]  }
  0x14   : > { %s427_s15 = scalar_lea.vmem (!%p378_p10), [#allocation5], %s1873_s26 }
  0x16   : > { %v2359_v0 = vmov 0.0   ;;  %vm2360_vm0 = vmmov 0   ;;  %s2486_s12 = scalar_select %p428_p11, %s2349_s20, 1  ;;  %v2361_v1 = vmov 0   ;;  %v455_v2 = vld [vmem:[%s2811_s6] sm:$0xff]  ;;  %v1886_v3 = vld [vmem:[%s2811_s6 + $0x8] sm:$0xff] }
  0x17   : > { %2030 = vmatprep.subr.bf16.mxu0 %v2359_v0  ;;  %2034 = vmatprep.mubr.msk.bf16.mxu0 %vm2360_vm0, %v2359_v0  ;;  %v2249_v4 = vld [vmem:[%s2812_s7 + $0x8] sm:$0xff]   ;;  %v2250_v7 = vld [vmem:[%s2812_s7] sm:$0xff]   ;;  %v2251_v10 = vld [vmem:[%s2812_s7 + $0x18] sm:$0xff]   ;;  %vm473_vm1 = vcmask 261120   ;;  %vm518_vm2 = vcmask 60416   ;;  %vm1032_vm3 = vcmask 1043456  }
  0x18   : > { %2038 = vmatprep.subr.bf16.mxu1 %v2359_v0  ;;  %2042 = vmatprep.mubr.msk.bf16.mxu1 %vm2360_vm0, %v2359_v0  ;;  %s1971_s13 = sshll.u32 %s2486_s12, 4  ;;  %s1874_s30 = sshll.u32 %s2486_s12, 2  ;;  %v454_v8 = vld [vmem:[%s2810_s5] sm:$0xf]  ;;  %v2252_v11 = vld [vmem:[%s2812_s7 + $0x10] sm:$0xff]   ;;  %v2253_v12 = vld [vmem:[%s2812_s7 + $0x28] sm:$0xff]  }
  0x19   : > { %2243 = vset.pattern.permute.xlu0 %v2361_v1  ;;  %2244 = vset.pattern.permute.xlu1 %v2361_v1  ;;  %s439_s28 = scalar_lea.vmem %s2806_s1, %s1971_s13  ;;  %s443_s19 = scalar_lea.vmem %s2807_s2, %s1874_s30  ;;  %v1885_v13 = vld [vmem:[%s2810_s5 + $0x4] sm:$0xf]  ;;  %v1897_v14 = vld [vmem:[%s2810_s5 + $0x8] sm:$0xf]  ;;  %v1909_v15 = vld [vmem:[%s2810_s5 + $0xc] sm:$0xf] }
  0x1a   : > { %458 = vperm.xlu0 %2243, %v455_v2   ;;  %594 = vperm.xlu1 %2244, %v1886_v3   ;;  %v2245_v5 = vld [vmem:[%s439_s28 + $0x8] sm:$0xff]   ;;  %v2246_v6 = vld [vmem:[%s439_s28] sm:$0xff]   ;;  %s434_s16 = scalar_lea.vmem %s2805_s0, %s1874_s30  ;;  %v2255_v20 = vld [vmem:[%s2812_s7 + $0x38] sm:$0xff]   ;;  %vm1028_vm4 = vcmask 64512   ;;  %s2363_s13 = smov 16   ;;  %vm1320_vm5 = vcmask 126016  }
  0x1b   : > { %2039 = vmatpush3.bf16.msra.mxu1 %v2249_v4  ;;  %2031 = vmatpush3.bf16.msra.mxu0 %v2245_v5  ;;  %v2518_v9 = vld [vmem:[%s443_s19] sm:$0xf]  ;;  %v2247_v16 = vld [vmem:[%s2808_s3 + $0x8] sm:$0xff]   ;;  %v2256_v21 = vld [vmem:[%s2812_s7 + $0x30] sm:$0xff]   ;;  %vm1504_vm6 = vcmask 191616   ;;  %vm1688_vm7 = vcmask 257216   ;;  %s2758_s12 = scalar_lea.hbm %s2816_s11, %s1968_s14 }
  0x1c   : > { %2040 = vmatprep.subr.bf16.mxu1 %v2359_v0  ;;  %2032 = vmatprep.subr.bf16.mxu0 %v2359_v0  ;;  %v2248_v17 = vld [vmem:[%s2808_s3] sm:$0xff]   ;;  %s1759_s30 = scalar_lea.sflag [#allocation6], %s425_s24 }
  0x1d   : > { %v2581_v18 = vld [vmem:[%s434_s16] sm:$0xf]  ;;  %s2362_s16 = smov 8  }
  0x1e   : > { %v2254_v19 = vld [vmem:[%s2812_s7 + $0x20] sm:$0xff]  }
  0x1f   : > { %2041 = vmatpush3.bf16.msra.mxu1 %v2250_v7  ;;  %2033 = vmatpush3.bf16.msra.mxu0 %v2246_v6  ;;  %v1881_v22 = vld [vmem:[%s2813_s8] ss:$0 sm:$0xff]  ;;  %v1893_v35 = vld [vmem:[%s2813_s8 + $0x1] ss:$0 sm:$0xff] }
  0x20   : > { %2054 = vmatprep.subr.bf16.mxu1 %v2359_v0  ;;  %2046 = vmatprep.subr.bf16.mxu0 %v2359_v0  ;;  %v1921_v62 = vld [vmem:[%s2809_s4] ss:$0 sm:$0xff] }
  0x22   : > { %2043 = vmatmul.mubr.msk.bf16.vlgmr.msra.gmra.mxu1 %vm473_vm1, %v2518_v9  ;;  %2035 = vmatmul.mubr.msk.bf16.vlgmr.msra.gmra.mxu0 %vm473_vm1, %v454_v8  ;;  %v2258_v8 = vld [vmem:[%s2808_s3 + $0x10] sm:$0xff]  }
  0x23   : > { %2055 = vmatpush3.bf16.msra.mxu1 %v2251_v10  ;;  %2047 = vmatpush3.bf16.msra.mxu0 %v2245_v5 }
  0x24   : > { %2050 = vmatprep.mubr.msk.bf16.mxu0 %vm2360_vm0, %v2359_v0  ;;  %2048 = vmatprep.subr.bf16.mxu0 %v2359_v0 }
  0x25   : > { %2056 = vmatprep.subr.bf16.mxu1 %v2359_v0  ;;  %2058 = vmatprep.mubr.msk.bf16.mxu1 %vm2360_vm0, %v2359_v0 }
  0x27   : > { %2057 = vmatpush3.bf16.msra.mxu1 %v2252_v11  ;;  %2049 = vmatpush3.bf16.msra.mxu0 %v2246_v6  ;;  %v1905_v11 = vld [vmem:[%s2813_s8 + $0x2] ss:$0 sm:$0xff] }
  0x28   : > { %2070 = vmatprep.subr.bf16.mxu1 %v2359_v0  ;;  %2062 = vmatprep.subr.bf16.mxu0 %v2359_v0 }
  0x2a   : > { %2059 = vmatmul.mubr.msk.bf16.vlgmr.msra.gmra.mxu1 %vm473_vm1, %v2518_v9  ;;  %2051 = vmatmul.mubr.msk.bf16.vlgmr.msra.gmra.mxu0 %vm473_vm1, %v1885_v13 }
  0x2b   : > { %2071 = vmatpush3.bf16.msra.mxu1 %v2253_v12  ;;  %2063 = vmatpush3.bf16.msra.mxu0 %v2245_v5 }
  0x2c   : > { %2066 = vmatprep.mubr.msk.bf16.mxu0 %vm2360_vm0, %v2359_v0  ;;  %2064 = vmatprep.subr.bf16.mxu0 %v2359_v0 }
  0x2d   : > { %2072 = vmatprep.subr.bf16.mxu1 %v2359_v0  ;;  %2074 = vmatprep.mubr.msk.bf16.mxu1 %vm2360_vm0, %v2359_v0 }
  0x2f   : > { %2065 = vmatpush3.bf16.msra.mxu0 %v2246_v6  ;;  %2073 = vmatpush3.bf16.msra.mxu1 %v2254_v19  ;;  %v1917_v19 = vld [vmem:[%s2813_s8 + $0x3] ss:$0 sm:$0xff] }
  0x30   : > { %2078 = vmatprep.subr.bf16.mxu0 %v2359_v0  ;;  %2086 = vmatprep.subr.bf16.mxu1 %v2359_v0 }
  0x32   : > { %2067 = vmatmul.mubr.msk.bf16.vlgmr.msra.gmra.mxu0 %vm473_vm1, %v1897_v14  ;;  %2075 = vmatmul.mubr.msk.bf16.vlgmr.msra.gmra.mxu1 %vm473_vm1, %v2518_v9 }
  0x33   : > { %2079 = vmatpush3.bf16.msra.mxu0 %v2245_v5  ;;  %2082 = vmatprep.mubr.msk.bf16.mxu0 %vm2360_vm0, %v2359_v0  ;;  %v2257_v5 = vld [vmem:[%s2808_s3 + $0x18] sm:$0xff]  }
  0x34   : > { %2080 = vmatprep.subr.bf16.mxu0 %v2359_v0  ;;  %2087 = vmatpush3.bf16.msra.mxu1 %v2255_v20 }
  0x35   : > { %2090 = vmatprep.mubr.msk.bf16.mxu1 %vm2360_vm0, %v2359_v0  ;;  %2088 = vmatprep.subr.bf16.mxu1 %v2359_v0 }
  0x37   : > { %2081 = vmatpush3.bf16.msra.mxu0 %v2246_v6 }
  0x38   : > { %2094 = vmatprep.subr.bf16.mxu0 %v2359_v0  ;;  %2089 = vmatpush3.bf16.msra.mxu1 %v2256_v21 }
  0x39   : > { %2102 = vmatprep.subr.bf16.mxu1 %v2359_v0 }
  0x3a   : > { %2083 = vmatmul.mubr.msk.bf16.vlgmr.msra.gmra.mxu0 %vm473_vm1, %v1909_v15 }
  0x3b   : > { %2095 = vmatpush3.bf16.msra.mxu0 %v2247_v16  ;;  %2098 = vmatprep.mubr.msk.bf16.mxu0 %vm2360_vm0, %v2359_v0 }
  0x3c   : > { %2096 = vmatprep.subr.bf16.mxu0 %v2359_v0  ;;  %2091 = vmatmul.mubr.msk.bf16.vlgmr.msra.gmra.mxu1 %vm473_vm1, %v2518_v9 }
  0x3d   : > { %2104 = vmatprep.mubr.msk.bf16.mxu1 %vm2360_vm0, %v2359_v0 }
  0x3f   : > { %2097 = vmatpush3.bf16.msra.mxu0 %v2248_v17 }
  0x40   : > { %2108 = vmatprep.subr.bf16.mxu0 %v2359_v0 }
  0x42   : > { %2099 = vmatmul.mubr.msk.bf16.vlgmr.msra.gmra.mxu0 %vm473_vm1, %v2581_v18 }
  0x43   : > { %2110 = vmatprep.mubr.msk.bf16.mxu0 %vm2360_vm0, %v2359_v0 }
  0x95   : > { %v459_v23 = vpop.permute.xlu0 %458  ;;  %v595_v37 = vpop.permute.xlu1 %594 }
  0xe2   : > { %v580_v24 = vpop.f32.mrf.mxu1  ;;  %v511_v25 = vpop.f32.mrf.mxu0 }
  0xe3   : > { %v581_v26 = vadd.f32 %v1881_v22, %v580_v24  ;;  %v512_v27 = vadd.f32 %v511_v25, %v459_v23 }
  0xe4   : > { %v2044_v28 = vpop.f32.mrf.mxu1  ;;  %v2036_v29 = vpop.f32.mrf.mxu0 }
  0xe5   : > { %v586_v30 = vpack.c.bf16 %v581_v26, %v581_v26  ;;  %v517_v31 = vpack.c.bf16 %v512_v27, %v512_v27 }
  0xe6   : > { %v583_v32 = vpop.f32.mrf.mxu1  ;;  %v514_v33 = vpop.f32.mrf.mxu0 }
  0xe7   : > { %587 = vst.msk [vmem:[#allocation3] sm:$0xf] %vm518_vm2, %v586_v30  ;;  %519 = vst.msk [vmem:[#allocation2] sm:$0xf] %vm518_vm2, %v517_v31  ;;  %v1898_v31 = vld [vmem:[%s2811_s6 + $0x10] sm:$0xff] }
  0xe8   : > { %v2045_v34 = vpop.f32.mrf.mxu1  ;;  %v2037_v36 = vpop.f32.mrf.mxu0 }
  0xea   : > { %v702_v38 = vpop.f32.mrf.mxu1  ;;  %v634_v39 = vpop.f32.mrf.mxu0 }
  0xeb   : > { %v703_v40 = vadd.f32 %v1893_v35, %v702_v38  ;;  %v635_v41 = vadd.f32 %v634_v39, %v595_v37 }
  0xec   : > { %v2060_v42 = vpop.f32.mrf.mxu1  ;;  %v2052_v43 = vpop.f32.mrf.mxu0 }
  0xed   : > { %v708_v44 = vpack.c.bf16 %v703_v40, %v703_v40  ;;  %v640_v45 = vpack.c.bf16 %v635_v41, %v635_v41  ;;  %v1932_v42 = vld [vmem:[%s2809_s4 + $0x1] ss:$0 sm:$0xff] }
  0xee   : > { %v705_v46 = vpop.f32.mrf.mxu1  ;;  %v1086_v47 = vld [vmem:[#allocation3] sm:$0xf]  ;;  %v637_v48 = vpop.f32.mrf.mxu0  ;;  %v1027_v49 = vld [vmem:[#allocation2] sm:$0xf] }
  0xef   : > { %710 = vst.msk [vmem:[#allocation3 + $0x4] sm:$0xf] %vm518_vm2, %v708_v44  ;;  %v1091_v50 = vsel %vm1032_vm3, %v1086_v47, 0  ;;  %642 = vst.msk [vmem:[#allocation2 + $0x4] sm:$0xf] %vm518_vm2, %v640_v45  ;;  %v1034_v51 = vsel %vm1032_vm3, %v1027_v49, 0 }
  0xf0   : > { %v2061_v52 = vpop.f32.mrf.mxu1  ;;  %2109 = vmatpush3.bf16.msra.mxu0 %v1091_v50  ;;  %v2053_v53 = vpop.f32.mrf.mxu0  ;;  %2103 = vmatpush3.bf16.msra.mxu1 %v1034_v51  ;;  %v2259_v50 = vld [vmem:[%s2808_s3 + $0x28] sm:$0xff]   ;;  %v2260_v51 = vld [vmem:[%s2808_s3 + $0x20] sm:$0xff]  }
  0xf1   : > { %2122 = vmatprep.subr.bf16.mxu0 %v2359_v0  ;;  %2114 = vmatprep.subr.bf16.mxu1 %v2359_v0 }
  0xf2   : > { %v2622_v54 = vpop.f32.mrf.mxu0  ;;  %v825_v12 = vpop.f32.mrf.mxu1 }
  0xf3   : > { %v826_v13 = vadd.f32 %v1905_v11, %v825_v12 }
  0xf4   : > { %v2068_v55 = vpop.f32.mrf.mxu0  ;;  %v2076_v14 = vpop.f32.mrf.mxu1 }
  0xf5   : > { %v831_v15 = vpack.c.bf16 %v826_v13, %v826_v13 }
  0xf6   : > { %v760_v56 = vpop.f32.mrf.mxu0  ;;  %v1264_v9 = vld [vmem:[#allocation3 + $0x4] sm:$0xf]  ;;  %v828_v16 = vpop.f32.mrf.mxu1  ;;  %v1206_v45 = vld [vmem:[#allocation2 + $0x4] sm:$0xf] }
  0xf7   : > { %v1269_v10 = vsel %vm1032_vm3, %v1264_v9, 0  ;;  %833 = vst.msk [vmem:[#allocation3 + $0x8] sm:$0xf] %vm518_vm2, %v831_v15  ;;  %v1211_v48 = vsel %vm1032_vm3, %v1206_v45, 0  ;;  %v2261_v16 = vld [vmem:[%s2808_s3 + $0x38] sm:$0xff]  }
  0xf8   : > { %v2069_v57 = vpop.f32.mrf.mxu0  ;;  %v2077_v17 = vpop.f32.mrf.mxu1 }
  0xf9   : > { %v2262_v17 = vld [vmem:[%s2808_s3 + $0x30] sm:$0xff]  }
  0xfa   : > { %v2624_v58 = vpop.f32.mrf.mxu0 }
  0xfc   : > { %v2084_v59 = vpop.f32.mrf.mxu0  ;;  %v948_v20 = vpop.f32.mrf.mxu1 }
  0xfd   : > { %v949_v21 = vadd.f32 %v1917_v19, %v948_v20 }
  0xfe   : > { %v883_v60 = vpop.f32.mrf.mxu0  ;;  %v2092_v22 = vpop.f32.mrf.mxu1  ;;  %v1448_v52 = vld [vmem:[#allocation3 + $0x8] sm:$0xf] }
  0xff   : > { %v954_v23 = vpack.c.bf16 %v949_v21, %v949_v21  ;;  %v1453_v53 = vsel %vm1032_vm3, %v1448_v52, 0 }
 0x100   : > { %v2085_v61 = vpop.f32.mrf.mxu0  ;;  %v951_v24 = vpop.f32.mrf.mxu1 }
 0x101   : > { %956 = vst.msk [vmem:[#allocation3 + $0xc] sm:$0xf] %vm518_vm2, %v954_v23 }
 0x102   : > { %v1019_v63 = vpop.f32.mrf.mxu0  ;;  %v2093_v25 = vpop.f32.mrf.mxu1 }
 0x103   : > { %v1020_v1 = vadd.f32 %v1921_v62, %v1019_v63 }
 0x104   : > { %v2100_v2 = vpop.f32.mrf.mxu0 }
 0x105   : > { %v1025_v3 = vmul.f32 0.35355338, %v1020_v1 }
 0x106   : > { %v1022_v4 = vpop.f32.mrf.mxu0 }
 0x107   : > { %v1026_v6 = vpack.c.bf16 %v1025_v3, %v1025_v3 }
 0x108   : > { %v2101_v7 = vpop.f32.mrf.mxu0  ;;  %v1632_v19 = vld [vmem:[#allocation3 + $0xc] sm:$0xf] }
 0x109   : > { %2105 = vmatmul.mubr.msk.bf16.vlgmr.msra.gmra.mxu1 %vm1028_vm4, %v1026_v6  ;;  %v1637_v20 = vsel %vm1032_vm3, %v1632_v19, 0 }
 0x10a   : > { %2115 = vmatpush3.bf16.msra.mxu1 %v2257_v5  ;;  %2118 = vmatprep.mubr.msk.bf16.mxu1 %vm2360_vm0, %v2359_v0 }
 0x10b   : > { %2116 = vmatprep.subr.bf16.mxu1 %v2359_v0 }
 0x10e   : > { %2117 = vmatpush3.bf16.msra.mxu1 %v2258_v8  ;;  %v1944_v8 = vld [vmem:[%s2809_s4 + $0x2] ss:$0 sm:$0xff] }
 0x10f   : > { %2128 = vmatprep.subr.bf16.mxu1 %v2359_v0 }
 0x111   : > { %2119 = vmatmul.mubr.msk.bf16.vlgmr.msra.gmra.mxu1 %vm473_vm1, %v2581_v18 }
 0x112   : > { %2129 = vmatpush3.bf16.msra.mxu1 %v1269_v10  ;;  %2130 = vmatprep.mubr.msk.bf16.mxu1 %vm2360_vm0, %v2359_v0 }
 0x113   : > { %2142 = vmatprep.subr.bf16.mxu1 %v2359_v0 }
 0x1c9   : > { %v1070_v26 = vpop.f32.mrf.mxu1 }
 0x1ca   : > { %v1076_v27 = vsel %vm1028_vm4, %v1070_v26, -inf }
 0x1cb   : > { %1077 = vmax.xlane.f32.xlu0 %v1076_v27  ;;  %v2106_v28 = vpop.f32.mrf.mxu1 }
 0x1cd   : > { %v1073_v29 = vpop.f32.mrf.mxu1 }
 0x1cf   : > { %v2107_v30 = vpop.f32.mrf.mxu1 }
 0x1d1   : > { %v1197_v32 = vpop.f32.mrf.mxu1 }
 0x1d2   : > { %v1198_v43 = vadd.f32 %v1932_v42, %v1197_v32 }
 0x1d3   : > { %v2120_v33 = vpop.f32.mrf.mxu1 }
 0x1d4   : > { %v1203_v47 = vmul.f32 0.35355338, %v1198_v43 }
 0x1d5   : > { %v1200_v34 = vpop.f32.mrf.mxu1 }
 0x1d6   : > { %v1204_v49 = vpack.c.bf16 %v1203_v47, %v1203_v47 }
 0x1d7   : > { %v2121_v35 = vpop.f32.mrf.mxu1 }
 0x1e1   : > { %717 = vperm.xlu0 %2243, %v1898_v31  }
 0x254   : > { %v1078_v36 = vpop.xlane.xlu0 %1077 }
 0x255   : > { %v1079_v37 = vsub.f32 %v1070_v26, %v1078_v36 }
 0x257   : > { %v1080_v38 = vmul.f32 1.442695, %v1079_v37 }
 0x259   : > { %2265 = vpow2.f32 %v1080_v38 }
 0x25c   : > { %v718_v39 = vpop.permute.xlu0 %717 }
 0x25d   : > { %v758_v40 = vadd.f32 %v2622_v54, %v718_v39 }
 0x25f   : > { %v763_v41 = vpack.c.bf16 %v758_v40, %v758_v40 }
 0x261   : > { %765 = vst.msk [vmem:[#allocation2 + $0x8] sm:$0xf] %vm518_vm2, %v763_v41  ;;  %v1956_v41 = vld [vmem:[%s2809_s4 + $0x3] ss:$0 sm:$0xff] }
 0x266   : > { %v2663_v44 = vpop.eup %2265 }
 0x267   : > { %v1085_v46 = vpack.c.bf16 %v2663_v44, %v2663_v44 }
 0x268   : > { %v1390_v11 = vld [vmem:[#allocation2 + $0x8] sm:$0xf] }
 0x269   : > { %2111 = vmatmul.mubr.msk.bf16.vlgmr.msra.gmra.mxu0 %vm1028_vm4, %v1085_v46  ;;  %v1395_v14 = vsel %vm1032_vm3, %v1390_v11, 0 }
 0x26a   : > { %2123 = vmatpush3.bf16.msra.mxu0 %v1211_v48  ;;  %2124 = vmatprep.mubr.msk.bf16.mxu0 %vm2360_vm0, %v2359_v0 }
 0x26b   : > { %2134 = vmatprep.subr.bf16.mxu0 %v2359_v0 }
 0x271   : > { %2125 = vmatmul.mubr.msk.bf16.vlgmr.msra.gmra.mxu0 %vm1028_vm4, %v1204_v49 }
 0x272   : > { %2135 = vmatpush3.bf16.msra.mxu0 %v2259_v50  ;;  %2138 = vmatprep.mubr.msk.bf16.mxu0 %vm2360_vm0, %v2359_v0 }
 0x273   : > { %2136 = vmatprep.subr.bf16.mxu0 %v2359_v0 }
 0x276   : > { %2137 = vmatpush3.bf16.msra.mxu0 %v2260_v51 }
 0x277   : > { %2148 = vmatprep.subr.bf16.mxu0 %v2359_v0 }
 0x279   : > { %2139 = vmatmul.mubr.msk.bf16.vlgmr.msra.gmra.mxu0 %vm473_vm1, %v2581_v18 }
 0x27a   : > { %2149 = vmatpush3.bf16.msra.mxu0 %v1453_v53  ;;  %2150 = vmatprep.mubr.msk.bf16.mxu0 %vm2360_vm0, %v2359_v0 }
 0x27b   : > { %2162 = vmatprep.subr.bf16.mxu0 %v2359_v0 }
 0x329   : > { %v2689_v54 = vpop.f32.mrf.mxu0 }
 0x32b   : > { %v2112_v55 = vpop.f32.mrf.mxu0 }
 0x32d   : > { %v1130_v56 = vpop.f32.mrf.mxu0 }
 0x32f   : > { %v2113_v57 = vpop.f32.mrf.mxu0 }
 0x331   : > { %v1247_v59 = vpop.f32.mrf.mxu0 }
 0x332   : > { %v1253_v60 = vsel %vm1028_vm4, %v1247_v59, -inf }
 0x333   : > { %1254 = vmax.xlane.f32.xlu1 %v1253_v60  ;;  %v2126_v61 = vpop.f32.mrf.mxu0 }
 0x335   : > { %v1250_v62 = vpop.f32.mrf.mxu0 }
 0x337   : > { %v2127_v63 = vpop.f32.mrf.mxu0 }
 0x339   : > { %v1381_v1 = vpop.f32.mrf.mxu0 }
 0x33a   : > { %v1382_v9 = vadd.f32 %v1944_v8, %v1381_v1 }
 0x33b   : > { %v2140_v2 = vpop.f32.mrf.mxu0 }
 0x33c   : > { %v1387_v13 = vmul.f32 0.35355338, %v1382_v9  ;;  %v1082_v9 = vsel %vm1028_vm4, %v2663_v44, 0.0 }
 0x33d   : > { %v1384_v3 = vpop.f32.mrf.mxu0 }
 0x33e   : > { %v1388_v15 = vpack.c.bf16 %v1387_v13, %v1387_v13 }
 0x33f   : > { %v2141_v4 = vpop.f32.mrf.mxu0 }
 0x3bc   : > { %v1255_v5 = vpop.xlane.xlu1 %1254 }
 0x3bd   : > { %v1256_v6 = vsub.f32 %v1247_v59, %v1255_v5 }
 0x3bf   : > { %v1257_v7 = vmul.f32 1.442695, %v1256_v6 }
 0x3c1   : > { %2267 = vpow2.f32 %v1257_v7 }
 0x3ce   : > { %v2268_v10 = vpop.eup %2267 }
 0x3cf   : > { %v1262_v12 = vpack.c.bf16 %v2268_v10, %v2268_v10  ;;  %v1259_v34 = vsel %vm1028_vm4, %v2268_v10, 0.0 }
 0x3d1   : > { %2131 = vmatmul.mubr.msk.bf16.vlgmr.msra.gmra.mxu1 %vm1028_vm4, %v1262_v12 }
 0x3d2   : > { %2143 = vmatpush3.bf16.msra.mxu1 %v1395_v14  ;;  %2144 = vmatprep.mubr.msk.bf16.mxu1 %vm2360_vm0, %v2359_v0 }
 0x3d3   : > { %2154 = vmatprep.subr.bf16.mxu1 %v2359_v0 }
 0x3d9   : > { %2145 = vmatmul.mubr.msk.bf16.vlgmr.msra.gmra.mxu1 %vm1028_vm4, %v1388_v15 }
 0x3da   : > { %2155 = vmatpush3.bf16.msra.mxu1 %v2261_v16  ;;  %2158 = vmatprep.mubr.msk.bf16.mxu1 %vm2360_vm0, %v2359_v0 }
 0x3db   : > { %2156 = vmatprep.subr.bf16.mxu1 %v2359_v0 }
 0x3de   : > { %2157 = vmatpush3.bf16.msra.mxu1 %v2262_v17 }
 0x3df   : > { %2168 = vmatprep.subr.bf16.mxu1 %v2359_v0 }
 0x3e1   : > { %2159 = vmatmul.mubr.msk.bf16.vlgmr.msra.gmra.mxu1 %vm473_vm1, %v2581_v18  ;;  %v1910_v18 = vld [vmem:[%s2811_s6 + $0x18] sm:$0xff] }
 0x3e2   : > { %2169 = vmatpush3.bf16.msra.mxu1 %v1637_v20  ;;  %2170 = vmatprep.mubr.msk.bf16.mxu1 %vm2360_vm0, %v2359_v0  ;;  %v2263_v20 = vld [vmem:[%s2814_s9 + $0x8] sm:$0xff]  }
 0x491   : > { %v1305_v21 = vpop.f32.mrf.mxu1 }
 0x493   : > { %v2132_v22 = vpop.f32.mrf.mxu1 }
 0x495   : > { %v1308_v23 = vpop.f32.mrf.mxu1 }
 0x497   : > { %v2133_v24 = vpop.f32.mrf.mxu1 }
 0x499   : > { %v1431_v25 = vpop.f32.mrf.mxu1 }
 0x49a   : > { %v1437_v26 = vsel %vm1028_vm4, %v1431_v25, -inf }
 0x49b   : > { %1438 = vmax.xlane.f32.xlu1 %v1437_v26  ;;  %v2146_v27 = vpop.f32.mrf.mxu1 }
 0x49d   : > { %v1434_v28 = vpop.f32.mrf.mxu1 }
 0x49f   : > { %v2147_v29 = vpop.f32.mrf.mxu1 }
 0x4a1   : > { %v1565_v30 = vpop.f32.mrf.mxu1 }
 0x4a2   : > { %v1566_v42 = vadd.f32 %v1956_v41, %v1565_v30 }
 0x4a3   : > { %v2160_v31 = vpop.f32.mrf.mxu1 }
 0x4a4   : > { %v1571_v47 = vmul.f32 0.35355338, %v1566_v42 }
 0x4a5   : > { %v1568_v32 = vpop.f32.mrf.mxu1 }
 0x4a7   : > { %v2161_v33 = vpop.f32.mrf.mxu1 }
 0x4ac   : > { %840 = vperm.xlu1 %2244, %v1910_v18  }
 0x4d0   : > { %1260 = vadd.xlane.f32.xlu1 %v1259_v34 }
 0x524   : > { %v1439_v35 = vpop.xlane.xlu1 %1438 }
 0x525   : > { %v1440_v36 = vsub.f32 %v1431_v25, %v1439_v35 }
 0x527   : > { %v1441_v37 = vmul.f32 1.442695, %v1440_v36 }
 0x528   : > { %v841_v38 = vpop.permute.xlu1 %840 }
 0x529   : > { %2269 = vpow2.f32 %v1441_v37  ;;  %v881_v39 = vadd.f32 %v2624_v58, %v841_v38  ;;  %v1572_v58 = vpack.c.bf16 %v1571_v47, %v1571_v47 }
 0x52b   : > { %v886_v40 = vpack.c.bf16 %v881_v39, %v881_v39 }
 0x52d   : > { %888 = vst.msk [vmem:[#allocation2 + $0xc] sm:$0xf] %vm518_vm2, %v886_v40 }
 0x534   : > { %v1574_v45 = vld [vmem:[#allocation2 + $0xc] sm:$0xf] }
 0x535   : > { %v1579_v48 = vsel %vm1032_vm3, %v1574_v45, 0 }
 0x536   : > { %v2270_v43 = vpop.eup %2269 }
 0x537   : > { %v1446_v46 = vpack.c.bf16 %v2270_v43, %v2270_v43  ;;  %v1443_v63 = vsel %vm1028_vm4, %v2270_v43, 0.0 }
 0x539   : > { %2151 = vmatmul.mubr.msk.bf16.vlgmr.msra.gmra.mxu0 %vm1028_vm4, %v1446_v46 }
 0x53a   : > { %2163 = vmatpush3.bf16.msra.mxu0 %v1579_v48  ;;  %2164 = vmatprep.mubr.msk.bf16.mxu0 %vm2360_vm0, %v2359_v0 }
 0x53b   : > { %2174 = vmatprep.subr.bf16.mxu0 %v2359_v0 }
 0x541   : > { %2165 = vmatmul.mubr.msk.bf16.vlgmr.msra.gmra.mxu0 %vm1028_vm4, %v1572_v58 }
 0x542   : > { %2178 = vmatprep.mubr.msk.bf16.mxu0 %vm2360_vm0, %v2359_v0  ;;  %2175 = vmatpush3.bf16.msra.mxu0 %v2263_v20 }
 0x543   : > { %2176 = vmatprep.subr.bf16.mxu0 %v2359_v0  ;;  %v1963_v0 = vld [vmem:[%s2815_s10] ss:$0 sm:$0xff] }
 0x559   : > { %v1261_v49 = vpop.xlane.xlu1 %1260 }
 0x55a   : > { %2271 = vrcp.f32 %v1261_v49 }
 0x567   : > { %v2272_v50 = vpop.eup %2271 }
 0x568   : > { %v1312_v51 = vmul.f32 %v2272_v50, %v1305_v21  ;;  %v2264_v21 = vld [vmem:[%s2814_s9] sm:$0xff]  }
 0x569   : > { %2177 = vmatpush3.bf16.msra.mxu0 %v2264_v21 }
 0x56a   : > { %v1972_v52 = vpack.c.bf16 %v1312_v51, %v1312_v51 }
 0x56c   : > { %1317 = vrot.lane.b32.xlu1 %v1972_v52, %s2362_s16  ;;  %s1773_s16 = sshll.u32 %s427_s15, 4  ;;  %s2760_s16 = int_to_ptr.vmem [resolvable:$true] %s1773_s16 }
 0x56d   : > { %s2281_s20 = scalar_lea.vmem %s2760_s16, 128 }
 0x56e   : > { %p2282_p12 = scmp.ne.s32.totalorder %s2760_s16, %s2281_s20 }
 0x570   : > { %p2283_p13 = pnand %p2282_p12, %p2466_p4 }
 0x572   : > { %p2284_p0 = pneg %p2283_p13 }
 0x5de   : > { %v1318_v19 = vpop.permute.xlu1 %1317 }
 0x5f9   : > { %v1489_v53 = vpop.f32.mrf.mxu0 }
 0x5fb   : > { %v2152_v55 = vpop.f32.mrf.mxu0 }
 0x5fd   : > { %v1492_v56 = vpop.f32.mrf.mxu0 }
 0x5ff   : > { %v2153_v57 = vpop.f32.mrf.mxu0 }
 0x601   : > { %v1615_v59 = vpop.f32.mrf.mxu0 }
 0x602   : > { %v1621_v60 = vsel %vm1028_vm4, %v1615_v59, -inf }
 0x603   : > { %1622 = vmax.xlane.f32.xlu0 %v1621_v60  ;;  %v2166_v61 = vpop.f32.mrf.mxu0 }
 0x605   : > { %v1618_v62 = vpop.f32.mrf.mxu0 }
 0x607   : > { %1444 = vadd.xlane.f32.xlu0 %v1443_v63  ;;  %v2167_v1 = vpop.f32.mrf.mxu0 }
 0x68c   : > { %v1623_v2 = vpop.xlane.xlu0 %1622 }
 0x68d   : > { %v1624_v3 = vsub.f32 %v1615_v59, %v1623_v2 }
 0x68f   : > { %v1625_v4 = vmul.f32 1.442695, %v1624_v3 }
 0x690   : > { %v1445_v8 = vpop.xlane.xlu0 %1444 }
 0x691   : > { %2273 = vpow2.f32 %v1625_v4 }
 0x692   : > { %2275 = vrcp.f32 %v1445_v8 }
 0x69e   : > { %v2274_v5 = vpop.eup %2273 }
 0x69f   : > { %v1627_v6 = vsel %vm1028_vm4, %v2274_v5, 0.0  ;;  %v1630_v7 = vpack.c.bf16 %v2274_v5, %v2274_v5  ;;  %v2276_v10 = vpop.eup %2275 }
 0x6a0   : > { %1628 = vadd.xlane.f32.xlu0 %v1627_v6  ;;  %v1496_v11 = vmul.f32 %v2276_v10, %v1489_v53 }
 0x6a1   : > { %2171 = vmatmul.mubr.msk.bf16.vlgmr.msra.gmra.mxu1 %vm1028_vm4, %v1630_v7 }
 0x6a2   : > { %v1973_v12 = vpack.c.bf16 %v1496_v11, %v1496_v11 }
 0x6a4   : > { %1083 = vadd.xlane.f32.xlu0 %v1082_v9 }
 0x6ba   : > { %1501 = vrot.lane.b32.xlu0 %v1973_v12, %s2363_s13 }
 0x729   : > { %v1629_v13 = vpop.xlane.xlu0 %1628 }
 0x72d   : > { %v1084_v14 = vpop.xlane.xlu0 %1083 }
 0x72e   : > { %2277 = vrcp.f32 %v1084_v14 }
 0x72f   : > { %2279 = vrcp.f32 %v1629_v13 }
 0x731   : > { %v1502_v44 = vpop.permute.xlu0 %1501 }
 0x73b   : > { %v2278_v15 = vpop.eup %2277 }
 0x73c   : > { %v1134_v16 = vmul.f32 %v2278_v15, %v2689_v54  ;;  %v2280_v54 = vpop.eup %2279 }
 0x73e   : > { %v1135_v17 = vpack.c.bf16 %v1134_v16, %v1134_v16 }
 0x740   : > { %1137 = vst.msk [vmem:[#allocation4] sm:$0xf] %vm518_vm2, %v1135_v17 }
 0x741   : > { %1321 = vst.msk [vmem:[#allocation4] sm:$0xf] %vm1320_vm5, %v1318_v19 }
 0x742   : > { %1505 = vst.msk [vmem:[#allocation4] sm:$0xf] %vm1504_vm6, %v1502_v44 }
 0x761   : > { %v1673_v22 = vpop.f32.mrf.mxu1 }
 0x762   : > { %v1680_v23 = vmul.f32 %v2280_v54, %v1673_v22 }
 0x763   : > { %v2172_v24 = vpop.f32.mrf.mxu1 }
 0x764   : > { %v1974_v25 = vpack.c.bf16 %v1680_v23, %v1680_v23 }
 0x765   : > { %v1676_v26 = vpop.f32.mrf.mxu1 }
 0x766   : > { %1685 = vrot.lane.b32.xlu1 %v1974_v25, %s2364_s23  ;;  %s2285_s23 = sshll.u32 %s2365_s25, 4  ;;  %s2286_s23 = int_to_ptr.vmem [resolvable:$false] %s2285_s23 }
 0x767   : > { %v2173_v27 = vpop.f32.mrf.mxu1  ;;  %s2287_s26 = scalar_lea.vmem %s2286_s23, 256  ;;  %p2288_p1 = scmp.lt.s32.totalorder %s2760_s16, %s2286_s23 }
 0x768   : > { %p2289_p2 = scmp.lt.s32.totalorder %s2287_s26, %s2281_s20 }
 0x76a   : > { %p2290_p3 = por %p2289_p2, %p2288_p1 }
 0x76c   : > { %p2291_p5 = pnand %p2290_p3, %p2284_p0 }
 0x7d8   : > { %v1686_v28 = vpop.permute.xlu1 %1685 }
 0x7d9   : > { %1689 = vst.msk [vmem:[#allocation4] sm:$0xf] %vm1688_vm7, %v1686_v28 }
 0x7e0   : > { %v1690_v29 = vld [vmem:[#allocation4] sm:$0xf] }
 0x7e1   : > { %2179 = vmatmul.mubr.msk.bf16.vlgmr.msra.gmra.mxu0 %vm473_vm1, %v1690_v29 }
 0x8a1   : > { %v1751_v18 = vpop.f32.mrf.mxu0 }
 0x8a2   : > { %v1752_v30 = vadd.f32 %v1963_v0, %v1751_v18 }
 0x8a3   : > { %v2180_v31 = vpop.f32.mrf.mxu0 }
 0x8a4   : > { %1757 = vst.msk [vmem:[%s427_s15] sm:$0xff] %vm473_vm1, %v1752_v30 }
 0x8a5   : > { %v1754_v32 = vpop.f32.mrf.mxu0 }
 0x8a6   : > { %2294 = shalt.err (!%p2291_p5)
}
 0x8a7   : > { %s2295_s28 = scalar_lea.hbm %s2758_s12, 128  ;;  %s2299_s14 = scalar_lea.hbm %s2816_s11, 256 }
 0x8a8   : > { %p2296_p6 = scmp.ne.s32.totalorder %s2758_s12, %s2295_s28  ;;  %p2300_p10 = scmp.lt.s32.totalorder %s2758_s12, %s2816_s11 }
 0x8a9   : > { %p2301_p11 = scmp.lt.s32.totalorder %s2299_s14, %s2295_s28 }
 0x8aa   : > { %p2297_p7 = pnand %p2296_p6, %p2466_p4 }
 0x8ab   : > { %p2302_p12 = por %p2301_p11, %p2300_p10 }
 0x8ac   : > { %p2298_p9 = pneg %p2297_p7 }
 0x8ae   : > { %p2303_p13 = pnand %p2302_p12, %p2298_p9 }
 0x8b0   : > { %2306 = shalt.err (!%p2303_p13)
}
 0x8b1   : > { %2182 = dma.vmem_to_hbm [thread:$0]  (%p2466_p4), %s2760_s16, 128, %s2758_s12, %s1759_s30   ;;  %v2181_v33 = vpop.f32.mrf.mxu0 }
 0x8b2 PF: > { %p2188_p0 = scmp.ge.s32.totalorder %s2357_s22, 2  ;;  %s1785_s21 = sand.u32 1, %s2337_s17  }
 0x8b3   : > { %s1786_s20 = scalar_lea.sflag [#allocation6], %s1785_s21 }
 0x8b4   : > { %p2185_p1 = pnand %p2188_p0, %p2473_p8 }
 0x8b6   : > { %p2186_p2 = pneg %p2185_p1 }
 0x8b8   : > { %2332 = dma.done.wait (%p2186_p2), %s1786_s20, 128  }
 0x8b9   : > { %2334 = vsyncadd (%p2186_p2), %s1786_s20, 4294967168  ;;  %s24_s22 = sadd.s32 1, %s2357_s22   ;;  %s2826_s27 = sld [smem:[#allocation8_spill]] }
 0x8ba   : > { %p21_p3 = scmp.ge.s32.totalorder %s24_s22, 4   ;;  %s2827_s19 = sld [smem:[#allocation11_spill]] }
 0x8bb   : > { %s2828_s20 = sld [smem:[#allocation9_spill]]  ;;  %s2830_s17 = smov %s2341_s18 }
 0x8bc   : > { %s2829_s21 = sld [smem:[#allocation10_spill]]  ;;  %23 = sbr.rel (!%p21_p3) target bundleno = 4 (0x4), region = 139 }
 0x8bf   : > { %s2831_s18 = smov %s2826_s27 }
 0x8c1   :  { %1791 = vsyncpa [#allocation6], 1 }
 0x8c2   :  { %1793 = vsyncpa [#allocation6 + $0x1], 1 }

</bundles_post_ra>
